<compile_context>
chip_gen: v5e
topology: v5e:2x2
jax: 0.10.0
libtpu: 0.0.40
codegen_flags: <defaults>
</compile_context>

<pallas_src>
import functools

import numpy as np

import jax
import jax.numpy as jnp
from jax import lax
from jax.experimental import pallas as pl
from jax.experimental.pallas import tpu as pltpu

LANES = 128        # padded channel width (lane-dense stores, full MXU N dim)
CIN1_PAD = 8       # conv1 input channels padded 3 -> 8 (sublane aligned)


# ---------------------------------------------------------------------------
# Static shape bookkeeping for the "full-resolution, row-flattened" layout.
#
# Intermediates (conv1/conv2 outputs, 2x2 window maxima) are 2-D (rows, 128)
# arrays where row r maps to spatial position (r // W, r % W) of the *input*
# resolution.  A k x k valid conv is then k*k shifted contiguous row-slices
# (shift = i*W + j), each a (rows, K) x (K, 128) GEMM.  Rows whose w >=
# valid-width hold finite garbage that is never read by any valid consumer
# (the extents below guarantee it).  The same trick is reused at the pooled
# HPxHP resolution for conv3.
# ---------------------------------------------------------------------------
def _derive_dims(H, W):
    assert H == W, "kernel assumes square inputs"
    K1, K2, K3 = 7, 3, 3
    H1 = H - K1 + 1                      # conv1 valid size
    H2 = H1 - K2 + 1                     # conv2 valid size
    assert H2 > 0 and H2 % 2 == 0
    HP = H2 // 2                         # size after first max-pool
    H3 = HP - K3 + 1                     # conv3 valid size
    assert H3 > 0 and H3 % 2 == 0
    HQ = H3 // 2                         # size after second max-pool

    MMF2 = 2 * (HQ - 1) * HP + 2 * (HQ - 1) + 1   # rows of window-max #2
    M3 = MMF2 + HP + 1                            # conv3 output rows
    MMF1 = 2 * (HP - 1) * W + 2 * (HP - 1) + 1    # rows of window-max #1
    M2 = MMF1 + W + 1                             # conv2 output rows
    M1 = M2 + (K2 - 1) * W + (K2 - 1)             # conv1 output rows
    M0 = M1 + (K1 - 1) * W + (K1 - 1)             # input rows consumed
    assert M0 == H * W                            # slices never go OOB
    assert M3 + (K3 - 1) * HP + (K3 - 1) == HP * HP
    return dict(K1=K1, K2=K2, K3=K3, W=W, HP=HP, HQ=HQ,
                M1=M1, M2=M2, M3=M3, MMF1=MMF1, MMF2=MMF2)


def _pool1_select(dims):
    # One-hot (HP*HP, MMF1) matrix selecting rows 2h'*W + 2w' of the 2x2
    # window-max map = the stride-2 subsample of the first max-pool (MXU).
    HP, W, MMF1 = dims["HP"], dims["W"], dims["MMF1"]
    s1 = np.zeros((HP * HP, MMF1), np.float32)
    for hh in range(HP):
        for ww in range(HP):
            s1[hh * HP + ww, 2 * hh * W + 2 * ww] = 1.0
    return jnp.asarray(s1, dtype=jnp.bfloat16)


# ------------------------------ fused kernel -------------------------------
def _fused_forward_kernel(xj_ref, w1_ref, b1_ref, w2_ref, b2_ref, w3_ref,
                          b3_ref, s1_ref, fcw_ref, fcb_ref, o_ref, *, dims):
    K1, K2, K3 = dims["K1"], dims["K2"], dims["K3"]
    W, HP, HQ = dims["W"], dims["HP"], dims["HQ"]
    M1, M2, M3 = dims["M1"], dims["M2"], dims["M3"]
    MMF1, MMF2 = dims["MMF1"], dims["MMF2"]
    f32, bf16 = jnp.float32, jnp.bfloat16
    K1C = K1 * CIN1_PAD                                       # 56

    def conv_taps(x_val, w_ref_, b_ref_, shifts, m_out, kdim):
        # Shifted-slice GEMMs (in-kernel im2col), bf16 x bf16 -> f32 acc.
        acc = jnp.zeros((m_out, LANES), f32)
        for t, shift in enumerate(shifts):
            patch = x_val[shift:shift + m_out, :]
            wtap = w_ref_[t * kdim:(t + 1) * kdim, :]
            acc = acc + jnp.dot(patch, wtap, preferred_element_type=f32)
        return jnp.maximum(acc + b_ref_[...], 0.0)            # bias+ReLU, f32

    def window_max(y, row_stride, m_out):
        # 2x2-window running max at full resolution (4 shifted slices).
        return jnp.maximum(
            jnp.maximum(y[0:m_out, :], y[1:m_out + 1, :]),
            jnp.maximum(y[row_stride:row_stride + m_out, :],
                        y[row_stride + 1:row_stride + 1 + m_out, :]))

    xj = xj_ref[...]                                  # (H*W-6, 56) bf16
    # conv1: kernel-width axis folded into K -> 7 GEMMs with K=56.
    c1 = conv_taps(xj, w1_ref, b1_ref,
                   [i * W for i in range(K1)], M1, K1C).astype(bf16)
    # conv2: 9 taps, K=128.
    c2 = conv_taps(c1, w2_ref, b2_ref,
                   [i * W + j for i in range(K2) for j in range(K2)],
                   M2, LANES)                                 # f32
    mf1 = window_max(c2, W, MMF1)                             # f32
    # stride-2 subsample of the window maxima via a one-hot matmul (MXU).
    p1 = jnp.dot(s1_ref[...], mf1.astype(bf16),
                 preferred_element_type=f32).astype(bf16)     # (HP*HP, 128)
    # conv3: 9 taps, K=128, on the pooled HPxHP layout.
    c3 = conv_taps(p1, w3_ref, b3_ref,
                   [i * HP + j for i in range(K3) for j in range(K3)],
                   M3, LANES)                                 # f32
    mf2 = window_max(c3, HP, MMF2)                            # f32

    # second max-pool (disjoint 2x2 blocks) + adaptive average pool (1,1).
    rows = [2 * hh * HP + 2 * ww for hh in range(HQ) for ww in range(HQ)]
    feat = mf2[rows[0]:rows[0] + 1, :]
    for r in rows[1:]:
        feat = feat + mf2[r:r + 1, :]
    feat = feat * (1.0 / len(rows))                           # (1, 128) f32

    # fc (f32: tiny, keeps the final layer at full precision)
    o_ref[...] = (jnp.dot(feat, fcw_ref[...], preferred_element_type=f32)
                  + fcb_ref[...])


def _fused_call(xj, s1, packed, dims, num_classes):
    N, HW6, KJ = xj.shape
    kernel = functools.partial(_fused_forward_kernel, dims=dims)
    out = pl.pallas_call(
        kernel,
        grid=(N,),
        in_specs=[
            pl.BlockSpec((None, HW6, KJ), lambda n: (n, 0, 0)),     # xj
            pl.BlockSpec(packed["w1"].shape, lambda n: (0, 0)),
            pl.BlockSpec(packed["b1"].shape, lambda n: (0, 0)),
            pl.BlockSpec(packed["w2"].shape, lambda n: (0, 0)),
            pl.BlockSpec(packed["b2"].shape, lambda n: (0, 0)),
            pl.BlockSpec(packed["w3"].shape, lambda n: (0, 0)),
            pl.BlockSpec(packed["b3"].shape, lambda n: (0, 0)),
            pl.BlockSpec(s1.shape, lambda n: (0, 0)),
            pl.BlockSpec(packed["fc_w"].shape, lambda n: (0, 0)),
            pl.BlockSpec(packed["fc_b"].shape, lambda n: (0, 0)),
        ],
        out_specs=pl.BlockSpec((None, 1, LANES), lambda n: (n, 0, 0)),
        out_shape=jax.ShapeDtypeStruct((N, 1, LANES), jnp.float32),
        compiler_params=pltpu.CompilerParams(
            dimension_semantics=("parallel",)),
    )(xj, packed["w1"], packed["b1"], packed["w2"], packed["b2"],
      packed["w3"], packed["b3"], s1, packed["fc_w"], packed["fc_b"])
    return out[:, 0, :num_classes]


# --------------------------- parameter packing ------------------------------
def pack_params(params, num_classes):
    """One-time repack: pad channels to 128 lanes, cast conv weights to bf16,
    lay taps out as (k*k*Cin_pad, 128) row-major in (i, j, c) so the kernel
    can slice either per (i, j) tap (K=Cin_pad) or per kernel row i
    (K=k*Cin_pad, conv1's width-folded GEMMs)."""
    def pack_w(w, cin_pad):
        KH, KW, Cin, Cout = w.shape
        wpad = jnp.pad(w, ((0, 0), (0, 0),
                           (0, cin_pad - Cin), (0, LANES - Cout)))
        return wpad.reshape(KH * KW * cin_pad, LANES).astype(jnp.bfloat16)

    def pack_b(b):
        return jnp.pad(b, (0, LANES - b.shape[0])).reshape(1, LANES) \
                  .astype(jnp.float32)

    fc_w = jnp.pad(params["fc_w"],
                   ((0, 0), (0, LANES - num_classes))).astype(jnp.float32)
    fc_b = jnp.pad(params["fc_b"],
                   (0, LANES - num_classes)).reshape(1, LANES) \
              .astype(jnp.float32)
    return {
        "w1": pack_w(params["w1"], CIN1_PAD), "b1": pack_b(params["b1"]),
        "w2": pack_w(params["w2"], LANES),    "b2": pack_b(params["b2"]),
        "w3": pack_w(params["w3"], LANES),    "b3": pack_b(params["b3"]),
        "fc_w": fc_w, "fc_b": fc_b,
    }


# ------------------------------ full model ----------------------------------
def base_model_forward(x_nchw, packed, num_classes):
    # dropout1/dropout2 are identity under inference (model.eval()) semantics.
    N, Cin, H, W = x_nchw.shape
    dims = _derive_dims(H, W)
    K1 = dims["K1"]
    # NCHW -> NHWC, pad channels 3->8, flatten spatial row-major per image.
    x = jnp.transpose(x_nchw, (0, 2, 3, 1)).astype(jnp.float32)
    x = jnp.pad(x, ((0, 0), (0, 0), (0, 0), (0, CIN1_PAD - Cin)))
    xf = x.reshape(N, H * W, CIN1_PAD)
    # Width-axis im2col for conv1 (layout plumbing, done once by XLA):
    # xj[n, r, j*8 + c] = x[n, r + j, c]  ->  7 wide-K GEMMs in the kernel.
    HW6 = H * W - (K1 - 1)
    xj = jnp.concatenate([xf[:, j:j + HW6, :] for j in range(K1)],
                         axis=-1).astype(jnp.bfloat16)         # (N, HW-6, 56)
    s1 = _pool1_select(dims)              # static -> constant-folded by jit
    return _fused_call(xj, s1, packed, dims, num_classes)


# --------------------------- pure-JAX reference ------------------------------
def reference_forward(x_nchw, params):
    dn = ("NHWC", "HWIO", "NHWC")
    hi = lax.Precision.HIGHEST
    x = jnp.transpose(x_nchw, (0, 2, 3, 1)).astype(jnp.float32)
    y = lax.conv_general_dilated(x, params["w1"], (1, 1), "VALID",
                                 dimension_numbers=dn, precision=hi)
    y = jax.nn.relu(y + params["b1"])
    y = lax.conv_general_dilated(y, params["w2"], (1, 1), "VALID",
                                 dimension_numbers=dn, precision=hi)
    y = jax.nn.relu(y + params["b2"])
    y = lax.reduce_window(y, -jnp.inf, lax.max, (1, 2, 2, 1), (1, 2, 2, 1),
                          "VALID")
    y = lax.conv_general_dilated(y, params["w3"], (1, 1), "VALID",
                                 dimension_numbers=dn, precision=hi)
    y = jax.nn.relu(y + params["b3"])
    y = lax.reduce_window(y, -jnp.inf, lax.max, (1, 2, 2, 1), (1, 2, 2, 1),
                          "VALID")
    feat = jnp.mean(y, axis=(1, 2))
    return jnp.dot(feat, params["fc_w"], precision=hi) + params["fc_b"]


def init_params(key, num_classes):
    ks = jax.random.split(key, 8)

    def u(k, shape, fan_in):
        bound = 1.0 / (fan_in ** 0.5)
        return jax.random.uniform(k, shape, jnp.float32, -bound, bound)

    return {
        "w1": u(ks[0], (7, 7, 3, 32), 7 * 7 * 3),
        "b1": u(ks[1], (32,), 7 * 7 * 3),
        "w2": u(ks[2], (3, 3, 32, 64), 3 * 3 * 32),
        "b2": u(ks[3], (64,), 3 * 3 * 32),
        "w3": u(ks[4], (3, 3, 64, 128), 3 * 3 * 64),
        "b3": u(ks[5], (128,), 3 * 3 * 64),
        "fc_w": u(ks[6], (128, num_classes), 128),
        "fc_b": u(ks[7], (num_classes,), 128),
    }


if __name__ == "__main__":
    key = jax.random.PRNGKey(0)
    pkey, xkey = jax.random.split(key)
    num_classes = 8
    params = init_params(pkey, num_classes)
    packed = pack_params(params, num_classes)

    # Small NCHW input (PyTorch convention): 20x20 -> 14 -> 12 -> 6 -> 4 -> 2.
    x = jax.random.normal(xkey, (2, 3, 20, 20), jnp.float32)

    fwd = jax.jit(functools.partial(base_model_forward,
                                    num_classes=num_classes))
    out = fwd(x, packed)
    jax.block_until_ready(out)
    assert out.shape == (2, num_classes) and out.dtype == jnp.float32
    assert bool(jnp.all(jnp.isfinite(out)))

    # Correctness vs a pure-JAX f32 reference (kernel feeds bf16 into the MXU
    # with f32 accumulation -> allow a small tolerance).
    ref = reference_forward(x, params)
    err = float(jnp.max(jnp.abs(out - ref)))
    tol = 0.08 * float(jnp.max(jnp.abs(ref))) + 2e-2
    assert err <= tol, f"max abs err {err} > tol {tol}"

    print("KERNEL_OK")
</pallas_src>

<mosaic_0001>
module attributes {stable_mosaic.version = 11 : i64} {
  func.func @_fused_forward_kernel(%arg0: i32, %arg1: memref<1x394x56xbf16, #tpu.memory_space<vmem>>, %arg2: memref<392x128xbf16, #tpu.memory_space<vmem>>, %arg3: memref<1x128xf32, #tpu.memory_space<vmem>>, %arg4: memref<1152x128xbf16, #tpu.memory_space<vmem>>, %arg5: memref<1x128xf32, #tpu.memory_space<vmem>>, %arg6: memref<1152x128xbf16, #tpu.memory_space<vmem>>, %arg7: memref<1x128xf32, #tpu.memory_space<vmem>>, %arg8: memref<36x211xbf16, #tpu.memory_space<vmem>>, %arg9: memref<128x128xf32, #tpu.memory_space<vmem>>, %arg10: memref<1x128xf32, #tpu.memory_space<vmem>>, %arg11: memref<1x1x128xf32, #tpu.memory_space<vmem>>) attributes {dimension_semantics = [#tpu.dimension_semantics<parallel>], iteration_bounds = array<i64: 2>, scalar_prefetch = 0 : i64, scratch_operands = 0 : i64, tpu.core_type = #tpu.core_type<tc>, window_params = [{transform_indices = @transform_0, window_bounds = array<i64: 1, 394, 56>}, {pipeline_mode = #tpu.pipeline_mode<synchronous>, transform_indices = @transform_1, window_bounds = array<i64: 392, 128>}, {pipeline_mode = #tpu.pipeline_mode<synchronous>, transform_indices = @transform_2, window_bounds = array<i64: 1, 128>}, {pipeline_mode = #tpu.pipeline_mode<synchronous>, transform_indices = @transform_3, window_bounds = array<i64: 1152, 128>}, {pipeline_mode = #tpu.pipeline_mode<synchronous>, transform_indices = @transform_4, window_bounds = array<i64: 1, 128>}, {pipeline_mode = #tpu.pipeline_mode<synchronous>, transform_indices = @transform_5, window_bounds = array<i64: 1152, 128>}, {pipeline_mode = #tpu.pipeline_mode<synchronous>, transform_indices = @transform_6, window_bounds = array<i64: 1, 128>}, {pipeline_mode = #tpu.pipeline_mode<synchronous>, transform_indices = @transform_7, window_bounds = array<i64: 36, 211>}, {pipeline_mode = #tpu.pipeline_mode<synchronous>, transform_indices = @transform_8, window_bounds = array<i64: 128, 128>}, {pipeline_mode = #tpu.pipeline_mode<synchronous>, transform_indices = @transform_9, window_bounds = array<i64: 1, 128>}, {transform_indices = @transform_10, window_bounds = array<i64: 1, 1, 128>}]} {
    %c0 = arith.constant 0 : index
    %c0_0 = arith.constant 0 : index
    %c0_1 = arith.constant 0 : index
    %0 = vector.load %arg1[%c0, %c0_0, %c0_1] : memref<1x394x56xbf16, #tpu.memory_space<vmem>>, vector<1x394x56xbf16>
    %1 = vector.shape_cast %0 : vector<1x394x56xbf16> to vector<394x56xbf16>
    %cst = arith.constant 0.000000e+00 : f32
    %2 = vector.broadcast %cst : f32 to vector<274x128xf32>
    %3 = vector.extract_strided_slice %1 {offsets = [0, 0], sizes = [274, 56], strides = [1, 1]} : vector<394x56xbf16> to vector<274x56xbf16>
    %c0_2 = arith.constant 0 : index
    %c0_3 = arith.constant 0 : index
    %4 = vector.load %arg2[%c0_2, %c0_3] : memref<392x128xbf16, #tpu.memory_space<vmem>>, vector<56x128xbf16>
    %cst_4 = arith.constant dense<0.000000e+00> : vector<274x128xf32>
    %5 = tpu.matmul %3, %4, %cst_4 {dimension_numbers = #tpu.dot_dimension_numbers<[1], [0], [0], [1], [0, 0, 1, 1], [], []>} : vector<274x56xbf16>, vector<56x128xbf16>, vector<274x128xf32> -> vector<274x128xf32>
    %6 = arith.addf %2, %5 : vector<274x128xf32>
    %7 = vector.extract_strided_slice %1 {offsets = [20, 0], sizes = [274, 56], strides = [1, 1]} : vector<394x56xbf16> to vector<274x56xbf16>
    %c56 = arith.constant 56 : index
    %c0_5 = arith.constant 0 : index
    %8 = vector.load %arg2[%c56, %c0_5] : memref<392x128xbf16, #tpu.memory_space<vmem>>, vector<56x128xbf16>
    %cst_6 = arith.constant dense<0.000000e+00> : vector<274x128xf32>
    %9 = tpu.matmul %7, %8, %cst_6 {dimension_numbers = #tpu.dot_dimension_numbers<[1], [0], [0], [1], [0, 0, 1, 1], [], []>} : vector<274x56xbf16>, vector<56x128xbf16>, vector<274x128xf32> -> vector<274x128xf32>
    %10 = arith.addf %6, %9 : vector<274x128xf32>
    %11 = vector.extract_strided_slice %1 {offsets = [40, 0], sizes = [274, 56], strides = [1, 1]} : vector<394x56xbf16> to vector<274x56xbf16>
    %c112 = arith.constant 112 : index
    %c0_7 = arith.constant 0 : index
    %12 = vector.load %arg2[%c112, %c0_7] : memref<392x128xbf16, #tpu.memory_space<vmem>>, vector<56x128xbf16>
    %cst_8 = arith.constant dense<0.000000e+00> : vector<274x128xf32>
    %13 = tpu.matmul %11, %12, %cst_8 {dimension_numbers = #tpu.dot_dimension_numbers<[1], [0], [0], [1], [0, 0, 1, 1], [], []>} : vector<274x56xbf16>, vector<56x128xbf16>, vector<274x128xf32> -> vector<274x128xf32>
    %14 = arith.addf %10, %13 : vector<274x128xf32>
    %15 = vector.extract_strided_slice %1 {offsets = [60, 0], sizes = [274, 56], strides = [1, 1]} : vector<394x56xbf16> to vector<274x56xbf16>
    %c168 = arith.constant 168 : index
    %c0_9 = arith.constant 0 : index
    %16 = vector.load %arg2[%c168, %c0_9] : memref<392x128xbf16, #tpu.memory_space<vmem>>, vector<56x128xbf16>
    %cst_10 = arith.constant dense<0.000000e+00> : vector<274x128xf32>
    %17 = tpu.matmul %15, %16, %cst_10 {dimension_numbers = #tpu.dot_dimension_numbers<[1], [0], [0], [1], [0, 0, 1, 1], [], []>} : vector<274x56xbf16>, vector<56x128xbf16>, vector<274x128xf32> -> vector<274x128xf32>
    %18 = arith.addf %14, %17 : vector<274x128xf32>
    %19 = vector.extract_strided_slice %1 {offsets = [80, 0], sizes = [274, 56], strides = [1, 1]} : vector<394x56xbf16> to vector<274x56xbf16>
    %c224 = arith.constant 224 : index
    %c0_11 = arith.constant 0 : index
    %20 = vector.load %arg2[%c224, %c0_11] : memref<392x128xbf16, #tpu.memory_space<vmem>>, vector<56x128xbf16>
    %cst_12 = arith.constant dense<0.000000e+00> : vector<274x128xf32>
    %21 = tpu.matmul %19, %20, %cst_12 {dimension_numbers = #tpu.dot_dimension_numbers<[1], [0], [0], [1], [0, 0, 1, 1], [], []>} : vector<274x56xbf16>, vector<56x128xbf16>, vector<274x128xf32> -> vector<274x128xf32>
    %22 = arith.addf %18, %21 : vector<274x128xf32>
    %23 = vector.extract_strided_slice %1 {offsets = [100, 0], sizes = [274, 56], strides = [1, 1]} : vector<394x56xbf16> to vector<274x56xbf16>
    %c280 = arith.constant 280 : index
    %c0_13 = arith.constant 0 : index
    %24 = vector.load %arg2[%c280, %c0_13] : memref<392x128xbf16, #tpu.memory_space<vmem>>, vector<56x128xbf16>
    %cst_14 = arith.constant dense<0.000000e+00> : vector<274x128xf32>
    %25 = tpu.matmul %23, %24, %cst_14 {dimension_numbers = #tpu.dot_dimension_numbers<[1], [0], [0], [1], [0, 0, 1, 1], [], []>} : vector<274x56xbf16>, vector<56x128xbf16>, vector<274x128xf32> -> vector<274x128xf32>
    %26 = arith.addf %22, %25 : vector<274x128xf32>
    %27 = vector.extract_strided_slice %1 {offsets = [120, 0], sizes = [274, 56], strides = [1, 1]} : vector<394x56xbf16> to vector<274x56xbf16>
    %c336 = arith.constant 336 : index
    %c0_15 = arith.constant 0 : index
    %28 = vector.load %arg2[%c336, %c0_15] : memref<392x128xbf16, #tpu.memory_space<vmem>>, vector<56x128xbf16>
    %cst_16 = arith.constant dense<0.000000e+00> : vector<274x128xf32>
    %29 = tpu.matmul %27, %28, %cst_16 {dimension_numbers = #tpu.dot_dimension_numbers<[1], [0], [0], [1], [0, 0, 1, 1], [], []>} : vector<274x56xbf16>, vector<56x128xbf16>, vector<274x128xf32> -> vector<274x128xf32>
    %30 = arith.addf %26, %29 : vector<274x128xf32>
    %c0_17 = arith.constant 0 : index
    %c0_18 = arith.constant 0 : index
    %31 = vector.load %arg3[%c0_17, %c0_18] : memref<1x128xf32, #tpu.memory_space<vmem>>, vector<1x128xf32>
    %32 = vector.broadcast %31 : vector<1x128xf32> to vector<274x128xf32>
    %33 = arith.addf %30, %32 : vector<274x128xf32>
    %cst_19 = arith.constant 0.000000e+00 : f32
    %34 = vector.broadcast %cst_19 : f32 to vector<274x128xf32>
    %35 = arith.maximumf %33, %34 : vector<274x128xf32>
    %36 = arith.truncf %35 : vector<274x128xf32> to vector<274x128xbf16>
    %cst_20 = arith.constant 0.000000e+00 : f32
    %37 = vector.broadcast %cst_20 : f32 to vector<232x128xf32>
    %38 = vector.extract_strided_slice %36 {offsets = [0, 0], sizes = [232, 128], strides = [1, 1]} : vector<274x128xbf16> to vector<232x128xbf16>
    %c0_21 = arith.constant 0 : index
    %c0_22 = arith.constant 0 : index
    %39 = vector.load %arg4[%c0_21, %c0_22] : memref<1152x128xbf16, #tpu.memory_space<vmem>>, vector<128x128xbf16>
    %cst_23 = arith.constant dense<0.000000e+00> : vector<232x128xf32>
    %40 = tpu.matmul %38, %39, %cst_23 {dimension_numbers = #tpu.dot_dimension_numbers<[1], [0], [0], [1], [0, 0, 1, 1], [], []>} : vector<232x128xbf16>, vector<128x128xbf16>, vector<232x128xf32> -> vector<232x128xf32>
    %41 = arith.addf %37, %40 : vector<232x128xf32>
    %42 = vector.extract_strided_slice %36 {offsets = [1, 0], sizes = [232, 128], strides = [1, 1]} : vector<274x128xbf16> to vector<232x128xbf16>
    %c128 = arith.constant 128 : index
    %c0_24 = arith.constant 0 : index
    %43 = vector.load %arg4[%c128, %c0_24] : memref<1152x128xbf16, #tpu.memory_space<vmem>>, vector<128x128xbf16>
    %cst_25 = arith.constant dense<0.000000e+00> : vector<232x128xf32>
    %44 = tpu.matmul %42, %43, %cst_25 {dimension_numbers = #tpu.dot_dimension_numbers<[1], [0], [0], [1], [0, 0, 1, 1], [], []>} : vector<232x128xbf16>, vector<128x128xbf16>, vector<232x128xf32> -> vector<232x128xf32>
    %45 = arith.addf %41, %44 : vector<232x128xf32>
    %46 = vector.extract_strided_slice %36 {offsets = [2, 0], sizes = [232, 128], strides = [1, 1]} : vector<274x128xbf16> to vector<232x128xbf16>
    %c256 = arith.constant 256 : index
    %c0_26 = arith.constant 0 : index
    %47 = vector.load %arg4[%c256, %c0_26] : memref<1152x128xbf16, #tpu.memory_space<vmem>>, vector<128x128xbf16>
    %cst_27 = arith.constant dense<0.000000e+00> : vector<232x128xf32>
    %48 = tpu.matmul %46, %47, %cst_27 {dimension_numbers = #tpu.dot_dimension_numbers<[1], [0], [0], [1], [0, 0, 1, 1], [], []>} : vector<232x128xbf16>, vector<128x128xbf16>, vector<232x128xf32> -> vector<232x128xf32>
    %49 = arith.addf %45, %48 : vector<232x128xf32>
    %50 = vector.extract_strided_slice %36 {offsets = [20, 0], sizes = [232, 128], strides = [1, 1]} : vector<274x128xbf16> to vector<232x128xbf16>
    %c384 = arith.constant 384 : index
    %c0_28 = arith.constant 0 : index
    %51 = vector.load %arg4[%c384, %c0_28] : memref<1152x128xbf16, #tpu.memory_space<vmem>>, vector<128x128xbf16>
    %cst_29 = arith.constant dense<0.000000e+00> : vector<232x128xf32>
    %52 = tpu.matmul %50, %51, %cst_29 {dimension_numbers = #tpu.dot_dimension_numbers<[1], [0], [0], [1], [0, 0, 1, 1], [], []>} : vector<232x128xbf16>, vector<128x128xbf16>, vector<232x128xf32> -> vector<232x128xf32>
    %53 = arith.addf %49, %52 : vector<232x128xf32>
    %54 = vector.extract_strided_slice %36 {offsets = [21, 0], sizes = [232, 128], strides = [1, 1]} : vector<274x128xbf16> to vector<232x128xbf16>
    %c512 = arith.constant 512 : index
    %c0_30 = arith.constant 0 : index
    %55 = vector.load %arg4[%c512, %c0_30] : memref<1152x128xbf16, #tpu.memory_space<vmem>>, vector<128x128xbf16>
    %cst_31 = arith.constant dense<0.000000e+00> : vector<232x128xf32>
    %56 = tpu.matmul %54, %55, %cst_31 {dimension_numbers = #tpu.dot_dimension_numbers<[1], [0], [0], [1], [0, 0, 1, 1], [], []>} : vector<232x128xbf16>, vector<128x128xbf16>, vector<232x128xf32> -> vector<232x128xf32>
    %57 = arith.addf %53, %56 : vector<232x128xf32>
    %58 = vector.extract_strided_slice %36 {offsets = [22, 0], sizes = [232, 128], strides = [1, 1]} : vector<274x128xbf16> to vector<232x128xbf16>
    %c640 = arith.constant 640 : index
    %c0_32 = arith.constant 0 : index
    %59 = vector.load %arg4[%c640, %c0_32] : memref<1152x128xbf16, #tpu.memory_space<vmem>>, vector<128x128xbf16>
    %cst_33 = arith.constant dense<0.000000e+00> : vector<232x128xf32>
    %60 = tpu.matmul %58, %59, %cst_33 {dimension_numbers = #tpu.dot_dimension_numbers<[1], [0], [0], [1], [0, 0, 1, 1], [], []>} : vector<232x128xbf16>, vector<128x128xbf16>, vector<232x128xf32> -> vector<232x128xf32>
    %61 = arith.addf %57, %60 : vector<232x128xf32>
    %62 = vector.extract_strided_slice %36 {offsets = [40, 0], sizes = [232, 128], strides = [1, 1]} : vector<274x128xbf16> to vector<232x128xbf16>
    %c768 = arith.constant 768 : index
    %c0_34 = arith.constant 0 : index
    %63 = vector.load %arg4[%c768, %c0_34] : memref<1152x128xbf16, #tpu.memory_space<vmem>>, vector<128x128xbf16>
    %cst_35 = arith.constant dense<0.000000e+00> : vector<232x128xf32>
    %64 = tpu.matmul %62, %63, %cst_35 {dimension_numbers = #tpu.dot_dimension_numbers<[1], [0], [0], [1], [0, 0, 1, 1], [], []>} : vector<232x128xbf16>, vector<128x128xbf16>, vector<232x128xf32> -> vector<232x128xf32>
    %65 = arith.addf %61, %64 : vector<232x128xf32>
    %66 = vector.extract_strided_slice %36 {offsets = [41, 0], sizes = [232, 128], strides = [1, 1]} : vector<274x128xbf16> to vector<232x128xbf16>
    %c896 = arith.constant 896 : index
    %c0_36 = arith.constant 0 : index
    %67 = vector.load %arg4[%c896, %c0_36] : memref<1152x128xbf16, #tpu.memory_space<vmem>>, vector<128x128xbf16>
    %cst_37 = arith.constant dense<0.000000e+00> : vector<232x128xf32>
    %68 = tpu.matmul %66, %67, %cst_37 {dimension_numbers = #tpu.dot_dimension_numbers<[1], [0], [0], [1], [0, 0, 1, 1], [], []>} : vector<232x128xbf16>, vector<128x128xbf16>, vector<232x128xf32> -> vector<232x128xf32>
    %69 = arith.addf %65, %68 : vector<232x128xf32>
    %70 = vector.extract_strided_slice %36 {offsets = [42, 0], sizes = [232, 128], strides = [1, 1]} : vector<274x128xbf16> to vector<232x128xbf16>
    %c1024 = arith.constant 1024 : index
    %c0_38 = arith.constant 0 : index
    %71 = vector.load %arg4[%c1024, %c0_38] : memref<1152x128xbf16, #tpu.memory_space<vmem>>, vector<128x128xbf16>
    %cst_39 = arith.constant dense<0.000000e+00> : vector<232x128xf32>
    %72 = tpu.matmul %70, %71, %cst_39 {dimension_numbers = #tpu.dot_dimension_numbers<[1], [0], [0], [1], [0, 0, 1, 1], [], []>} : vector<232x128xbf16>, vector<128x128xbf16>, vector<232x128xf32> -> vector<232x128xf32>
    %73 = arith.addf %69, %72 : vector<232x128xf32>
    %c0_40 = arith.constant 0 : index
    %c0_41 = arith.constant 0 : index
    %74 = vector.load %arg5[%c0_40, %c0_41] : memref<1x128xf32, #tpu.memory_space<vmem>>, vector<1x128xf32>
    %75 = vector.broadcast %74 : vector<1x128xf32> to vector<232x128xf32>
    %76 = arith.addf %73, %75 : vector<232x128xf32>
    %cst_42 = arith.constant 0.000000e+00 : f32
    %77 = vector.broadcast %cst_42 : f32 to vector<232x128xf32>
    %78 = arith.maximumf %76, %77 : vector<232x128xf32>
    %79 = vector.extract_strided_slice %78 {offsets = [0, 0], sizes = [211, 128], strides = [1, 1]} : vector<232x128xf32> to vector<211x128xf32>
    %80 = vector.extract_strided_slice %78 {offsets = [1, 0], sizes = [211, 128], strides = [1, 1]} : vector<232x128xf32> to vector<211x128xf32>
    %81 = arith.maximumf %79, %80 : vector<211x128xf32>
    %82 = vector.extract_strided_slice %78 {offsets = [20, 0], sizes = [211, 128], strides = [1, 1]} : vector<232x128xf32> to vector<211x128xf32>
    %83 = vector.extract_strided_slice %78 {offsets = [21, 0], sizes = [211, 128], strides = [1, 1]} : vector<232x128xf32> to vector<211x128xf32>
    %84 = arith.maximumf %82, %83 : vector<211x128xf32>
    %85 = arith.maximumf %81, %84 : vector<211x128xf32>
    %c0_43 = arith.constant 0 : index
    %c0_44 = arith.constant 0 : index
    %86 = vector.load %arg8[%c0_43, %c0_44] : memref<36x211xbf16, #tpu.memory_space<vmem>>, vector<36x211xbf16>
    %87 = arith.truncf %85 : vector<211x128xf32> to vector<211x128xbf16>
    %cst_45 = arith.constant dense<0.000000e+00> : vector<36x128xf32>
    %88 = tpu.matmul %86, %87, %cst_45 {dimension_numbers = #tpu.dot_dimension_numbers<[1], [0], [0], [1], [0, 0, 1, 1], [], []>} : vector<36x211xbf16>, vector<211x128xbf16>, vector<36x128xf32> -> vector<36x128xf32>
    %89 = arith.truncf %88 : vector<36x128xf32> to vector<36x128xbf16>
    %cst_46 = arith.constant 0.000000e+00 : f32
    %90 = vector.broadcast %cst_46 : f32 to vector<22x128xf32>
    %91 = vector.extract_strided_slice %89 {offsets = [0, 0], sizes = [22, 128], strides = [1, 1]} : vector<36x128xbf16> to vector<22x128xbf16>
    %c0_47 = arith.constant 0 : index
    %c0_48 = arith.constant 0 : index
    %92 = vector.load %arg6[%c0_47, %c0_48] : memref<1152x128xbf16, #tpu.memory_space<vmem>>, vector<128x128xbf16>
    %cst_49 = arith.constant dense<0.000000e+00> : vector<22x128xf32>
    %93 = tpu.matmul %91, %92, %cst_49 {dimension_numbers = #tpu.dot_dimension_numbers<[1], [0], [0], [1], [0, 0, 1, 1], [], []>} : vector<22x128xbf16>, vector<128x128xbf16>, vector<22x128xf32> -> vector<22x128xf32>
    %94 = arith.addf %90, %93 : vector<22x128xf32>
    %95 = vector.extract_strided_slice %89 {offsets = [1, 0], sizes = [22, 128], strides = [1, 1]} : vector<36x128xbf16> to vector<22x128xbf16>
    %c128_50 = arith.constant 128 : index
    %c0_51 = arith.constant 0 : index
    %96 = vector.load %arg6[%c128_50, %c0_51] : memref<1152x128xbf16, #tpu.memory_space<vmem>>, vector<128x128xbf16>
    %cst_52 = arith.constant dense<0.000000e+00> : vector<22x128xf32>
    %97 = tpu.matmul %95, %96, %cst_52 {dimension_numbers = #tpu.dot_dimension_numbers<[1], [0], [0], [1], [0, 0, 1, 1], [], []>} : vector<22x128xbf16>, vector<128x128xbf16>, vector<22x128xf32> -> vector<22x128xf32>
    %98 = arith.addf %94, %97 : vector<22x128xf32>
    %99 = vector.extract_strided_slice %89 {offsets = [2, 0], sizes = [22, 128], strides = [1, 1]} : vector<36x128xbf16> to vector<22x128xbf16>
    %c256_53 = arith.constant 256 : index
    %c0_54 = arith.constant 0 : index
    %100 = vector.load %arg6[%c256_53, %c0_54] : memref<1152x128xbf16, #tpu.memory_space<vmem>>, vector<128x128xbf16>
    %cst_55 = arith.constant dense<0.000000e+00> : vector<22x128xf32>
    %101 = tpu.matmul %99, %100, %cst_55 {dimension_numbers = #tpu.dot_dimension_numbers<[1], [0], [0], [1], [0, 0, 1, 1], [], []>} : vector<22x128xbf16>, vector<128x128xbf16>, vector<22x128xf32> -> vector<22x128xf32>
    %102 = arith.addf %98, %101 : vector<22x128xf32>
    %103 = vector.extract_strided_slice %89 {offsets = [6, 0], sizes = [22, 128], strides = [1, 1]} : vector<36x128xbf16> to vector<22x128xbf16>
    %c384_56 = arith.constant 384 : index
    %c0_57 = arith.constant 0 : index
    %104 = vector.load %arg6[%c384_56, %c0_57] : memref<1152x128xbf16, #tpu.memory_space<vmem>>, vector<128x128xbf16>
    %cst_58 = arith.constant dense<0.000000e+00> : vector<22x128xf32>
    %105 = tpu.matmul %103, %104, %cst_58 {dimension_numbers = #tpu.dot_dimension_numbers<[1], [0], [0], [1], [0, 0, 1, 1], [], []>} : vector<22x128xbf16>, vector<128x128xbf16>, vector<22x128xf32> -> vector<22x128xf32>
    %106 = arith.addf %102, %105 : vector<22x128xf32>
    %107 = vector.extract_strided_slice %89 {offsets = [7, 0], sizes = [22, 128], strides = [1, 1]} : vector<36x128xbf16> to vector<22x128xbf16>
    %c512_59 = arith.constant 512 : index
    %c0_60 = arith.constant 0 : index
    %108 = vector.load %arg6[%c512_59, %c0_60] : memref<1152x128xbf16, #tpu.memory_space<vmem>>, vector<128x128xbf16>
    %cst_61 = arith.constant dense<0.000000e+00> : vector<22x128xf32>
    %109 = tpu.matmul %107, %108, %cst_61 {dimension_numbers = #tpu.dot_dimension_numbers<[1], [0], [0], [1], [0, 0, 1, 1], [], []>} : vector<22x128xbf16>, vector<128x128xbf16>, vector<22x128xf32> -> vector<22x128xf32>
    %110 = arith.addf %106, %109 : vector<22x128xf32>
    %111 = vector.extract_strided_slice %89 {offsets = [8, 0], sizes = [22, 128], strides = [1, 1]} : vector<36x128xbf16> to vector<22x128xbf16>
    %c640_62 = arith.constant 640 : index
    %c0_63 = arith.constant 0 : index
    %112 = vector.load %arg6[%c640_62, %c0_63] : memref<1152x128xbf16, #tpu.memory_space<vmem>>, vector<128x128xbf16>
    %cst_64 = arith.constant dense<0.000000e+00> : vector<22x128xf32>
    %113 = tpu.matmul %111, %112, %cst_64 {dimension_numbers = #tpu.dot_dimension_numbers<[1], [0], [0], [1], [0, 0, 1, 1], [], []>} : vector<22x128xbf16>, vector<128x128xbf16>, vector<22x128xf32> -> vector<22x128xf32>
    %114 = arith.addf %110, %113 : vector<22x128xf32>
    %115 = vector.extract_strided_slice %89 {offsets = [12, 0], sizes = [22, 128], strides = [1, 1]} : vector<36x128xbf16> to vector<22x128xbf16>
    %c768_65 = arith.constant 768 : index
    %c0_66 = arith.constant 0 : index
    %116 = vector.load %arg6[%c768_65, %c0_66] : memref<1152x128xbf16, #tpu.memory_space<vmem>>, vector<128x128xbf16>
    %cst_67 = arith.constant dense<0.000000e+00> : vector<22x128xf32>
    %117 = tpu.matmul %115, %116, %cst_67 {dimension_numbers = #tpu.dot_dimension_numbers<[1], [0], [0], [1], [0, 0, 1, 1], [], []>} : vector<22x128xbf16>, vector<128x128xbf16>, vector<22x128xf32> -> vector<22x128xf32>
    %118 = arith.addf %114, %117 : vector<22x128xf32>
    %119 = vector.extract_strided_slice %89 {offsets = [13, 0], sizes = [22, 128], strides = [1, 1]} : vector<36x128xbf16> to vector<22x128xbf16>
    %c896_68 = arith.constant 896 : index
    %c0_69 = arith.constant 0 : index
    %120 = vector.load %arg6[%c896_68, %c0_69] : memref<1152x128xbf16, #tpu.memory_space<vmem>>, vector<128x128xbf16>
    %cst_70 = arith.constant dense<0.000000e+00> : vector<22x128xf32>
    %121 = tpu.matmul %119, %120, %cst_70 {dimension_numbers = #tpu.dot_dimension_numbers<[1], [0], [0], [1], [0, 0, 1, 1], [], []>} : vector<22x128xbf16>, vector<128x128xbf16>, vector<22x128xf32> -> vector<22x128xf32>
    %122 = arith.addf %118, %121 : vector<22x128xf32>
    %123 = vector.extract_strided_slice %89 {offsets = [14, 0], sizes = [22, 128], strides = [1, 1]} : vector<36x128xbf16> to vector<22x128xbf16>
    %c1024_71 = arith.constant 1024 : index
    %c0_72 = arith.constant 0 : index
    %124 = vector.load %arg6[%c1024_71, %c0_72] : memref<1152x128xbf16, #tpu.memory_space<vmem>>, vector<128x128xbf16>
    %cst_73 = arith.constant dense<0.000000e+00> : vector<22x128xf32>
    %125 = tpu.matmul %123, %124, %cst_73 {dimension_numbers = #tpu.dot_dimension_numbers<[1], [0], [0], [1], [0, 0, 1, 1], [], []>} : vector<22x128xbf16>, vector<128x128xbf16>, vector<22x128xf32> -> vector<22x128xf32>
    %126 = arith.addf %122, %125 : vector<22x128xf32>
    %c0_74 = arith.constant 0 : index
    %c0_75 = arith.constant 0 : index
    %127 = vector.load %arg7[%c0_74, %c0_75] : memref<1x128xf32, #tpu.memory_space<vmem>>, vector<1x128xf32>
    %128 = vector.broadcast %127 : vector<1x128xf32> to vector<22x128xf32>
    %129 = arith.addf %126, %128 : vector<22x128xf32>
    %cst_76 = arith.constant 0.000000e+00 : f32
    %130 = vector.broadcast %cst_76 : f32 to vector<22x128xf32>
    %131 = arith.maximumf %129, %130 : vector<22x128xf32>
    %132 = vector.extract_strided_slice %131 {offsets = [0, 0], sizes = [15, 128], strides = [1, 1]} : vector<22x128xf32> to vector<15x128xf32>
    %133 = vector.extract_strided_slice %131 {offsets = [1, 0], sizes = [15, 128], strides = [1, 1]} : vector<22x128xf32> to vector<15x128xf32>
    %134 = arith.maximumf %132, %133 : vector<15x128xf32>
    %135 = vector.extract_strided_slice %131 {offsets = [6, 0], sizes = [15, 128], strides = [1, 1]} : vector<22x128xf32> to vector<15x128xf32>
    %136 = vector.extract_strided_slice %131 {offsets = [7, 0], sizes = [15, 128], strides = [1, 1]} : vector<22x128xf32> to vector<15x128xf32>
    %137 = arith.maximumf %135, %136 : vector<15x128xf32>
    %138 = arith.maximumf %134, %137 : vector<15x128xf32>
    %139 = vector.extract_strided_slice %138 {offsets = [0, 0], sizes = [1, 128], strides = [1, 1]} : vector<15x128xf32> to vector<1x128xf32>
    %140 = vector.extract_strided_slice %138 {offsets = [2, 0], sizes = [1, 128], strides = [1, 1]} : vector<15x128xf32> to vector<1x128xf32>
    %141 = arith.addf %139, %140 : vector<1x128xf32>
    %142 = vector.extract_strided_slice %138 {offsets = [12, 0], sizes = [1, 128], strides = [1, 1]} : vector<15x128xf32> to vector<1x128xf32>
    %143 = arith.addf %141, %142 : vector<1x128xf32>
    %144 = vector.extract_strided_slice %138 {offsets = [14, 0], sizes = [1, 128], strides = [1, 1]} : vector<15x128xf32> to vector<1x128xf32>
    %145 = arith.addf %143, %144 : vector<1x128xf32>
    %cst_77 = arith.constant 2.500000e-01 : f32
    %146 = vector.broadcast %cst_77 : f32 to vector<1x128xf32>
    %147 = arith.mulf %145, %146 : vector<1x128xf32>
    %c0_78 = arith.constant 0 : index
    %c0_79 = arith.constant 0 : index
    %148 = vector.load %arg9[%c0_78, %c0_79] : memref<128x128xf32, #tpu.memory_space<vmem>>, vector<128x128xf32>
    %cst_80 = arith.constant dense<0.000000e+00> : vector<1x128xf32>
    %149 = tpu.matmul %147, %148, %cst_80 {dimension_numbers = #tpu.dot_dimension_numbers<[1], [0], [0], [1], [0, 0, 1, 1], [], []>} : vector<1x128xf32>, vector<128x128xf32>, vector<1x128xf32> -> vector<1x128xf32>
    %c0_81 = arith.constant 0 : index
    %c0_82 = arith.constant 0 : index
    %150 = vector.load %arg10[%c0_81, %c0_82] : memref<1x128xf32, #tpu.memory_space<vmem>>, vector<1x128xf32>
    %151 = arith.addf %149, %150 : vector<1x128xf32>
    %c0_83 = arith.constant 0 : index
    %c0_84 = arith.constant 0 : index
    %c0_85 = arith.constant 0 : index
    %152 = vector.load %arg11[%c0_83, %c0_84, %c0_85] : memref<1x1x128xf32, #tpu.memory_space<vmem>>, vector<1x1x128xf32>
    %153 = vector.shape_cast %152 : vector<1x1x128xf32> to vector<1x128xf32>
    %154 = vector.shape_cast %151 : vector<1x128xf32> to vector<1x1x128xf32>
    tpu.vector_store %arg11[%c0_83, %c0_84, %c0_85], %154 {strides = array<i32>} : memref<1x1x128xf32, #tpu.memory_space<vmem>>, vector<1x1x128xf32>,
    return
  }
  func.func @transform_0(%arg0: i32) -> (i32, i32, i32) {
    %c0_i32 = arith.constant 0 : i32
    %c0_i32_0 = arith.constant 0 : i32
    %c0_i32_1 = arith.constant 0 : i32
    return %arg0, %c0_i32, %c0_i32_0 : i32, i32, i32
  }
  func.func @transform_1(%arg0: i32) -> (i32, i32) {
    %c0_i32 = arith.constant 0 : i32
    %c0_i32_0 = arith.constant 0 : i32
    %c0_i32_1 = arith.constant 0 : i32
    return %c0_i32, %c0_i32_0 : i32, i32
  }
  func.func @transform_2(%arg0: i32) -> (i32, i32) {
    %c0_i32 = arith.constant 0 : i32
    %c0_i32_0 = arith.constant 0 : i32
    %c0_i32_1 = arith.constant 0 : i32
    return %c0_i32, %c0_i32_0 : i32, i32
  }
  func.func @transform_3(%arg0: i32) -> (i32, i32) {
    %c0_i32 = arith.constant 0 : i32
    %c0_i32_0 = arith.constant 0 : i32
    %c0_i32_1 = arith.constant 0 : i32
    return %c0_i32, %c0_i32_0 : i32, i32
  }
  func.func @transform_4(%arg0: i32) -> (i32, i32) {
    %c0_i32 = arith.constant 0 : i32
    %c0_i32_0 = arith.constant 0 : i32
    %c0_i32_1 = arith.constant 0 : i32
    return %c0_i32, %c0_i32_0 : i32, i32
  }
  func.func @transform_5(%arg0: i32) -> (i32, i32) {
    %c0_i32 = arith.constant 0 : i32
    %c0_i32_0 = arith.constant 0 : i32
    %c0_i32_1 = arith.constant 0 : i32
    return %c0_i32, %c0_i32_0 : i32, i32
  }
  func.func @transform_6(%arg0: i32) -> (i32, i32) {
    %c0_i32 = arith.constant 0 : i32
    %c0_i32_0 = arith.constant 0 : i32
    %c0_i32_1 = arith.constant 0 : i32
    return %c0_i32, %c0_i32_0 : i32, i32
  }
  func.func @transform_7(%arg0: i32) -> (i32, i32) {
    %c0_i32 = arith.constant 0 : i32
    %c0_i32_0 = arith.constant 0 : i32
    %c0_i32_1 = arith.constant 0 : i32
    return %c0_i32, %c0_i32_0 : i32, i32
  }
  func.func @transform_8(%arg0: i32) -> (i32, i32) {
    %c0_i32 = arith.constant 0 : i32
    %c0_i32_0 = arith.constant 0 : i32
    %c0_i32_1 = arith.constant 0 : i32
    return %c0_i32, %c0_i32_0 : i32, i32
  }
  func.func @transform_9(%arg0: i32) -> (i32, i32) {
    %c0_i32 = arith.constant 0 : i32
    %c0_i32_0 = arith.constant 0 : i32
    %c0_i32_1 = arith.constant 0 : i32
    return %c0_i32, %c0_i32_0 : i32, i32
  }
  func.func @transform_10(%arg0: i32) -> (i32, i32, i32) {
    %c0_i32 = arith.constant 0 : i32
    %c0_i32_0 = arith.constant 0 : i32
    %c0_i32_1 = arith.constant 0 : i32
    return %arg0, %c0_i32, %c0_i32_0 : i32, i32, i32
  }
}

</mosaic_0001>

<bundles_post_ra>
// kernel: base_model_forward.1
= control target key start
LH: loop header
LB: loop body
LE: loop exit
PB: predicated region body
PF: predicated region fallthrough
CT: control target
= control target key end

     0   :  { %s10000_s0 = inlined_call_operand.vmem [shape: bf16[2,394,56], index: 0, kind: input, shape index: {}]   ;;  %s10001_s1 = inlined_call_operand.vmem [shape: bf16[392,128], index: 1, kind: input, shape index: {}]   ;;  %s10002_s2 = inlined_call_operand.vmem [shape: f32[1,128], index: 2, kind: input, shape index: {}]   ;;  %s10003_s3 = inlined_call_operand.vmem [shape: bf16[1152,128], index: 3, kind: input, shape index: {}]   ;;  %s10004_s4 = inlined_call_operand.vmem [shape: f32[1,128], index: 4, kind: input, shape index: {}]   ;;  %s10005_s5 = inlined_call_operand.vmem [shape: bf16[1152,128], index: 5, kind: input, shape index: {}]   ;;  %s10006_s6 = inlined_call_operand.vmem [shape: f32[1,128], index: 6, kind: input, shape index: {}]   ;;  %s10007_s7 = inlined_call_operand.vmem [shape: bf16[36,211], index: 7, kind: input, shape index: {}]   ;;  %s10008_s8 = inlined_call_operand.vmem [shape: f32[128,128], index: 8, kind: input, shape index: {}]   ;;  %s10009_s9 = inlined_call_operand.vmem [shape: f32[1,128], index: 9, kind: input, shape index: {}]   ;;  %s10010_s10 = inlined_call_operand.hbm [shape: f32[2,1,128], index: 10, kind: output, shape index: {}]  }
   0x1   :  { %10046 = sst [smem:[#allocation151_spill]] %s10000_s0 }
   0x2   :  { %15 = vsyncpa [#allocation3], 0 }
   0x3   :  { %17 = vsyncpa [#allocation3 + $0x1], 0  ;;  %s7124_s13 = smov 0   ;;  %s7126_s14 = smov 0  }
   0x4   :  { %s7128_s15 = smov 0   ;;  %s7130_s16 = smov 0  }
   0x5 LB: > { %s7145_s17 = sadd.s32 4294967295, %s7066_s16   ;;  %s5751_s18 = sadd.s32 4294967294, %s7066_s16   ;;  %s7066_s16 = sphi %s7130_s16, %s10499_s16   ;;  %s7062_s15 = sphi %s7128_s15, %s10498_s15   ;;  %s7058_s14 = sphi %s7126_s14, %s10497_s14   ;;  %s7054_s13 = sphi %s7124_s13, %s10496_s13  }
   0x6   : > { %s7149_s19 = sadd.s32 1, %s7066_s16   ;;  %s245_s20 = sadd.s32 1, %s7062_s15 }
   0x7   : > { %s242_s21 = ssub.s32 %s7066_s16, %s7149_s19  ;;  %p255_p0 = scmp.ne.s32.totalorder %s7062_s15, %s7058_s14 }
   0x8   : > { %p243_p1 = scmp.eq.s32.totalorder %s242_s21, 0  ;;  %p256_p2 = scmp.eq.s32.totalorder %s7145_s17, 1 }
   0x9   : > { %p261_p3 = scmp.ne.s32.totalorder %s7058_s14, %s7054_s13  ;;  %p262_p4 = scmp.eq.s32.totalorder %s5751_s18, 1 }
   0xa   : > { %s7160_s22 = scalar_select %p243_p1, %s7062_s15, %s245_s20  }
   0xb   : > { %p7162_p5 = por %p256_p2, %p255_p0  ;;  %p7166_p6 = por %p262_p4, %p261_p3 }
   0xc   : > { %p5754_p7 = scmp.ge.s32.totalorder %s7066_s16, 1  ;;  %p315_p8 = scmp.lt.s32.totalorder %s7066_s16, 3 }
   0xe   : > { %p316_p9 = pnand %p5754_p7, %p315_p8 }
  0x10   : > { %319 = sbr.rel (%p316_p9) target bundleno = 1913 (0x779), region = 60 }
  0x15   : > { %v421_v0 = vld [vmem:[%s10001_s1 + $0x34] sm:$0xf]  ;;  %v414_v1 = vld [vmem:[%s10001_s1 + $0x18] sm:$0xf]  ;;  %v912_v4 = vld [vmem:[%s10001_s1 + $0x50] sm:$0xf]  ;;  %s5692_s30 = scalar_lea.hbm %s10010_s10, %s7145_s17 }
  0x16   : > { %v559_v2 = vunpack.c.l.b16 %v421_v0  ;;  %v743_v3 = vunpack.c.l.b16 %v414_v1  ;;  %v1154_v5 = vld [vmem:[%s10001_s1 + $0x6c] sm:$0xf]  ;;  %p352_p10 = scmp.lt.s32.totalorder %s7145_s17, 1  ;;  %vm622_vm0 = vcmask 1043456   ;;  %v950_v6 = vunpack.c.l.b16 %v912_v4  ;;  %v6580_v15 = vld [vmem:[%s10001_s1 + $0x10] sm:$0xff]  ;;  %v6589_v19 = vld [vmem:[%s10001_s1 + $0x64] sm:$0xff] }
  0x17   : > { %v1209_v7 = vunpack.c.l.b16 %v1154_v5  ;;  %v6583_v12 = vld [vmem:[%s10001_s1 + $0x2c] sm:$0xff]  ;;  %s10049_s0 = sld [smem:[#allocation151_spill]]  ;;  %v6582_v20 = vld [vmem:[%s10001_s1 + $0x24] sm:$0xff]  ;;  %v6588_v23 = vld [vmem:[%s10001_s1 + $0x5c] sm:$0xff]  ;;  %vm510_vm1 = vcmask 1045504   ;;  %vm567_vm2 = vcmask 457728  }
  0x18   : > { %v563_v8 = vpack.c.b16 %v559_v2, %v559_v2  ;;  %v747_v9 = vpack.c.b16 %v743_v3, %v743_v3  ;;  %s353_s18 = scalar_select %p352_p10, %s7145_s17, 1  ;;  %v954_v10 = vpack.c.b16 %v950_v6, %v950_v6  ;;  %v6586_v18 = vld [vmem:[%s10001_s1 + $0x48] sm:$0xff]  ;;  %v6585_v22 = vld [vmem:[%s10001_s1 + $0x40] sm:$0xff]  ;;  %v6584_v32 = vld [vmem:[%s10001_s1 + $0x38] sm:$0xff]  ;;  %vm2212_vm3 = vsmask.f32 7424 }
  0x19   : > { %v1213_v11 = vpack.c.b16 %v1209_v7, %v1209_v7  ;;  %v6579_v21 = vld [vmem:[%s10001_s1 + $0x8] sm:$0xff]  ;;  %v6581_v28 = vld [vmem:[%s10001_s1 + $0x1c] sm:$0xff]  ;;  %v6587_v33 = vld [vmem:[%s10001_s1 + $0x54] sm:$0xff]  ;;  %vm3087_vm4 = vsmask.f32 5376  ;;  %vm2641_vm5 = vcmask 1046528  }
  0x1a   : > { %v624_v13 = vsel %vm622_vm0, %v563_v8, 0  ;;  %v806_v14 = vsel %vm622_vm0, %v747_v9, 0  ;;  %s6957_s27 = smul.u32 200, %s353_s18  ;;  %v1013_v16 = vsel %vm622_vm0, %v954_v10, 0  ;;  %v6578_v29 = vld [vmem:[%s10001_s1] sm:$0xff]  ;;  %vm3343_vm6 = vcmask 1044480  }
  0x1b   : > { %630 = vmatpush.bf16.msra.mxu0 %v624_v13  ;;  %812 = vmatpush.bf16.msra.mxu1 %v806_v14  ;;  %v1272_v17 = vsel %vm622_vm0, %v1213_v11, 0  ;;  %vm4687_vm7 = vcmask 1040384   ;;  %vm4688_vm8 = vcmask 1041408   ;;  %vm4677_vm9 = vcmask 678912   ;;  %s350_s26 = sand.u32 1, %s7058_s14   ;;  %s5696_s20 = sshll.u32 %s5692_s30, 4  ;;  %s5697_s20 = int_to_ptr.hbm [resolvable:$true] %s5696_s20 }
  0x1c   : > { %1019 = vmatpush.bf16.msra.mxu2 %v1013_v16  ;;  %1278 = vmatpush.bf16.msra.mxu3 %v1272_v17  ;;  %vm5135_vm10 = vsmask.f32 4352  ;;  %s351_s11 = scalar_lea.vmem [#allocation2], %s350_s26  ;;  %s5684_s21 = scalar_lea.sflag [#allocation3], %s350_s26 }
  0x1d   : > { %s7205_s18 = scalar_lea.vmem %s10049_s0, %s6957_s27  ;;  %s5694_s12 = sshll.u32 %s351_s11, 4  ;;  %s5695_s12 = int_to_ptr.vmem [resolvable:$true] %s5694_s12 }
  0x1e   : > { %v6576_v24 = vld [vmem:[%s7205_s18 + $0x8] sm:$0xff]  ;;  %v6831_v25 = vld [vmem:[%s7205_s18 + $0x10] sm:$0xff]   ;;  %v6926_v26 = vld [vmem:[%s7205_s18 + $0x1c] sm:$0xff]   ;;  %s7018_s25 = sshra.s32 %s5697_s20, 4  ;;  %s7024_s29 = scalar_lea.hbm %s10010_s10, 2  ;;  %s7019_s25 = int_to_ptr.hbm [resolvable:$true] %s7018_s25 }
  0x1f   : > { %631 = vmatpush.bf16.msra.mxu0 %v6583_v12  ;;  %813 = vmatpush.bf16.msra.mxu1 %v6580_v15  ;;  %v6928_v27 = vld [vmem:[%s7205_s18 + $0x24] sm:$0xff]   ;;  %v511_v30 = vrot.slane %v6576_v24, 2  ;;  %v512_v31 = vrot.slane %v6831_v25, 2  ;;  %v1161_v34 = vrot.slane %v6926_v26, 2  ;;  %v6924_v38 = vld [vmem:[%s7205_s18 + $0x14] sm:$0xff]   ;;  %v6930_v41 = vld [vmem:[%s7205_s18 + $0x2c] sm:$0xff]   ;;  %p7025_p0 = scmp.lt.s32.totalorder %s7019_s25, %s10010_s10 }
  0x20   : > { %1020 = vmatpush.bf16.msra.mxu2 %v6586_v18  ;;  %1279 = vmatpush.bf16.msra.mxu3 %v6589_v19  ;;  %v1162_v35 = vrot.slane %v6928_v27, 2  ;;  %v6575_v36 = vld [vmem:[%s7205_s18] sm:$0xff]  ;;  %v6832_v40 = vld [vmem:[%s7205_s18 + $0x18] sm:$0xff]   ;;  %v1164_v43 = vrot.slane %v6930_v41, 2  ;;  %v7260_v52 = vld [vmem:[%s7205_s18 + $0x28] sm:$0xff]   ;;  %s7020_s0 = scalar_lea.hbm %s7019_s25, 1 }
  0x21   : > { %v513_v37 = vsel %vm510_vm1, %v511_v30, %v512_v31  ;;  %v514_v42 = vrot.slane %v6832_v40, 2  ;;  %v6833_v46 = vld [vmem:[%s7205_s18 + $0x20] sm:$0xff]   ;;  %v6932_v47 = vld [vmem:[%s7205_s18 + $0x34] sm:$0xff]   ;;  %v518_v54 = vrot.slane %v7260_v52, 2  ;;  %v7291_v1 = vld [vmem:[%s7205_s18 + $0x4c] sm:$0xff]   ;;  %p7021_p11 = scmp.ne.s32.totalorder %s7019_s25, %s7020_s0  ;;  %p7026_p1 = scmp.lt.s32.totalorder %s7024_s29, %s7020_s0 }
  0x22   : > { %v1163_v39 = vsel %vm510_vm1, %v1161_v34, %v1162_v35  ;;  %v1165_v45 = vsel %vm510_vm1, %v1162_v35, %v1164_v43  ;;  %v516_v48 = vrot.slane %v6833_v46, 2  ;;  %v1166_v49 = vrot.slane %v6932_v47, 2  ;;  %v7263_v53 = vld [vmem:[%s7205_s18 + $0x3c] sm:$0xff]   ;;  %v7274_v58 = vld [vmem:[%s7205_s18 + $0x30] sm:$0xff]   ;;  %v7277_v59 = vld [vmem:[%s7205_s18 + $0x44] sm:$0xff]  }
  0x23   : > { %632 = vmatpush.bf16.msra.mxu0 %v6582_v20  ;;  %814 = vmatpush.bf16.msra.mxu1 %v6579_v21  ;;  %v515_v44 = vsel %vm510_vm1, %v512_v31, %v514_v42  ;;  %v1168_v55 = vrot.slane %v7263_v53, 2  ;;  %v520_v60 = vrot.slane %v7274_v58, 2  ;;  %v1170_v61 = vrot.slane %v7277_v59, 2  ;;  %v7288_v0 = vld [vmem:[%s7205_s18 + $0x38] sm:$0xff]   ;;  %v7307_v6 = vld [vmem:[%s7205_s18 + $0x40] sm:$0xff]   ;;  %v7326_v12 = vld [vmem:[%s7205_s18 + $0x48] sm:$0xff]   ;;  %p7022_p12 = pnand %p7021_p11, %p7162_p5  ;;  %p7027_p2 = por %p7026_p1, %p7025_p0 }
  0x24   : > { %1021 = vmatpush.bf16.msra.mxu2 %v6585_v22  ;;  %1280 = vmatpush.bf16.msra.mxu3 %v6588_v23  ;;  %v517_v50 = vsel %vm510_vm1, %v514_v42, %v516_v48  ;;  %v1167_v51 = vsel %vm510_vm1, %v1164_v43, %v1166_v49  ;;  %v519_v56 = vsel %vm510_vm1, %v516_v48, %v518_v54  ;;  %v522_v2 = vrot.slane %v7288_v0, 2  ;;  %v7310_v7 = vld [vmem:[%s7205_s18 + $0x54] sm:$0xff]   ;;  %v7329_v13 = vld [vmem:[%s7205_s18 + $0x5c] sm:$0xff]   ;;  %v7348_v19 = vld [vmem:[%s7205_s18 + $0x64] sm:$0xff]  }
  0x25   : > { %v1169_v57 = vsel %vm510_vm1, %v1166_v49, %v1168_v55  ;;  %v521_v62 = vsel %vm510_vm1, %v518_v54, %v520_v60  ;;  %v1171_v63 = vsel %vm510_vm1, %v1168_v55, %v1170_v61  ;;  %v1172_v3 = vrot.slane %v7291_v1, 2  ;;  %v7345_v18 = vld [vmem:[%s7205_s18 + $0x50] sm:$0xff]   ;;  %v7387_v55 = vld [vmem:[%s7205_s18 + $0x60] sm:$0xff]   ;;  %p7023_p13 = pneg %p7022_p12 }
  0x26   : > { %v7296_v4 = vsel %vm510_vm1, %v520_v60, %v522_v2  ;;  %v524_v8 = vrot.slane %v7307_v6, 2  ;;  %v1174_v9 = vrot.slane %v7310_v7, 2  ;;  %v526_v14 = vrot.slane %v7326_v12, 2  ;;  %v7367_v34 = vld [vmem:[%s7205_s18 + $0x6c] sm:$0xff]  }
  0x27   : > { %633 = vmatpush.bf16.msra.mxu0 %v6581_v28  ;;  %815 = vmatpush.bf16.msra.mxu1 %v6578_v29  ;;  %v1173_v5 = vsel %vm510_vm1, %v1170_v61, %v1172_v3  ;;  %v1176_v15 = vrot.slane %v7329_v13, 2  ;;  %v528_v20 = vrot.slane %v7345_v18, 2  ;;  %v1178_v21 = vrot.slane %v7348_v19, 2  ;;  %p7028_p3 = pnand %p7027_p2, %p7023_p13 }
  0x28   : > { %1022 = vmatpush.bf16.msra.mxu2 %v6584_v32  ;;  %1281 = vmatpush.bf16.msra.mxu3 %v6587_v33  ;;  %v7315_v10 = vsel %vm510_vm1, %v522_v2, %v524_v8  ;;  %v1175_v11 = vsel %vm510_vm1, %v1172_v3, %v1174_v9  ;;  %v7334_v16 = vsel %vm510_vm1, %v524_v8, %v526_v14  ;;  %v7364_v33 = vld [vmem:[%s7205_s18 + $0x58] sm:$0xff]   ;;  %v532_v60 = vrot.slane %v7387_v55, 2 }
  0x29   : > { %v1177_v17 = vsel %vm510_vm1, %v1174_v9, %v1176_v15 }
  0x2a   : > { %5772 = vmatmul.msk.bf16.vlgmr.msra.gmra.mxu0 %vm567_vm2, %v513_v37  ;;  %5806 = vmatmul.msk.bf16.vlgmr.msra.gmra.mxu1 %vm567_vm2, %v6575_v36  ;;  %v530_v36 = vrot.slane %v7364_v33, 2  ;;  %v1180_v37 = vrot.slane %v7367_v34, 2 }
  0x2b   : > { %5836 = vmatmul.msk.bf16.vlgmr.msra.gmra.mxu2 %vm567_vm2, %v6924_v38  ;;  %5866 = vmatmul.msk.bf16.vlgmr.msra.gmra.mxu3 %vm567_vm2, %v1163_v39 }
  0x2c   : > { %v7374_v43 = vsel %vm510_vm1, %v528_v20, %v530_v36  ;;  %v7397_v8 = vsel %vm510_vm1, %v530_v36, %v532_v60 }
  0x3a   : > { %5773 = vmatmul.msk.bf16.gmra.mxu0 %vm567_vm2, %v515_v44  ;;  %5807 = vmatmul.msk.bf16.gmra.mxu1 %vm567_vm2, %v6576_v24  ;;  %v7353_v24 = vsel %vm510_vm1, %v526_v14, %v528_v20 }
  0x3b   : > { %5837 = vmatmul.msk.bf16.gmra.mxu2 %vm567_vm2, %v6926_v26  ;;  %5867 = vmatmul.msk.bf16.gmra.mxu3 %vm567_vm2, %v1165_v45  ;;  %v1179_v26 = vsel %vm510_vm1, %v1176_v15, %v1178_v21  ;;  %v1181_v45 = vsel %vm510_vm1, %v1178_v21, %v1180_v37 }
  0x4a   : > { %5774 = vmatmul.msk.bf16.gmra.mxu0 %vm567_vm2, %v517_v50  ;;  %5808 = vmatmul.msk.bf16.gmra.mxu1 %vm567_vm2, %v6831_v25 }
  0x4b   : > { %5838 = vmatmul.msk.bf16.gmra.mxu2 %vm567_vm2, %v6928_v27  ;;  %5868 = vmatmul.msk.bf16.gmra.mxu3 %vm567_vm2, %v1167_v51 }
  0x5a   : > { %5775 = vmatmul.msk.bf16.gmra.mxu0 %vm567_vm2, %v519_v56  ;;  %5809 = vmatmul.msk.bf16.gmra.mxu1 %vm567_vm2, %v6832_v40  ;;  %v7390_v56 = vld [vmem:[%s7205_s18 + $0x74] sm:$0xff]  }
  0x5b   : > { %5839 = vmatmul.msk.bf16.gmra.mxu2 %vm567_vm2, %v6930_v41  ;;  %5869 = vmatmul.msk.bf16.gmra.mxu3 %vm567_vm2, %v1169_v57  ;;  %v1182_v61 = vrot.slane %v7390_v56, 2 }
  0x6a   : > { %5776 = vmatmul.msk.bf16.gmra.mxu0 %vm567_vm2, %v521_v62  ;;  %5810 = vmatmul.msk.bf16.gmra.mxu1 %vm567_vm2, %v6833_v46 }
  0x6b   : > { %5840 = vmatmul.msk.bf16.gmra.mxu2 %vm567_vm2, %v6932_v47  ;;  %5870 = vmatmul.msk.bf16.gmra.mxu3 %vm567_vm2, %v1171_v63 }
  0x7a   : > { %5777 = vmatmul.msk.bf16.gmra.mxu0 %vm567_vm2, %v7296_v4  ;;  %5811 = vmatmul.msk.bf16.gmra.mxu1 %vm567_vm2, %v7260_v52 }
  0x7b   : > { %5841 = vmatmul.msk.bf16.gmra.mxu2 %vm567_vm2, %v7263_v53  ;;  %5871 = vmatmul.msk.bf16.gmra.mxu3 %vm567_vm2, %v1173_v5 }
  0x8a   : > { %5778 = vmatmul.msk.bf16.gmra.mxu0 %vm567_vm2, %v7315_v10  ;;  %5812 = vmatmul.msk.bf16.gmra.mxu1 %vm567_vm2, %v7274_v58 }
  0x8b   : > { %5842 = vmatmul.msk.bf16.gmra.mxu2 %vm567_vm2, %v7277_v59  ;;  %5872 = vmatmul.msk.bf16.gmra.mxu3 %vm567_vm2, %v1175_v11  ;;  %v1183_v11 = vsel %vm510_vm1, %v1180_v37, %v1182_v61 }
  0x9a   : > { %5779 = vmatmul.msk.bf16.gmra.mxu0 %vm567_vm2, %v7334_v16  ;;  %5813 = vmatmul.msk.bf16.gmra.mxu1 %vm567_vm2, %v7288_v0 }
  0x9b   : > { %5843 = vmatmul.msk.bf16.gmra.mxu2 %vm567_vm2, %v7291_v1  ;;  %5873 = vmatmul.msk.bf16.gmra.mxu3 %vm567_vm2, %v1177_v17 }
  0xa7   : > { %v635_v22 = vpop.f32.mrf.mxu0  ;;  %v817_v23 = vpop.f32.mrf.mxu1 }
  0xa8   : > { %v818_v25 = vadd.f32 %v817_v23, %v635_v22 }
  0xaa   : > { %5780 = vmatmul.msk.bf16.gmra.mxu0 %vm567_vm2, %v7353_v24  ;;  %5814 = vmatmul.msk.bf16.gmra.mxu1 %vm567_vm2, %v7307_v6 }
  0xab   : > { %5844 = vmatmul.msk.bf16.gmra.mxu2 %vm567_vm2, %v7310_v7  ;;  %5874 = vmatmul.msk.bf16.gmra.mxu3 %vm567_vm2, %v1179_v26  ;;  %v7413_v26 = vld [vmem:[%s7205_s18 + $0x7c] sm:$0xff]  }
  0xae   : > { %v1024_v27 = vpop.f32.mrf.mxu2  ;;  %v1283_v28 = vpop.f32.mrf.mxu3 }
  0xaf   : > { %v1113_v29 = vadd.f32 %v1024_v27, %v818_v25  ;;  %v637_v30 = vpop.f32.mrf.mxu0  ;;  %v819_v31 = vpop.f32.mrf.mxu1  ;;  %v7410_v25 = vld [vmem:[%s7205_s18 + $0x68] sm:$0xff]  }
  0xb0   : > { %v820_v32 = vadd.f32 %v819_v31, %v637_v30 }
  0xb1   : > { %v7369_v35 = vadd.f32 %v1283_v28, %v1113_v29  ;;  %v534_v28 = vrot.slane %v7410_v25, 2  ;;  %v1184_v29 = vrot.slane %v7413_v26, 2 }
  0xb6   : > { %v1026_v38 = vpop.f32.mrf.mxu2  ;;  %v1285_v39 = vpop.f32.mrf.mxu3 }
  0xb7   : > { %v1114_v40 = vadd.f32 %v1026_v38, %v820_v32  ;;  %v640_v41 = vpop.f32.mrf.mxu0  ;;  %v822_v42 = vpop.f32.mrf.mxu1  ;;  %v7420_v38 = vsel %vm510_vm1, %v532_v60, %v534_v28 }
  0xb8   : > { %v823_v44 = vadd.f32 %v822_v42, %v640_v41  ;;  %v7426_v42 = vld [vmem:[%s7205_s18 + $0x80] sm:$0xff]  }
  0xb9   : > { %v7377_v46 = vadd.f32 %v1285_v39, %v1114_v40  ;;  %v1185_v40 = vsel %vm510_vm1, %v1182_v61, %v1184_v29  ;;  %v7443_v61 = vld [vmem:[%s7205_s18 + $0x70] sm:$0xff]  }
  0xba   : > { %5781 = vmatmul.msk.bf16.gmra.mxu0 %vm567_vm2, %v7374_v43  ;;  %5815 = vmatmul.msk.bf16.gmra.mxu1 %vm567_vm2, %v7326_v12 }
  0xbb   : > { %5845 = vmatmul.msk.bf16.gmra.mxu2 %vm567_vm2, %v7329_v13  ;;  %5875 = vmatmul.msk.bf16.gmra.mxu3 %vm567_vm2, %v1181_v45  ;;  %v6806_v45 = vunpack.c.h.b16 %v7426_v42 }
  0xbe   : > { %v1029_v47 = vpop.f32.mrf.mxu2  ;;  %v1288_v48 = vpop.f32.mrf.mxu3 }
  0xbf   : > { %v1115_v49 = vadd.f32 %v1029_v47, %v823_v44  ;;  %v642_v50 = vpop.f32.mrf.mxu0  ;;  %v824_v51 = vpop.f32.mrf.mxu1  ;;  %v7429_v44 = vld [vmem:[%s7205_s18 + $0x88] sm:$0xff]  }
  0xc0   : > { %v825_v54 = vadd.f32 %v824_v51, %v642_v50  ;;  %v7440_v47 = vunpack.c.l.b16 %v7429_v44 }
  0xc1   : > { %v7392_v57 = vadd.f32 %v1288_v48, %v1115_v49 }
  0xc6   : > { %v1031_v62 = vpop.f32.mrf.mxu2  ;;  %v1290_v63 = vpop.f32.mrf.mxu3 }
  0xc7   : > { %v1116_v2 = vadd.f32 %v1031_v62, %v825_v54  ;;  %v645_v3 = vpop.f32.mrf.mxu0  ;;  %v827_v5 = vpop.f32.mrf.mxu1  ;;  %v7446_v62 = vpack.c.b16 %v7440_v47, %v6806_v45  ;;  %v1606_v45 = vld [vmem:[%s10001_s1 + $0xa4] sm:$0xf] }
  0xc8   : > { %v828_v9 = vadd.f32 %v827_v5, %v645_v3  ;;  %v536_v5 = vrot.slane %v7443_v61, 2 }
  0xc9   : > { %v7400_v14 = vadd.f32 %v1290_v63, %v1116_v2  ;;  %v1809_v2 = vld [vmem:[%s10001_s1 + $0xc0] sm:$0xf] }
  0xca   : > { %5782 = vmatmul.msk.bf16.gmra.mxu0 %vm567_vm2, %v7397_v8  ;;  %5816 = vmatmul.msk.bf16.gmra.mxu1 %vm567_vm2, %v7345_v18  ;;  %v1834_v3 = vunpack.c.l.b16 %v1809_v2 }
  0xcb   : > { %5846 = vmatmul.msk.bf16.gmra.mxu2 %vm567_vm2, %v7348_v19  ;;  %5876 = vmatmul.msk.bf16.gmra.mxu3 %vm567_vm2, %v1183_v11 }
  0xcc   : > { %v1838_v11 = vpack.c.b16 %v1834_v3, %v1834_v3 }
  0xce   : > { %v1034_v15 = vpop.f32.mrf.mxu2  ;;  %v1293_v17 = vpop.f32.mrf.mxu3 }
  0xcf   : > { %v1117_v20 = vadd.f32 %v1034_v15, %v828_v9  ;;  %v647_v21 = vpop.f32.mrf.mxu0  ;;  %v829_v22 = vpop.f32.mrf.mxu1  ;;  %v1186_v9 = vrot.slane %v7446_v62, 2 }
  0xd0   : > { %v830_v23 = vadd.f32 %v829_v22, %v647_v21 }
  0xd1   : > { %v7415_v27 = vadd.f32 %v1293_v17, %v1117_v20  ;;  %v1861_v20 = vsel %vm622_vm0, %v1838_v11, 0 }
  0xd2   : > { %1867 = vmatpush.bf16.msrb.mxu2 %v1861_v20  ;;  %v7485_v20 = vld [vmem:[%s7205_s18 + $0x78] sm:$0xff]  }
  0xd6   : > { %v1036_v30 = vpop.f32.mrf.mxu2  ;;  %v1295_v31 = vpop.f32.mrf.mxu3 }
  0xd7   : > { %v1118_v32 = vadd.f32 %v1036_v30, %v830_v23  ;;  %v650_v36 = vpop.f32.mrf.mxu0  ;;  %v832_v37 = vpop.f32.mrf.mxu1  ;;  %v7457_v30 = vsel %vm510_vm1, %v534_v28, %v536_v5 }
  0xd8   : > { %v833_v39 = vadd.f32 %v832_v37, %v650_v36  ;;  %v1187_v36 = vsel %vm510_vm1, %v1184_v29, %v1186_v9  ;;  %v6810_v29 = vunpack.c.h.b16 %v7429_v44 }
  0xd9   : > { %v7423_v41 = vadd.f32 %v1295_v31, %v1118_v32  ;;  %v1413_v31 = vld [vmem:[%s10001_s1 + $0x88] sm:$0xf] }
  0xda   : > { %5783 = vmatmul.msk.bf16.gmra.mxu0 %vm567_vm2, %v7420_v38  ;;  %5817 = vmatmul.msk.bf16.gmra.mxu1 %vm567_vm2, %v7364_v33  ;;  %v1438_v37 = vunpack.c.l.b16 %v1413_v31 }
  0xdb   : > { %5847 = vmatmul.msk.bf16.gmra.mxu2 %vm567_vm2, %v7367_v34  ;;  %5877 = vmatmul.msk.bf16.gmra.mxu3 %vm567_vm2, %v1185_v40  ;;  %v7466_v40 = vld [vmem:[%s7205_s18 + $0x90] sm:$0xff]  }
  0xdc   : > { %v1442_v28 = vpack.c.b16 %v1438_v37, %v1438_v37 }
  0xde   : > { %v1039_v48 = vpop.f32.mrf.mxu2  ;;  %v1298_v49 = vpop.f32.mrf.mxu3 }
  0xdf   : > { %v1119_v50 = vadd.f32 %v1039_v48, %v833_v39  ;;  %v652_v51 = vpop.f32.mrf.mxu0  ;;  %v834_v54 = vpop.f32.mrf.mxu1  ;;  %v1638_v48 = vunpack.c.l.b16 %v1606_v45 }
  0xe0   : > { %v835_v60 = vadd.f32 %v834_v54, %v652_v51 }
  0xe1   : > { %v7448_v63 = vadd.f32 %v1298_v49, %v1119_v50  ;;  %v7480_v49 = vunpack.c.l.b16 %v7466_v40  ;;  %v1465_v50 = vsel %vm622_vm0, %v1442_v28, 0  ;;  %v1642_v51 = vpack.c.b16 %v1638_v48, %v1638_v48 }
  0xe2   : > { %1471 = vmatpush.bf16.msrb.mxu0 %v1465_v50 }
  0xe3   : > { %10050 = vst [vmem:[#allocation5_spill] sm:$0xff] %v7448_v63  ;;  %v1668_v2 = vsel %vm622_vm0, %v1642_v51, 0 }
  0xe4   : > { %1674 = vmatpush.bf16.msrb.mxu1 %v1668_v2 }
  0xe6   : > { %v1041_v15 = vpop.f32.mrf.mxu2  ;;  %v1300_v17 = vpop.f32.mrf.mxu3 }
  0xe7   : > { %v1120_v21 = vadd.f32 %v1041_v15, %v835_v60  ;;  %v655_v22 = vpop.f32.mrf.mxu0  ;;  %v837_v23 = vpop.f32.mrf.mxu1 }
  0xe8   : > { %v838_v32 = vadd.f32 %v837_v23, %v655_v22  ;;  %v538_v23 = vrot.slane %v7485_v20, 2 }
  0xe9   : > { %v7463_v39 = vadd.f32 %v1300_v17, %v1120_v21  ;;  %v7488_v21 = vpack.c.b16 %v7480_v49, %v6810_v29 }
  0xea   : > { %5784 = vmatmul.msk.bf16.gmra.mxu0 %vm567_vm2, %v7457_v30  ;;  %5818 = vmatmul.msk.bf16.gmra.mxu1 %vm567_vm2, %v7387_v55  ;;  %v7495_v48 = vsel %vm510_vm1, %v536_v5, %v538_v23 }
  0xeb   : > { %10051 = vst [vmem:[#allocation6_spill] sm:$0xff] %v7463_v39  ;;  %5848 = vmatmul.msk.bf16.gmra.mxu2 %vm567_vm2, %v7390_v56  ;;  %5878 = vmatmul.msk.bf16.gmra.mxu3 %vm567_vm2, %v1187_v36  ;;  %v1188_v31 = vrot.slane %v7488_v21, 2 }
  0xed   : > { %v1189_v51 = vsel %vm510_vm1, %v1186_v9, %v1188_v31 }
  0xee   : > { %v1044_v54 = vpop.f32.mrf.mxu2  ;;  %v1303_v60 = vpop.f32.mrf.mxu3 }
  0xef   : > { %v1121_v3 = vadd.f32 %v1044_v54, %v838_v32  ;;  %v657_v11 = vpop.f32.mrf.mxu0  ;;  %v839_v15 = vpop.f32.mrf.mxu1 }
  0xf0   : > { %v840_v17 = vadd.f32 %v839_v15, %v657_v11  ;;  %v7508_v11 = vld [vmem:[%s7205_s18 + $0x94] sm:$0xff]  }
  0xf1   : > { %v7490_v22 = vadd.f32 %v1303_v60, %v1121_v3 }
  0xf3   : > { %10052 = vst [vmem:[#allocation7_spill] sm:$0xff] %v7490_v22 }
  0xf6   : > { %v1046_v36 = vpop.f32.mrf.mxu2  ;;  %v1305_v37 = vpop.f32.mrf.mxu3 }
  0xf7   : > { %v1122_v45 = vadd.f32 %v1046_v36, %v840_v17  ;;  %v660_v28 = vpop.f32.mrf.mxu0  ;;  %v842_v32 = vpop.f32.mrf.mxu1  ;;  %v540_v17 = vrot.slane %v7426_v42, 2  ;;  %v1190_v36 = vrot.slane %v7508_v11, 2 }
  0xf8   : > { %v843_v50 = vadd.f32 %v842_v32, %v660_v28 }
  0xf9   : > { %v7498_v29 = vadd.f32 %v1305_v37, %v1122_v45 }
  0xfa   : > { %5785 = vmatmul.msk.bf16.gmra.mxu0 %vm567_vm2, %v7495_v48  ;;  %5819 = vmatmul.msk.bf16.gmra.mxu1 %vm567_vm2, %v7410_v25 }
  0xfb   : > { %10053 = vst [vmem:[#allocation8_spill] sm:$0xff] %v7498_v29  ;;  %5849 = vmatmul.msk.bf16.gmra.mxu2 %vm567_vm2, %v7413_v26  ;;  %5879 = vmatmul.msk.bf16.gmra.mxu3 %vm567_vm2, %v1189_v51  ;;  %v1191_v29 = vsel %vm510_vm1, %v1188_v31, %v1190_v36 }
  0xfe   : > { %v1049_v54 = vpop.f32.mrf.mxu2  ;;  %v1308_v60 = vpop.f32.mrf.mxu3 }
  0xff   : > { %v1123_v5 = vadd.f32 %v1049_v54, %v843_v50  ;;  %v662_v2 = vpop.f32.mrf.mxu0  ;;  %v844_v3 = vpop.f32.mrf.mxu1  ;;  %v7515_v50 = vsel %vm510_vm1, %v538_v23, %v540_v17 }
 0x100   : > { %v845_v9 = vadd.f32 %v844_v3, %v662_v2  ;;  %v7521_v3 = vld [vmem:[%s7205_s18 + $0x98] sm:$0xff]  }
 0x101   : > { %v7510_v15 = vadd.f32 %v1308_v60, %v1123_v5  ;;  %10056 = vst [vmem:[#allocation11_spill] sm:$0xff] %v7521_v3  ;;  %v7524_v60 = vld [vmem:[%s7205_s18 + $0xa0] sm:$0xff]   ;;  %v7534_v23 = vunpack.c.h.b16 %v7521_v3 }
 0x102   : > { %10057 = vst [vmem:[#allocation12_spill] sm:$0xff] %v7524_v60  ;;  %v6821_v31 = vunpack.c.l.b16 %v7524_v60 }
 0x103   : > { %10054 = vst [vmem:[#allocation9_spill] sm:$0xff] %v7510_v15  ;;  %v7543_v15 = vrot.slane %v7429_v44, 2 }
 0x106   : > { %v1051_v37 = vpop.f32.mrf.mxu2  ;;  %v1310_v45 = vpop.f32.mrf.mxu3 }
 0x107   : > { %v1124_v28 = vadd.f32 %v1051_v37, %v845_v9  ;;  %v665_v32 = vpop.f32.mrf.mxu0  ;;  %v847_v51 = vpop.f32.mrf.mxu1 }
 0x108   : > { %v848_v54 = vadd.f32 %v847_v51, %v665_v32  ;;  %v7538_v51 = vpack.c.b16 %v6821_v31, %v7534_v23 }
 0x109   : > { %v7518_v2 = vadd.f32 %v1310_v45, %v1124_v28 }
 0x10a   : > { %5786 = vmatmul.msk.bf16.gmra.mxu0 %vm567_vm2, %v7515_v50  ;;  %5820 = vmatmul.msk.bf16.gmra.mxu1 %vm567_vm2, %v7443_v61  ;;  %10058 = vst [vmem:[#allocation13_spill] sm:$0xff] %v7538_v51 }
 0x10b   : > { %10055 = vst [vmem:[#allocation10_spill] sm:$0xff] %v7518_v2  ;;  %5850 = vmatmul.msk.bf16.gmra.mxu2 %vm567_vm2, %v7446_v62  ;;  %5880 = vmatmul.msk.bf16.gmra.mxu3 %vm567_vm2, %v1191_v29  ;;  %v1192_v29 = vrot.slane %v7538_v51, 2 }
 0x10e   : > { %v1054_v5 = vpop.f32.mrf.mxu2  ;;  %v1313_v9 = vpop.f32.mrf.mxu3 }
 0x10f   : > { %v1125_v37 = vadd.f32 %v1054_v5, %v848_v54  ;;  %v667_v45 = vpop.f32.mrf.mxu0  ;;  %v849_v28 = vpop.f32.mrf.mxu1  ;;  %v7552_v5 = vsel %vm510_vm1, %v540_v17, %v7543_v15 }
 0x110   : > { %v850_v32 = vadd.f32 %v849_v28, %v667_v45  ;;  %v6598_v45 = vld [vmem:[%s10001_s1 + $0xb8] sm:$0xff] }
 0x111   : > { %v7540_v2 = vadd.f32 %v1313_v9, %v1125_v37  ;;  %v1193_v9 = vsel %vm510_vm1, %v1190_v36, %v1192_v29  ;;  %v6595_v36 = vld [vmem:[%s10001_s1 + $0x9c] sm:$0xff]  ;;  %1868 = vmatpush.bf16.msrb.mxu2 %v6598_v45  ;;  %v6593_v45 = vld [vmem:[%s10001_s1 + $0x8c] sm:$0xff] }
 0x112   : > { %1675 = vmatpush.bf16.msrb.mxu1 %v6595_v36  ;;  %v6590_v36 = vld [vmem:[%s10001_s1 + $0x70] sm:$0xff] }
 0x113   : > { %10059 = vst [vmem:[#allocation14_spill] sm:$0xff] %v7540_v2 }
 0x116   : > { %v1056_v22 = vpop.f32.mrf.mxu2  ;;  %v7546_v3 = vpop.f32.mrf.mxu3 }
 0x117   : > { %10060 = vst [vmem:[#allocation15_spill] sm:$0xff] %v7546_v3  ;;  %v7548_v39 = vadd.f32 %v1056_v22, %v850_v32  ;;  %v670_v63 = vpop.f32.mrf.mxu0  ;;  %v852_v54 = vpop.f32.mrf.mxu1  ;;  %v7563_v22 = vunpack.c.h.b16 %v7524_v60  ;;  %v6591_v60 = vld [vmem:[%s10001_s1 + $0x78] sm:$0xff] }
 0x118   : > { %v853_v31 = vadd.f32 %v852_v54, %v670_v63  ;;  %v6592_v63 = vld [vmem:[%s10001_s1 + $0x80] sm:$0xff] }
 0x119   : > { %10061 = vst [vmem:[#allocation16_spill] sm:$0xff] %v7548_v39  ;;  %v1160_v39 = vpack.c.b16 %v7563_v22, %v7563_v22  ;;  %1472 = vmatpush.bf16.msrb.mxu0 %v6592_v63 }
 0x11a   : > { %5787 = vmatmul.msk.bf16.gmra.mxu0 %vm567_vm2, %v7552_v5  ;;  %5821 = vmatmul.msk.bf16.gmra.mxu1 %vm567_vm2, %v7485_v20  ;;  %10062 = vst [vmem:[#allocation17_spill] sm:$0xff] %v7563_v22 }
 0x11b   : > { %5851 = vmatmul.msk.bf16.gmra.mxu2 %vm567_vm2, %v7488_v21  ;;  %5881 = vmatmul.msk.bf16.gmra.mxu3 %vm567_vm2, %v1193_v9  ;;  %v509_v9 = vpack.c.b16 %v7480_v49, %v7480_v49  ;;  %v6597_v49 = vld [vmem:[%s10001_s1 + $0xb0] sm:$0xff] }
 0x11c   : > { %1869 = vmatpush.bf16.msrb.mxu2 %v6597_v49 }
 0x11d   : > { %1473 = vmatpush.bf16.msrb.mxu0 %v6591_v60 }
 0x11e   : > { %v1059_v37 = vpop.f32.mrf.mxu2  ;;  %v1318_v17 = vpop.f32.mrf.mxu3 }
 0x11f   : > { %v1127_v28 = vadd.f32 %v1059_v37, %v853_v31  ;;  %v672_v32 = vpop.f32.mrf.mxu0  ;;  %v854_v54 = vpop.f32.mrf.mxu1  ;;  %v6594_v31 = vld [vmem:[%s10001_s1 + $0x94] sm:$0xff]  ;;  %v544_v37 = vrot.slane %v509_v9, 2 }
 0x120   : > { %v855_v3 = vadd.f32 %v854_v54, %v672_v32  ;;  %v1194_v32 = vrot.slane %v1160_v39, 2  ;;  %1676 = vmatpush.bf16.msrb.mxu1 %v6594_v31 }
 0x121   : > { %v7578_v2 = vadd.f32 %v1318_v17, %v1127_v28  ;;  %v6596_v28 = vld [vmem:[%s10001_s1 + $0xa8] sm:$0xff]  ;;  %v545_v9 = vsel %vm510_vm1, %v7543_v15, %v544_v37  ;;  %1474 = vmatpush.bf16.msrb.mxu0 %v6590_v36 }
 0x122   : > { %v1195_v49 = vsel %vm510_vm1, %v1192_v29, %v1194_v32  ;;  %1870 = vmatpush.bf16.msrb.mxu2 %v6596_v28  ;;  %v729_v28 = vpack.c.b16 %v7440_v47, %v7440_v47 }
 0x123   : > { %10063 = vst [vmem:[#allocation18_spill] sm:$0xff] %v7578_v2 }
 0x124   : > { %1677 = vmatpush.bf16.msrb.mxu1 %v6593_v45 }
 0x126   : > { %v1061_v17 = vpop.f32.mrf.mxu2  ;;  %v7589_v63 = vpop.f32.mrf.mxu3 }
 0x127   : > { %10064 = vst [vmem:[#allocation19_spill] sm:$0xff] %v7589_v63  ;;  %v7600_v54 = vadd.f32 %v1061_v17, %v855_v3  ;;  %v675_v39 = vpop.f32.mrf.mxu0  ;;  %v857_v60 = vpop.f32.mrf.mxu1 }
 0x128   : > { %v858_v31 = vadd.f32 %v857_v60, %v675_v39 }
 0x129   : > { %10065 = vst [vmem:[#allocation20_spill] sm:$0xff] %v7600_v54 }
 0x12a   : > { %5788 = vmatmul.msk.bf16.gmra.mxu0 %vm567_vm2, %v545_v9  ;;  %5822 = vmatmul.msk.bf16.gmra.mxu1 %vm567_vm2, %v7426_v42 }
 0x12b   : > { %5852 = vmatmul.msk.bf16.gmra.mxu2 %vm567_vm2, %v7508_v11  ;;  %5882 = vmatmul.msk.bf16.gmra.mxu3 %vm567_vm2, %v1195_v49  ;;  %v936_v49 = vpack.c.b16 %v7534_v23, %v7534_v23 }
 0x12e   : > { %v1064_v3 = vpop.f32.mrf.mxu2  ;;  %v1323_v17 = vpop.f32.mrf.mxu3 }
 0x12f   : > { %v1129_v63 = vadd.f32 %v1064_v3, %v858_v31  ;;  %v677_v54 = vpop.f32.mrf.mxu0  ;;  %v859_v39 = vpop.f32.mrf.mxu1 }
 0x130   : > { %v860_v60 = vadd.f32 %v859_v39, %v677_v54 }
 0x131   : > { %v7611_v29 = vadd.f32 %v1323_v17, %v1129_v63 }
 0x136   : > { %v1066_v36 = vpop.f32.mrf.mxu2  ;;  %v7613_v45 = vpop.f32.mrf.mxu3 }
 0x137   : > { %v7617_v9 = vadd.f32 %v1066_v36, %v860_v60  ;;  %v680_v2 = vpop.f32.mrf.mxu0  ;;  %v862_v22 = vpop.f32.mrf.mxu1 }
 0x138   : > { %v863_v51 = vadd.f32 %v862_v22, %v680_v2 }
 0x13a   : > { %5789 = vmatmul.msk.bf16.gmra.mxu0 %vm567_vm2, %v544_v37  ;;  %5823 = vmatmul.msk.bf16.gmra.mxu1 %vm567_vm2, %v729_v28 }
 0x13b   : > { %5853 = vmatmul.msk.bf16.gmra.mxu2 %vm567_vm2, %v936_v49  ;;  %5883 = vmatmul.msk.bf16.gmra.mxu3 %vm567_vm2, %v1194_v32 }
 0x13e   : > { %v1069_v63 = vpop.f32.mrf.mxu2  ;;  %v1328_v54 = vpop.f32.mrf.mxu3 }
 0x13f   : > { %v1131_v31 = vadd.f32 %v1069_v63, %v863_v51  ;;  %v682_v47 = vpop.f32.mrf.mxu0  ;;  %v864_v3 = vpop.f32.mrf.mxu1 }
 0x140   : > { %v865_v17 = vadd.f32 %v864_v3, %v682_v47 }
 0x141   : > { %v7625_v39 = vadd.f32 %v1328_v54, %v1131_v31 }
 0x146   : > { %v1071_v60 = vpop.f32.mrf.mxu2  ;;  %v7627_v36 = vpop.f32.mrf.mxu3 }
 0x147   : > { %v7629_v2 = vadd.f32 %v1071_v60, %v865_v17  ;;  %v685_v23 = vpop.f32.mrf.mxu0  ;;  %v867_v22 = vpop.f32.mrf.mxu1 }
 0x148   : > { %v868_v37 = vadd.f32 %v867_v22, %v685_v23 }
 0x14a   : > { %5896 = vmatmul.msk.bf16.vlgmr.msrb.gmra.mxu0 %vm567_vm2, %v7260_v52  ;;  %5926 = vmatmul.msk.bf16.vlgmr.msrb.gmra.mxu1 %vm567_vm2, %v7296_v4 }
 0x14b   : > { %5960 = vmatmul.msk.bf16.vlgmr.msrb.gmra.mxu2 %vm567_vm2, %v7263_v53 }
 0x14e   : > { %v1074_v51 = vpop.f32.mrf.mxu2  ;;  %v1333_v32 = vpop.f32.mrf.mxu3 }
 0x14f   : > { %v1133_v28 = vadd.f32 %v1074_v51, %v868_v37  ;;  %v687_v49 = vpop.f32.mrf.mxu0  ;;  %v869_v63 = vpop.f32.mrf.mxu1 }
 0x150   : > { %v870_v54 = vadd.f32 %v869_v63, %v687_v49 }
 0x151   : > { %v7637_v31 = vadd.f32 %v1333_v32, %v1133_v28 }
 0x156   : > { %v1076_v47 = vpop.f32.mrf.mxu2  ;;  %v7639_v3 = vpop.f32.mrf.mxu3 }
 0x157   : > { %v7641_v17 = vadd.f32 %v1076_v47, %v870_v54  ;;  %v690_v52 = vpop.f32.mrf.mxu0  ;;  %v872_v60 = vpop.f32.mrf.mxu1 }
 0x158   : > { %v873_v23 = vadd.f32 %v872_v60, %v690_v52 }
 0x15a   : > { %5897 = vmatmul.msk.bf16.gmra.mxu0 %vm567_vm2, %v7274_v58  ;;  %5927 = vmatmul.msk.bf16.gmra.mxu1 %vm567_vm2, %v7315_v10 }
 0x15b   : > { %5961 = vmatmul.msk.bf16.gmra.mxu2 %vm567_vm2, %v7277_v59 }
 0x15e   : > { %v1079_v53 = vpop.f32.mrf.mxu2  ;;  %v1338_v4 = vpop.f32.mrf.mxu3 }
 0x15f   : > { %v1135_v22 = vadd.f32 %v1079_v53, %v873_v23  ;;  %v692_v37 = vpop.f32.mrf.mxu0  ;;  %v874_v51 = vpop.f32.mrf.mxu1 }
 0x160   : > { %v875_v32 = vadd.f32 %v874_v51, %v692_v37 }
 0x161   : > { %v7649_v28 = vadd.f32 %v1338_v4, %v1135_v22 }
 0x166   : > { %v1081_v49 = vpop.f32.mrf.mxu2  ;;  %v7651_v63 = vpop.f32.mrf.mxu3 }
 0x167   : > { %v7653_v54 = vadd.f32 %v1081_v49, %v875_v32  ;;  %v695_v58 = vpop.f32.mrf.mxu0  ;;  %v877_v47 = vpop.f32.mrf.mxu1 }
 0x168   : > { %v878_v52 = vadd.f32 %v877_v47, %v695_v58 }
 0x16a   : > { %5898 = vmatmul.msk.bf16.gmra.mxu0 %vm567_vm2, %v7288_v0  ;;  %5928 = vmatmul.msk.bf16.gmra.mxu1 %vm567_vm2, %v7334_v16 }
 0x16b   : > { %5962 = vmatmul.msk.bf16.gmra.mxu2 %vm567_vm2, %v7291_v1 }
 0x16e   : > { %v1084_v59 = vpop.f32.mrf.mxu2  ;;  %v1343_v10 = vpop.f32.mrf.mxu3 }
 0x16f   : > { %v1137_v60 = vadd.f32 %v1084_v59, %v878_v52  ;;  %v697_v23 = vpop.f32.mrf.mxu0  ;;  %v879_v53 = vpop.f32.mrf.mxu1 }
 0x170   : > { %v880_v4 = vadd.f32 %v879_v53, %v697_v23 }
 0x171   : > { %v7661_v22 = vadd.f32 %v1343_v10, %v1137_v60 }
 0x176   : > { %v1086_v37 = vpop.f32.mrf.mxu2  ;;  %v7663_v51 = vpop.f32.mrf.mxu3 }
 0x177   : > { %v7665_v32 = vadd.f32 %v1086_v37, %v880_v4  ;;  %v700_v0 = vpop.f32.mrf.mxu0  ;;  %v882_v49 = vpop.f32.mrf.mxu1 }
 0x178   : > { %v883_v58 = vadd.f32 %v882_v49, %v700_v0 }
 0x17a   : > { %5899 = vmatmul.msk.bf16.gmra.mxu0 %vm567_vm2, %v7307_v6  ;;  %5929 = vmatmul.msk.bf16.gmra.mxu1 %vm567_vm2, %v7353_v24 }
 0x17b   : > { %5963 = vmatmul.msk.bf16.gmra.mxu2 %vm567_vm2, %v7310_v7 }
 0x17e   : > { %v1089_v1 = vpop.f32.mrf.mxu2  ;;  %v1348_v16 = vpop.f32.mrf.mxu3 }
 0x17f   : > { %v1139_v47 = vadd.f32 %v1089_v1, %v883_v58  ;;  %v702_v52 = vpop.f32.mrf.mxu0  ;;  %v884_v59 = vpop.f32.mrf.mxu1 }
 0x180   : > { %v885_v10 = vadd.f32 %v884_v59, %v702_v52  ;;  %v6614_v52 = vld [vmem:[%s10003_s3 + $0x78] sm:$0xff] }
 0x181   : > { %v7673_v60 = vadd.f32 %v1348_v16, %v1139_v47  ;;  %2395 = vmatpush.bf16.msrb.mxu3 %v6614_v52 }
 0x186   : > { %v1091_v23 = vpop.f32.mrf.mxu2  ;;  %v7675_v53 = vpop.f32.mrf.mxu3 }
 0x187   : > { %v7677_v4 = vadd.f32 %v1091_v23, %v885_v10  ;;  %v705_v6 = vpop.f32.mrf.mxu0  ;;  %v887_v37 = vpop.f32.mrf.mxu1 }
 0x188   : > { %v888_v0 = vadd.f32 %v887_v37, %v705_v6 }
 0x18a   : > { %5900 = vmatmul.msk.bf16.gmra.mxu0 %vm567_vm2, %v7326_v12  ;;  %5930 = vmatmul.msk.bf16.gmra.mxu1 %vm567_vm2, %v7374_v43 }
 0x18b   : > { %5964 = vmatmul.msk.bf16.gmra.mxu2 %vm567_vm2, %v7329_v13 }
 0x18e   : > { %v1094_v7 = vpop.f32.mrf.mxu2  ;;  %v1353_v24 = vpop.f32.mrf.mxu3 }
 0x18f   : > { %v1141_v49 = vadd.f32 %v1094_v7, %v888_v0  ;;  %v707_v58 = vpop.f32.mrf.mxu0  ;;  %v889_v1 = vpop.f32.mrf.mxu1 }
 0x190   : > { %v890_v16 = vadd.f32 %v889_v1, %v707_v58 }
 0x191   : > { %v7685_v47 = vadd.f32 %v1353_v24, %v1141_v49 }
 0x196   : > { %v1096_v12 = vpop.f32.mrf.mxu2  ;;  %v7690_v59 = vpop.f32.mrf.mxu3 }
 0x197   : > { %v7692_v43 = vadd.f32 %v1096_v12, %v890_v16  ;;  %v710_v10 = vpop.f32.mrf.mxu0  ;;  %v892_v13 = vpop.f32.mrf.mxu1 }
 0x198   : > { %v893_v23 = vadd.f32 %v892_v13, %v710_v10 }
 0x19a   : > { %5901 = vmatmul.msk.bf16.gmra.mxu0 %vm567_vm2, %v7345_v18  ;;  %5931 = vmatmul.msk.bf16.gmra.mxu1 %vm567_vm2, %v7397_v8 }
 0x19b   : > { %5965 = vmatmul.msk.bf16.gmra.mxu2 %vm567_vm2, %v7348_v19 }
 0x19e   : > { %v1099_v6 = vpop.f32.mrf.mxu2  ;;  %v1358_v37 = vpop.f32.mrf.mxu3 }
 0x19f   : > { %v1143_v0 = vadd.f32 %v1099_v6, %v893_v23  ;;  %v712_v7 = vpop.f32.mrf.mxu0  ;;  %v894_v24 = vpop.f32.mrf.mxu1 }
 0x1a0   : > { %v895_v49 = vadd.f32 %v894_v24, %v712_v7 }
 0x1a1   : > { %v7700_v58 = vadd.f32 %v1358_v37, %v1143_v0 }
 0x1a3   : > { %10066 = vst [vmem:[#allocation21_spill] sm:$0xff] %v7700_v58 }
 0x1a6   : > { %v1101_v1 = vpop.f32.mrf.mxu2  ;;  %v7702_v16 = vpop.f32.mrf.mxu3 }
 0x1a7   : > { %10067 = vst [vmem:[#allocation22_spill] sm:$0xff] %v7702_v16  ;;  %v7704_v52 = vadd.f32 %v1101_v1, %v895_v49  ;;  %v715_v18 = vpop.f32.mrf.mxu0  ;;  %v897_v12 = vpop.f32.mrf.mxu1  ;;  %v10095_v16 = vld [vmem:[#allocation18_spill] sm:$0xff] }
 0x1a8   : > { %v898_v10 = vadd.f32 %v897_v12, %v715_v18 }
 0x1a9   : > { %10068 = vst [vmem:[#allocation23_spill] sm:$0xff] %v7704_v52 }
 0x1aa   : > { %5902 = vmatmul.msk.bf16.gmra.mxu0 %vm567_vm2, %v7364_v33  ;;  %5932 = vmatmul.msk.bf16.gmra.mxu1 %vm567_vm2, %v7420_v38  ;;  %v6613_v38 = vld [vmem:[%s10003_s3 + $0x70] sm:$0xff] }
 0x1ab   : > { %5966 = vmatmul.msk.bf16.gmra.mxu2 %vm567_vm2, %v7367_v34  ;;  %2396 = vmatpush.bf16.msrb.mxu3 %v6613_v38 }
 0x1ae   : > { %v1104_v19 = vpop.f32.mrf.mxu2  ;;  %v1363_v8 = vpop.f32.mrf.mxu3 }
 0x1af   : > { %v1145_v13 = vadd.f32 %v1104_v19, %v898_v10  ;;  %v717_v23 = vpop.f32.mrf.mxu0  ;;  %v899_v6 = vpop.f32.mrf.mxu1 }
 0x1b0   : > { %v900_v37 = vadd.f32 %v899_v6, %v717_v23 }
 0x1b1   : > { %v7712_v0 = vadd.f32 %v1363_v8, %v1145_v13  ;;  %v6612_v13 = vld [vmem:[%s10003_s3 + $0x68] sm:$0xff] }
 0x1b2   : > { %2397 = vmatpush.bf16.msrb.mxu3 %v6612_v13 }
 0x1b3   : > { %10069 = vst [vmem:[#allocation24_spill] sm:$0xff] %v7712_v0 }
 0x1b6   : > { %v1106_v7 = vpop.f32.mrf.mxu2  ;;  %v7714_v24 = vpop.f32.mrf.mxu3 }
 0x1b7   : > { %10070 = vst [vmem:[#allocation25_spill] sm:$0xff] %v7714_v24  ;;  %v7716_v49 = vadd.f32 %v1106_v7, %v900_v37  ;;  %v720_v33 = vpop.f32.mrf.mxu0  ;;  %v902_v1 = vpop.f32.mrf.mxu1  ;;  %v6610_v7 = vld [vmem:[%s10003_s3 + $0x58] sm:$0xff]  ;;  %v10081_v24 = vld [vmem:[#allocation17_spill] sm:$0xff] }
 0x1b8   : > { %v903_v34 = vadd.f32 %v902_v1, %v720_v33  ;;  %v6609_v1 = vld [vmem:[%s10003_s3 + $0x50] sm:$0xff] }
 0x1b9   : > { %10071 = vst [vmem:[#allocation26_spill] sm:$0xff] %v7716_v49 }
 0x1ba   : > { %5903 = vmatmul.msk.bf16.gmra.mxu0 %vm567_vm2, %v7387_v55  ;;  %5933 = vmatmul.msk.bf16.gmra.mxu1 %vm567_vm2, %v7457_v30  ;;  %v6611_v55 = vld [vmem:[%s10003_s3 + $0x60] sm:$0xff] }
 0x1bb   : > { %5967 = vmatmul.msk.bf16.gmra.mxu2 %vm567_vm2, %v7390_v56  ;;  %2398 = vmatpush.bf16.msrb.mxu3 %v6611_v55 }
 0x1be   : > { %v1109_v18 = vpop.f32.mrf.mxu2  ;;  %v1368_v12 = vpop.f32.mrf.mxu3 }
 0x1bf   : > { %v1147_v10 = vadd.f32 %v1109_v18, %v903_v34  ;;  %v722_v19 = vpop.f32.mrf.mxu0  ;;  %v904_v8 = vpop.f32.mrf.mxu1  ;;  %2399 = vmatpush.bf16.msrb.mxu3 %v6610_v7 }
 0x1c0   : > { %v6607_v19 = vld [vmem:[%s10003_s3 + $0x40] sm:$0xff] }
 0x1c1   : > { %v7730_v23 = vadd.f32 %v1368_v12, %v1147_v10 }
 0x1c3   : > { %10072 = vst [vmem:[#allocation27_spill] sm:$0xff] %v7730_v23  ;;  %2400 = vmatpush.bf16.msrb.mxu3 %v6609_v1 }
 0x1c6   : > { %v1111_v30 = vpop.f32.mrf.mxu2  ;;  %v1370_v6 = vpop.f32.mrf.mxu3 }
 0x1c7   : > { %v1476_v56 = vpop.f32.mrf.mxu0  ;;  %v1679_v37 = vpop.f32.mrf.mxu1 }
 0x1c8   : > { %v1565_v33 = vadd.f32 %v1476_v56, %v7369_v35  ;;  %v7751_v35 = vld [vmem:[%s10002_s2] ss:$0 sm:$0xff] }
 0x1ca   : > { %5904 = vmatmul.msk.bf16.gmra.mxu0 %vm567_vm2, %v7410_v25  ;;  %5934 = vmatmul.msk.bf16.gmra.mxu1 %vm567_vm2, %v7495_v48  ;;  %v1768_v38 = vadd.f32 %v1679_v37, %v1565_v33  ;;  %v6608_v48 = vld [vmem:[%s10003_s3 + $0x48] sm:$0xff] }
 0x1cb   : > { %5968 = vmatmul.msk.bf16.gmra.mxu2 %vm567_vm2, %v7413_v26  ;;  %2401 = vmatpush.bf16.msrb.mxu3 %v6608_v48 }
 0x1ce   : > { %v1872_v34 = vpop.f32.mrf.mxu2 }
 0x1cf   : > { %v1961_v18 = vadd.f32 %v1872_v34, %v1768_v38  ;;  %v1478_v25 = vpop.f32.mrf.mxu0  ;;  %v1681_v12 = vpop.f32.mrf.mxu1  ;;  %2402 = vmatpush.bf16.msrb.mxu3 %v6607_v19 }
 0x1d0   : > { %v1566_v26 = vadd.f32 %v1478_v25, %v7377_v46 }
 0x1d1   : > { %v2000_v10 = vadd.f32 %v7751_v35, %v1961_v18 }
 0x1d2   : > { %v1769_v8 = vadd.f32 %v1681_v12, %v1566_v26 }
 0x1d3   : > { %v2035_v55 = vmax.f32 %v2000_v10, 0.0 }
 0x1d5   : > { %v2070_v46 = vpack.c.bf16 %v2035_v55, %v2035_v55 }
 0x1d6   : > { %v1874_v13 = vpop.f32.mrf.mxu2 }
 0x1d7   : > { %v1962_v30 = vadd.f32 %v1874_v13, %v1769_v8  ;;  %v1481_v6 = vpop.f32.mrf.mxu0  ;;  %v1684_v56 = vpop.f32.mrf.mxu1  ;;  %v2167_v18 = vunpack.c.l.b16 %v2070_v46 }
 0x1d8   : > { %v1567_v7 = vadd.f32 %v1481_v6, %v7392_v57 }
 0x1d9   : > { %v2001_v37 = vadd.f32 %v7751_v35, %v1962_v30 }
 0x1da   : > { %5905 = vmatmul.msk.bf16.gmra.mxu0 %vm567_vm2, %v7443_v61  ;;  %5935 = vmatmul.msk.bf16.gmra.mxu1 %vm567_vm2, %v7515_v50  ;;  %v1770_v38 = vadd.f32 %v1684_v56, %v1567_v7 }
 0x1db   : > { %v2036_v33 = vmax.f32 %v2001_v37, 0.0  ;;  %5969 = vmatmul.msk.bf16.gmra.mxu2 %vm567_vm2, %v7446_v62 }
 0x1dd   : > { %v2071_v1 = vpack.c.bf16 %v2036_v33, %v2036_v33 }
 0x1de   : > { %v1877_v34 = vpop.f32.mrf.mxu2 }
 0x1df   : > { %v2168_v25 = vunpack.c.l.b16 %v2071_v1  ;;  %v1963_v12 = vadd.f32 %v1877_v34, %v1770_v38  ;;  %v1483_v48 = vpop.f32.mrf.mxu0  ;;  %v1686_v26 = vpop.f32.mrf.mxu1 }
 0x1e0   : > { %v1568_v61 = vadd.f32 %v1483_v48, %v7400_v14 }
 0x1e1   : > { %v7769_v57 = vpack.c.b16 %v2168_v25, %v2167_v18  ;;  %v2002_v10 = vadd.f32 %v7751_v35, %v1963_v12 }
 0x1e2   : > { %v1771_v50 = vadd.f32 %v1686_v26, %v1568_v61  ;;  %v1613_v26 = vrot.slane %v7466_v40, 2 }
 0x1e3   : > { %v2037_v8 = vmax.f32 %v2002_v10, 0.0  ;;  %v2216_v37 = vshll.u32 %v7769_v57, 16  ;;  %v2214_v12 = vshrl.u32 %v7769_v57, 16 }
 0x1e5   : > { %v2072_v56 = vpack.c.bf16 %v2037_v8, %v2037_v8  ;;  %v2218_v25 = vrot.slane %v2216_v37, 1 }
 0x1e6   : > { %v1879_v19 = vpop.f32.mrf.mxu2 }
 0x1e7   : > { %v1964_v13 = vadd.f32 %v1879_v19, %v1771_v50  ;;  %v1486_v55 = vpop.f32.mrf.mxu0  ;;  %v1689_v62 = vpop.f32.mrf.mxu1  ;;  %v2169_v1 = vunpack.c.l.b16 %v2072_v56  ;;  %v2219_v10 = vor.u32 %v2218_v25, %v2214_v12 }
 0x1e8   : > { %v1569_v6 = vadd.f32 %v1486_v55, %v7415_v27 }
 0x1e9   : > { %v2003_v30 = vadd.f32 %v7751_v35, %v1964_v13 }
 0x1ea   : > { %5906 = vmatmul.msk.bf16.gmra.mxu0 %vm567_vm2, %v7485_v20  ;;  %5936 = vmatmul.msk.bf16.gmra.mxu1 %vm567_vm2, %v7552_v5  ;;  %v1772_v46 = vadd.f32 %v1689_v62, %v1569_v6 }
 0x1eb   : > { %v2038_v14 = vmax.f32 %v2003_v30, 0.0  ;;  %5970 = vmatmul.msk.bf16.gmra.mxu2 %vm567_vm2, %v7488_v21 }
 0x1ed   : > { %v2073_v7 = vpack.c.bf16 %v2038_v14, %v2038_v14  ;;  %v1614_v14 = vsel %vm510_vm1, %v7543_v15, %v1613_v26 }
 0x1ee   : > { %v1882_v33 = vpop.f32.mrf.mxu2 }
 0x1ef   : > { %v2170_v38 = vunpack.c.l.b16 %v2073_v7  ;;  %v1965_v34 = vadd.f32 %v1882_v33, %v1772_v46  ;;  %v1488_v27 = vpop.f32.mrf.mxu0  ;;  %v1691_v18 = vpop.f32.mrf.mxu1  ;;  %v10073_v46 = vld [vmem:[#allocation5_spill] sm:$0xff] }
 0x1f0   : > { %v1570_v5 = vadd.f32 %v1488_v27, %v7423_v41 }
 0x1f1   : > { %v7782_v20 = vpack.c.b16 %v2170_v38, %v2169_v1  ;;  %v2004_v48 = vadd.f32 %v7751_v35, %v1965_v34 }
 0x1f2   : > { %v1773_v50 = vadd.f32 %v1691_v18, %v1570_v5 }
 0x1f3   : > { %v2221_v21 = vshll.u32 %v7782_v20, 16  ;;  %v2225_v61 = vshrl.u32 %v7782_v20, 16  ;;  %v2039_v62 = vmax.f32 %v2004_v48, 0.0 }
 0x1f5   : > { %v2223_v19 = vrot.slane %v2221_v21, 1  ;;  %v3089_v8 = vrot.slane %v2221_v21, 3  ;;  %v3088_v13 = vrot.slane %v2225_v61, 2  ;;  %v2074_v1 = vpack.c.bf16 %v2039_v62, %v2039_v62  ;;  %v10074_v21 = vld [vmem:[#allocation6_spill] sm:$0xff] }
 0x1f6   : > { %v1884_v55 = vpop.f32.mrf.mxu2 }
 0x1f7   : > { %v1966_v30 = vadd.f32 %v1884_v55, %v1773_v50  ;;  %v1491_v41 = vpop.f32.mrf.mxu0  ;;  %v1694_v6 = vpop.f32.mrf.mxu1  ;;  %v2224_v56 = vsel %vm2212_vm3, %v2219_v10, %v2223_v19  ;;  %v3090_v37 = vor.u32 %v3089_v8, %v3088_v13  ;;  %v2171_v15 = vunpack.c.l.b16 %v2074_v1  ;;  %v10075_v55 = vld [vmem:[#allocation11_spill] sm:$0xff] }
 0x1f8   : > { %2403 = vmatmul.bf16.vlgmr.msrb.gmra.mxu3 %v2224_v56  ;;  %v1571_v33 = vadd.f32 %v1491_v41, %v10073_v46  ;;  %v1615_v62 = vrot.slane %v10075_v55, 2  ;;  %v2227_v41 = vor.u32 %v2225_v61, %v2223_v19  ;;  %v10077_v19 = vld [vmem:[#allocation7_spill] sm:$0xff] }
 0x1f9   : > { %v2005_v7 = vadd.f32 %v7751_v35, %v1966_v30 }
 0x1fa   : > { %5907 = vmatmul.msk.bf16.gmra.mxu0 %vm567_vm2, %v7426_v42  ;;  %5937 = vmatmul.msk.bf16.gmra.mxu1 %vm567_vm2, %v1614_v14  ;;  %v1774_v27 = vadd.f32 %v1694_v6, %v1571_v33 }
 0x1fb   : > { %v2040_v38 = vmax.f32 %v2005_v7, 0.0  ;;  %5971 = vmatmul.msk.bf16.gmra.mxu2 %vm567_vm2, %v7508_v11 }
 0x1fd   : > { %v2075_v34 = vpack.c.bf16 %v2040_v38, %v2040_v38 }
 0x1fe   : > { %v1887_v18 = vpop.f32.mrf.mxu2 }
 0x1ff   : > { %v2172_v25 = vunpack.c.l.b16 %v2075_v34  ;;  %v1967_v5 = vadd.f32 %v1887_v18, %v1774_v27  ;;  %v1493_v12 = vpop.f32.mrf.mxu0  ;;  %v1696_v48 = vpop.f32.mrf.mxu1  ;;  %v1616_v18 = vsel %vm510_vm1, %v1613_v26, %v1615_v62 }
 0x200   : > { %v1572_v10 = vadd.f32 %v1493_v12, %v10074_v21  ;;  %v10078_v21 = vld [vmem:[#allocation13_spill] sm:$0xff] }
 0x201   : > { %v7801_v50 = vpack.c.b16 %v2172_v25, %v2171_v15  ;;  %v2006_v42 = vadd.f32 %v7751_v35, %v1967_v5 }
 0x202   : > { %v1775_v30 = vadd.f32 %v1696_v48, %v1572_v10 }
 0x203   : > { %v2041_v8 = vmax.f32 %v2006_v42, 0.0  ;;  %v2229_v13 = vshll.u32 %v7801_v50, 16  ;;  %v2233_v11 = vshrl.u32 %v7801_v50, 16 }
 0x205   : > { %v2076_v6 = vpack.c.bf16 %v2041_v8, %v2041_v8  ;;  %v2231_v56 = vrot.slane %v2229_v13, 1  ;;  %v3092_v14 = vrot.slane %v2229_v13, 3  ;;  %v3091_v7 = vrot.slane %v2233_v11, 2 }
 0x206   : > { %v1889_v46 = vpop.f32.mrf.mxu2 }
 0x207   : > { %v2173_v33 = vunpack.c.l.b16 %v2076_v6  ;;  %v1968_v1 = vadd.f32 %v1889_v46, %v1775_v30  ;;  %v1496_v38 = vpop.f32.mrf.mxu0  ;;  %v1699_v34 = vpop.f32.mrf.mxu1  ;;  %v2232_v27 = vsel %vm2212_vm3, %v2227_v41, %v2231_v56  ;;  %v3093_v12 = vor.u32 %v3092_v14, %v3091_v7  ;;  %v7822_v6 = vld [vmem:[%s7205_s18 + $0xa8] sm:$0xff]   ;;  %v10079_v7 = vld [vmem:[#allocation8_spill] sm:$0xff] }
 0x208   : > { %2408 = vmatmul.bf16.gmra.mxu3 %v2232_v27  ;;  %v1573_v5 = vadd.f32 %v1496_v38, %v10077_v19 }
 0x209   : > { %v7809_v15 = vpack.c.b16 %v2173_v33, %v2172_v25  ;;  %v2007_v61 = vadd.f32 %v7751_v35, %v1968_v1  ;;  %v7819_v26 = vsel %vm3087_vm4, %v3090_v37, %v3093_v12  ;;  %v10080_v1 = vld [vmem:[#allocation12_spill] sm:$0xff] }
 0x20a   : > { %5908 = vmatmul.msk.bf16.gmra.mxu0 %vm567_vm2, %v7429_v44  ;;  %5938 = vmatmul.msk.bf16.gmra.mxu1 %vm567_vm2, %v1616_v18  ;;  %v1776_v10 = vadd.f32 %v1699_v34, %v1573_v5  ;;  %v1617_v38 = vrot.slane %v10080_v1, 2  ;;  %v6825_v34 = vunpack.c.l.b16 %v7822_v6 }
 0x20b   : > { %10076 = vst [vmem:[#allocation5_spill] sm:$0xff] %v7809_v15  ;;  %v2042_v48 = vmax.f32 %v2007_v61, 0.0  ;;  %5972 = vmatmul.msk.bf16.gmra.mxu2 %vm567_vm2, %v10078_v21  ;;  %v2235_v61 = vor.u32 %v2233_v11, %v2231_v56  ;;  %v3780_v19 = vshll.u32 %v7809_v15, 16 }
 0x20c   : > { %v1816_v11 = vpack.c.b16 %v6825_v34, %v10081_v24 }
 0x20d   : > { %v2077_v25 = vpack.c.bf16 %v2042_v48, %v2042_v48  ;;  %v3782_v56 = vrot.slane %v3780_v19, 1 }
 0x20e   : > { %v1892_v42 = vpop.f32.mrf.mxu2 }
 0x20f   : > { %v2174_v8 = vunpack.c.l.b16 %v2077_v25  ;;  %v1969_v13 = vadd.f32 %v1892_v42, %v1776_v10  ;;  %v1498_v30 = vpop.f32.mrf.mxu0  ;;  %v1701_v41 = vpop.f32.mrf.mxu1  ;;  %v1618_v10 = vsel %vm510_vm1, %v1615_v62, %v1617_v38  ;;  %v3778_v62 = vshrl.u32 %v7809_v15, 16 }
 0x210   : > { %v1574_v46 = vadd.f32 %v1498_v30, %v10079_v7 }
 0x211   : > { %v7824_v14 = vpack.c.b16 %v2174_v8, %v2173_v33  ;;  %v2008_v44 = vadd.f32 %v7751_v35, %v1969_v13  ;;  %v3783_v34 = vor.u32 %v3782_v56, %v3778_v62 }
 0x212   : > { %v1777_v48 = vadd.f32 %v1701_v41, %v1574_v46  ;;  %v10083_v46 = vld [vmem:[#allocation9_spill] sm:$0xff] }
 0x213   : > { %v2043_v27 = vmax.f32 %v2008_v44, 0.0  ;;  %v2237_v37 = vshll.u32 %v7824_v14, 16  ;;  %v2241_v18 = vshrl.u32 %v7824_v14, 16 }
 0x215   : > { %v2078_v5 = vpack.c.bf16 %v2043_v27, %v2043_v27  ;;  %v2239_v33 = vrot.slane %v2237_v37, 1  ;;  %v3095_v21 = vrot.slane %v2241_v18, 2  ;;  %v3096_v42 = vrot.slane %v2237_v37, 3 }
 0x216   : > { %v1894_v25 = vpop.f32.mrf.mxu2  ;;  %v4087_v37 = vrot.slane %v7809_v15, 1 }
 0x217   : > { %v2175_v13 = vunpack.c.l.b16 %v2078_v5  ;;  %v1970_v30 = vadd.f32 %v1894_v25, %v1777_v48  ;;  %v1501_v44 = vpop.f32.mrf.mxu0  ;;  %v1704_v7 = vpop.f32.mrf.mxu1  ;;  %v2240_v23 = vsel %vm2212_vm3, %v2235_v61, %v2239_v33  ;;  %v3097_v0 = vor.u32 %v3096_v42, %v3095_v21 }
 0x218   : > { %2413 = vmatmul.bf16.gmra.mxu3 %v2240_v23  ;;  %v1575_v49 = vadd.f32 %v1501_v44, %v10083_v46  ;;  %v7860_v44 = vld [vmem:[%s7205_s18 + $0xb0] sm:$0xff]   ;;  %v6826_v46 = vunpack.c.h.b16 %v7822_v6 }
 0x219   : > { %v7838_v27 = vpack.c.b16 %v2175_v13, %v2174_v8  ;;  %v2009_v41 = vadd.f32 %v7751_v35, %v1970_v30  ;;  %v7849_v24 = vsel %vm3087_vm4, %v3093_v12, %v3097_v0 }
 0x21a   : > { %5909 = vmatmul.msk.bf16.gmra.mxu0 %vm567_vm2, %v7466_v40  ;;  %5939 = vmatmul.msk.bf16.gmra.mxu1 %vm567_vm2, %v1618_v10  ;;  %v1778_v19 = vadd.f32 %v1704_v7, %v1575_v49  ;;  %v10020_v7 = vrot.slane %v7822_v6, 2 }
 0x21b   : > { %10082 = vst [vmem:[#allocation6_spill] sm:$0xff] %v7838_v27  ;;  %v2044_v61 = vmax.f32 %v2009_v41, 0.0  ;;  %5973 = vmatmul.msk.bf16.gmra.mxu2 %vm567_vm2, %v1816_v11  ;;  %v3785_v23 = vshll.u32 %v7838_v27, 16  ;;  %v4088_v8 = vrot.slane %v7838_v27, 1  ;;  %v10086_v41 = vld [vmem:[#allocation10_spill] sm:$0xff] }
 0x21d   : > { %v2079_v40 = vpack.c.bf16 %v2044_v61, %v2044_v61  ;;  %v3787_v5 = vrot.slane %v3785_v23, 1  ;;  %v7854_v48 = vsel %vm2641_vm5, %v4087_v37, %v4088_v8  ;;  %v7870_v61 = vunpack.c.l.b16 %v7860_v44 }
 0x21e   : > { %10084 = vst [vmem:[#allocation11_spill] sm:$0xff] %v7854_v48  ;;  %v1897_v21 = vpop.f32.mrf.mxu2 }
 0x21f   : > { %v2176_v25 = vunpack.c.l.b16 %v2079_v40  ;;  %v1971_v10 = vadd.f32 %v1897_v21, %v1778_v19  ;;  %v1503_v42 = vpop.f32.mrf.mxu0  ;;  %v1706_v30 = vpop.f32.mrf.mxu1  ;;  %v7857_v12 = vsel %vm2212_vm3, %v3783_v34, %v3787_v5  ;;  %v2243_v34 = vor.u32 %v2241_v18, %v2239_v33 }
 0x220   : > { %10085 = vst [vmem:[#allocation7_spill] sm:$0xff] %v7857_v12  ;;  %v1576_v49 = vadd.f32 %v1503_v42, %v10086_v41  ;;  %v1620_v42 = vsel %vm510_vm1, %v1617_v38, %v10020_v7  ;;  %v1817_v33 = vpack.c.b16 %v7870_v61, %v6826_v46  ;;  %v6622_v38 = vld [vmem:[%s10003_s3 + $0xb8] sm:$0xff] }
 0x221   : > { %v7862_v11 = vpack.c.b16 %v2176_v25, %v2175_v13  ;;  %v2010_v56 = vadd.f32 %v7751_v35, %v1971_v10  ;;  %v6630_v46 = vld [vmem:[%s10003_s3 + $0xf8] sm:$0xff]  ;;  %2734 = vmatpush.bf16.msra.mxu0 %v6622_v38 }
 0x222   : > { %v1779_v13 = vadd.f32 %v1706_v30, %v1576_v49  ;;  %2959 = vmatpush.bf16.msra.mxu1 %v6630_v46 }
 0x223   : > { %v2045_v62 = vmax.f32 %v2010_v56, 0.0  ;;  %v2245_v37 = vshll.u32 %v7862_v11, 16  ;;  %v10018_v23 = vshrl.u32 %v7862_v11, 16 }
 0x225   : > { %v2080_v40 = vpack.c.bf16 %v2045_v62, %v2045_v62  ;;  %v2247_v19 = vrot.slane %v2245_v37, 1  ;;  %v3099_v21 = vrot.slane %v10018_v23, 2  ;;  %v3100_v56 = vrot.slane %v2245_v37, 3  ;;  %v10088_v23 = vld [vmem:[#allocation14_spill] sm:$0xff] }
 0x226   : > { %v1899_v10 = vpop.f32.mrf.mxu2 }
 0x227   : > { %v2177_v41 = vunpack.c.l.b16 %v2080_v40  ;;  %v1972_v48 = vadd.f32 %v1899_v10, %v1779_v13  ;;  %v1506_v12 = vpop.f32.mrf.mxu0  ;;  %v1709_v15 = vpop.f32.mrf.mxu1  ;;  %v2248_v18 = vsel %vm2212_vm3, %v2243_v34, %v2247_v19  ;;  %v7882_v30 = vor.u32 %v3100_v56, %v3099_v21  ;;  %v10090_v56 = vld [vmem:[#allocation16_spill] sm:$0xff] }
 0x228   : > { %2418 = vmatmul.bf16.gmra.mxu3 %v2248_v18  ;;  %v1577_v1 = vadd.f32 %v1506_v12, %v10088_v23  ;;  %v10091_v18 = vld [vmem:[#allocation15_spill] sm:$0xff] }
 0x229   : > { %v7884_v49 = vpack.c.b16 %v2177_v41, %v2176_v25  ;;  %v2011_v62 = vadd.f32 %v7751_v35, %v1972_v48  ;;  %v6638_v25 = vld [vmem:[%s10003_s3 + $0x138] sm:$0xff]  ;;  %v7902_v48 = vsel %vm3087_vm4, %v3097_v0, %v7882_v30 }
 0x22a   : > { %5910 = vmatmul.msk.bf16.gmra.mxu0 %vm567_vm2, %v10075_v55  ;;  %5940 = vmatmul.msk.bf16.gmra.mxu1 %vm567_vm2, %v1620_v42  ;;  %v3789_v55 = vshrl.u32 %v7838_v27, 16  ;;  %v1780_v13 = vadd.f32 %v1709_v15, %v1577_v1  ;;  %v6621_v42 = vld [vmem:[%s10003_s3 + $0xb0] sm:$0xff] }
 0x22b   : > { %10087 = vst [vmem:[#allocation13_spill] sm:$0xff] %v7884_v49  ;;  %v2046_v12 = vmax.f32 %v2011_v62, 0.0  ;;  %5974 = vmatmul.msk.bf16.gmra.mxu2 %vm567_vm2, %v1817_v33  ;;  %v3793_v37 = vshll.u32 %v7884_v49, 16  ;;  %v10019_v23 = vrot.slane %v7884_v49, 1  ;;  %v6637_v15 = vld [vmem:[%s10003_s3 + $0x130] sm:$0xff]  ;;  %v1385_v33 = vadd.f32 %v10091_v18, %v10090_v56  ;;  %2735 = vmatpush.bf16.msra.mxu0 %v6621_v42 }
 0x22c   : > { %v3791_v34 = vor.u32 %v3789_v55, %v3787_v5  ;;  %3215 = vmatpush.bf16.msra.mxu2 %v6638_v25  ;;  %v6629_v5 = vld [vmem:[%s10003_s3 + $0xf0] sm:$0xff]  ;;  %v404_v25 = vld [vmem:[%s7205_s18 + $0xb8] sm:$0xf]  ;;  %v10093_v56 = vshrl.u32 %v7862_v11, 16 }
 0x22d   : > { %v2081_v40 = vpack.c.bf16 %v2046_v12, %v2046_v12  ;;  %v7908_v21 = vrot.slane %v3793_v37, 1  ;;  %v7913_v0 = vsel %vm2641_vm5, %v4088_v8, %v10019_v23  ;;  %2960 = vmatpush.bf16.msra.mxu1 %v6629_v5  ;;  %v10021_v23 = vrot.slane %v7860_v44, 2 }
 0x22e   : > { %10089 = vst [vmem:[#allocation8_spill] sm:$0xff] %v7913_v0  ;;  %v1902_v10 = vpop.f32.mrf.mxu2  ;;  %v7946_v5 = vunpack.c.l.b16 %v404_v25  ;;  %v2251_v18 = vor.u32 %v10093_v56, %v2247_v19  ;;  %v10094_v25 = vrot.slane %v7822_v6, 2  ;;  %v6619_v19 = vld [vmem:[%s10003_s3 + $0xa0] sm:$0xff] }
 0x22f   : > { %v2178_v62 = vunpack.c.l.b16 %v2081_v40  ;;  %v1973_v1 = vadd.f32 %v1902_v10, %v1780_v13  ;;  %v1508_v8 = vpop.f32.mrf.mxu0  ;;  %v1711_v38 = vpop.f32.mrf.mxu1  ;;  %v7928_v46 = vsel %vm2212_vm3, %v3791_v34, %v7908_v21  ;;  %v6830_v40 = vunpack.c.h.b16 %v7860_v44  ;;  %v6620_v13 = vld [vmem:[%s10003_s3 + $0xa8] sm:$0xff] }
 0x230   : > { %10092 = vst [vmem:[#allocation12_spill] sm:$0xff] %v7928_v46  ;;  %v1578_v37 = vadd.f32 %v1508_v8, %v1385_v33  ;;  %3216 = vmatpush.bf16.msra.mxu2 %v6637_v15  ;;  %v6628_v34 = vld [vmem:[%s10003_s3 + $0xe8] sm:$0xff]  ;;  %2736 = vmatpush.bf16.msra.mxu0 %v6620_v13  ;;  %v1622_v0 = vsel %vm510_vm1, %v10094_v25, %v10021_v23 }
 0x231   : > { %v7931_v55 = vpack.c.b16 %v2178_v62, %v2177_v41  ;;  %v2012_v12 = vadd.f32 %v7751_v35, %v1973_v1  ;;  %v6636_v41 = vld [vmem:[%s10003_s3 + $0x128] sm:$0xff]  ;;  %2961 = vmatpush.bf16.msra.mxu1 %v6628_v34  ;;  %v1818_v23 = vpack.c.b16 %v7946_v5, %v6830_v40  ;;  %v6618_v40 = vld [vmem:[%s10003_s3 + $0x98] sm:$0xff] }
 0x232   : > { %v1781_v1 = vadd.f32 %v1711_v38, %v1578_v37  ;;  %v6627_v38 = vld [vmem:[%s10003_s3 + $0xe0] sm:$0xff] }
 0x233   : > { %v2047_v10 = vmax.f32 %v2012_v12, 0.0  ;;  %v2253_v42 = vshll.u32 %v7931_v55, 16  ;;  %v10022_v15 = vshrl.u32 %v7931_v55, 16  ;;  %v6635_v37 = vld [vmem:[%s10003_s3 + $0x120] sm:$0xff] }
 0x234   : > { %3217 = vmatpush.bf16.msra.mxu2 %v6636_v41  ;;  %2737 = vmatpush.bf16.msra.mxu0 %v6619_v19 }
 0x235   : > { %v2082_v33 = vpack.c.bf16 %v2047_v10, %v2047_v10  ;;  %v7951_v8 = vrot.slane %v2253_v42, 1  ;;  %v3103_v7 = vrot.slane %v10022_v15, 2  ;;  %v3104_v13 = vrot.slane %v2253_v42, 3  ;;  %2962 = vmatpush.bf16.msra.mxu1 %v6627_v38  ;;  %v7001_v42 = vld [vmem:[%s7205_s18 + $0xa0] sm:$0xff]  }
 0x236   : > { %v1904_v12 = vpop.f32.mrf.mxu2 }
 0x237   : > { %v2179_v34 = vunpack.c.l.b16 %v2082_v33  ;;  %v1974_v41 = vadd.f32 %v1904_v12, %v1781_v1  ;;  %v1511_v10 = vpop.f32.mrf.mxu0  ;;  %v1714_v56 = vpop.f32.mrf.mxu1  ;;  %v2256_v25 = vsel %vm2212_vm3, %v2251_v18, %v7951_v8  ;;  %v7972_v15 = vor.u32 %v3104_v13, %v3103_v7  ;;  %v6626_v7 = vld [vmem:[%s10003_s3 + $0xd8] sm:$0xff] }
 0x238   : > { %2423 = vmatmul.bf16.gmra.mxu3 %v2256_v25  ;;  %v1579_v52 = vadd.f32 %v1511_v10, %v10095_v16  ;;  %3218 = vmatpush.bf16.msra.mxu2 %v6635_v37  ;;  %v3797_v18 = vshrl.u32 %v7884_v49, 16  ;;  %v10099_v13 = vld [vmem:[#allocation19_spill] sm:$0xff] }
 0x239   : > { %v7974_v46 = vpack.c.b16 %v2179_v34, %v2178_v62  ;;  %v2013_v27 = vadd.f32 %v7751_v35, %v1974_v41  ;;  %v6634_v62 = vld [vmem:[%s10003_s3 + $0x118] sm:$0xff]  ;;  %v7993_v16 = vsel %vm3087_vm4, %v7882_v30, %v7972_v15  ;;  %2738 = vmatpush.bf16.msra.mxu0 %v6618_v40  ;;  %2963 = vmatpush.bf16.msra.mxu1 %v6626_v7  ;;  %v10096_v30 = vrot.slane %v7884_v49, 1 }
 0x23a   : > { %5911 = vmatmul.msk.bf16.gmra.mxu0 %vm567_vm2, %v7001_v42  ;;  %5941 = vmatmul.msk.bf16.gmra.mxu1 %vm567_vm2, %v1622_v0  ;;  %v3799_v12 = vor.u32 %v3797_v18, %v7908_v21  ;;  %v1782_v38 = vadd.f32 %v1714_v56, %v1579_v52  ;;  %v6617_v21 = vld [vmem:[%s10003_s3 + $0x90] sm:$0xff] }
 0x23b   : > { %v2048_v0 = vmax.f32 %v2013_v27, 0.0  ;;  %5975 = vmatmul.msk.bf16.gmra.mxu2 %vm567_vm2, %v1818_v23  ;;  %v3801_v33 = vshll.u32 %v7974_v46, 16  ;;  %v10024_v1 = vrot.slane %v7974_v46, 1  ;;  %v10098_v23 = vld [vmem:[#allocation20_spill] sm:$0xff]  ;;  %v6625_v52 = vld [vmem:[%s10003_s3 + $0xd0] sm:$0xff] }
 0x23c   : > { %3219 = vmatpush.bf16.msra.mxu2 %v6634_v62  ;;  %v1387_v41 = vadd.f32 %v10099_v13, %v10098_v23  ;;  %v6633_v56 = vld [vmem:[%s10003_s3 + $0x110] sm:$0xff]  ;;  %v1612_v62 = vpack.c.b16 %v7946_v5, %v7946_v5  ;;  %v6632_v5 = vld [vmem:[%s10003_s3 + $0x108] sm:$0xff] }
 0x23d   : > { %v2083_v19 = vpack.c.bf16 %v2048_v0, %v2048_v0  ;;  %v3803_v37 = vrot.slane %v3801_v33, 1  ;;  %v8005_v27 = vsel %vm2641_vm5, %v10096_v30, %v10024_v1  ;;  %2739 = vmatpush.bf16.msra.mxu0 %v6617_v21  ;;  %2964 = vmatpush.bf16.msra.mxu1 %v6625_v52 }
 0x23e   : > { %10097 = vst [vmem:[#allocation17_spill] sm:$0xff] %v8005_v27  ;;  %v1907_v10 = vpop.f32.mrf.mxu2  ;;  %v8036_v23 = vrot.slane %v1612_v62, 2  ;;  %v6615_v62 = vld [vmem:[%s10003_s3 + $0x80] sm:$0xff] }
 0x23f   : > { %v2180_v25 = vunpack.c.l.b16 %v2083_v19  ;;  %v1975_v42 = vadd.f32 %v1907_v10, %v1782_v38  ;;  %v1513_v40 = vpop.f32.mrf.mxu0  ;;  %v1716_v7 = vpop.f32.mrf.mxu1  ;;  %v8021_v18 = vsel %vm2212_vm3, %v3799_v12, %v3803_v37  ;;  %v6616_v19 = vld [vmem:[%s10003_s3 + $0x88] sm:$0xff]  ;;  %v6577_v27 = vld [vmem:[%s7205_s18 + $0xbc] sm:$0xff] }
 0x240   : > { %10100 = vst [vmem:[#allocation9_spill] sm:$0xff] %v8021_v18  ;;  %v1580_v30 = vadd.f32 %v1513_v40, %v1387_v41  ;;  %3220 = vmatpush.bf16.msra.mxu2 %v6633_v56  ;;  %v6624_v38 = vld [vmem:[%s10003_s3 + $0xc8] sm:$0xff]  ;;  %v10101_v41 = vshrl.u32 %v7931_v55, 16 }
 0x241   : > { %v8023_v0 = vpack.c.b16 %v2180_v25, %v2179_v34  ;;  %v2014_v33 = vadd.f32 %v7751_v35, %v1975_v42  ;;  %2740 = vmatpush.bf16.msra.mxu0 %v6616_v19  ;;  %2965 = vmatpush.bf16.msra.mxu1 %v6624_v38 }
 0x242   : > { %v2259_v10 = vor.u32 %v10101_v41, %v7951_v8  ;;  %v1783_v52 = vadd.f32 %v1716_v7, %v1580_v30  ;;  %v6631_v8 = vld [vmem:[%s10003_s3 + $0x100] sm:$0xff]  ;;  %v10102_v41 = vrot.slane %v7860_v44, 2 }
 0x243   : > { %v2049_v12 = vmax.f32 %v2014_v33, 0.0  ;;  %v2261_v34 = vshll.u32 %v8023_v0, 16  ;;  %v2265_v13 = vshrl.u32 %v8023_v0, 16  ;;  %v6623_v33 = vld [vmem:[%s10003_s3 + $0xc0] sm:$0xff] }
 0x244   : > { %3221 = vmatpush.bf16.msra.mxu2 %v6632_v5  ;;  %v1624_v1 = vsel %vm510_vm1, %v10102_v41, %v8036_v23 }
 0x245   : > { %v2084_v21 = vpack.c.bf16 %v2049_v12, %v2049_v12  ;;  %v2263_v56 = vrot.slane %v2261_v34, 1  ;;  %v3107_v42 = vrot.slane %v2265_v13, 2  ;;  %v3108_v19 = vrot.slane %v2261_v34, 3  ;;  %2741 = vmatpush.bf16.msra.mxu0 %v6615_v62  ;;  %2966 = vmatpush.bf16.msra.mxu1 %v6623_v33 }
 0x246   : > { %v1909_v40 = vpop.f32.mrf.mxu2 }
 0x247   : > { %v2181_v7 = vunpack.c.l.b16 %v2084_v21  ;;  %v1976_v30 = vadd.f32 %v1909_v40, %v1783_v52  ;;  %v1516_v12 = vpop.f32.mrf.mxu0  ;;  %v1719_v38 = vpop.f32.mrf.mxu1  ;;  %v2264_v5 = vsel %vm2212_vm3, %v2259_v10, %v2263_v56  ;;  %v3109_v18 = vor.u32 %v3108_v19, %v3107_v42 }
 0x248   : > { %2428 = vmatmul.bf16.gmra.mxu3 %v2264_v5  ;;  %v1581_v34 = vadd.f32 %v1516_v12, %v7611_v29  ;;  %3222 = vmatpush.bf16.msra.mxu2 %v6631_v8  ;;  %v3805_v10 = vshrl.u32 %v7974_v46, 16 }
 0x249   : > { %v8057_v49 = vpack.c.b16 %v2181_v7, %v2180_v25  ;;  %v2015_v58 = vadd.f32 %v7751_v35, %v1976_v30  ;;  %v8066_v44 = vsel %vm3087_vm4, %v7972_v15, %v3109_v18 }
 0x24a   : > { %5912 = vmatmul.msk.bf16.gmra.mxu0 %vm567_vm2, %v7822_v6  ;;  %5942 = vmatmul.msk.bf16.gmra.mxu1 %vm567_vm2, %v1624_v1  ;;  %v3807_v52 = vor.u32 %v3805_v10, %v3803_v37  ;;  %v1784_v40 = vadd.f32 %v1719_v38, %v1581_v34  ;;  %v10103_v1 = vrot.slane %v7974_v46, 1  ;;  %v407_v37 = vld [vmem:[%s7205_s18 + $0xc4] sm:$0x1] }
 0x24b   : > { %v2050_v21 = vmax.f32 %v2015_v58, 0.0  ;;  %5976 = vmatmul.msk.bf16.gmra.mxu2 %vm567_vm2, %v6577_v27  ;;  %v3809_v25 = vshll.u32 %v8057_v49, 16  ;;  %v4094_v29 = vrot.slane %v8057_v49, 1  ;;  %v1389_v58 = vadd.f32 %v7613_v45, %v7617_v9 }
 0x24c   : > { %v1815_v10 = vunpack.c.l.b16 %v407_v37  ;;  %v2267_v45 = vor.u32 %v2265_v13, %v2263_v56 }
 0x24d   : > { %v2085_v42 = vpack.c.bf16 %v2050_v21, %v2050_v21  ;;  %v3811_v6 = vrot.slane %v3809_v25, 1  ;;  %v8075_v62 = vsel %vm2641_vm5, %v10103_v1, %v4094_v29 }
 0x24e   : > { %10104 = vst [vmem:[#allocation10_spill] sm:$0xff] %v8075_v62  ;;  %v1912_v15 = vpop.f32.mrf.mxu2 }
 0x24f   : > { %v2182_v33 = vunpack.c.l.b16 %v2085_v42  ;;  %v1977_v8 = vadd.f32 %v1912_v15, %v1784_v40  ;;  %v1518_v27 = vpop.f32.mrf.mxu0  ;;  %v1721_v19 = vpop.f32.mrf.mxu1  ;;  %v8080_v30 = vsel %vm2212_vm3, %v3807_v52, %v3811_v6  ;;  %v1424_v52 = vpack.c.b16 %v7870_v61, %v7870_v61 }
 0x250   : > { %10105 = vst [vmem:[#allocation14_spill] sm:$0xff] %v8080_v30  ;;  %v1582_v5 = vadd.f32 %v1518_v27, %v1389_v58 }
 0x251   : > { %v8083_v12 = vpack.c.b16 %v2182_v33, %v2181_v7  ;;  %v2016_v38 = vadd.f32 %v7751_v35, %v1977_v8 }
 0x252   : > { %v1785_v25 = vadd.f32 %v1721_v19, %v1582_v5  ;;  %v3813_v19 = vshrl.u32 %v8057_v49, 16 }
 0x253   : > { %v2051_v41 = vmax.f32 %v2016_v38, 0.0  ;;  %v2269_v34 = vshll.u32 %v8083_v12, 16  ;;  %v2273_v21 = vshrl.u32 %v8083_v12, 16  ;;  %v1820_v38 = vpack.c.b16 %v1815_v10, %v1815_v10 }
 0x255   : > { %v2086_v9 = vpack.c.bf16 %v2051_v41, %v2051_v41  ;;  %v2271_v42 = vrot.slane %v2269_v34, 1  ;;  %v3111_v40 = vrot.slane %v2273_v21, 2  ;;  %v3112_v7 = vrot.slane %v2269_v34, 3 }
 0x256   : > { %v1914_v1 = vpop.f32.mrf.mxu2 }
 0x257   : > { %v2183_v15 = vunpack.c.l.b16 %v2086_v9  ;;  %v1978_v62 = vadd.f32 %v1914_v1, %v1785_v25  ;;  %v1521_v8 = vpop.f32.mrf.mxu0  ;;  %v1724_v58 = vpop.f32.mrf.mxu1  ;;  %v2272_v27 = vsel %vm2212_vm3, %v2267_v45, %v2271_v42  ;;  %v3113_v37 = vor.u32 %v3112_v7, %v3111_v40 }
 0x258   : > { %2433 = vmatmul.bf16.gmra.mxu3 %v2272_v27  ;;  %v1583_v56 = vadd.f32 %v1521_v8, %v7625_v39 }
 0x259   : > { %v8091_v30 = vpack.c.b16 %v2183_v15, %v2182_v33  ;;  %v2017_v13 = vadd.f32 %v7751_v35, %v1978_v62  ;;  %v8099_v61 = vsel %vm3087_vm4, %v3109_v18, %v3113_v37  ;;  %v3815_v62 = vor.u32 %v3813_v19, %v3811_v6 }
 0x25a   : > { %5913 = vmatmul.msk.bf16.gmra.mxu0 %vm567_vm2, %v1424_v52  ;;  %5943 = vmatmul.msk.bf16.gmra.mxu1 %vm567_vm2, %v8036_v23  ;;  %v1786_v39 = vadd.f32 %v1724_v58, %v1583_v56  ;;  %v1391_v18 = vadd.f32 %v7627_v36, %v7629_v2  ;;  %v2643_v36 = vrot.slane %v7782_v20, 1  ;;  %v10026_v2 = vrot.slane %v7801_v50, 2 }
 0x25b   : > { %v2052_v5 = vmax.f32 %v2017_v13, 0.0  ;;  %5977 = vmatmul.msk.bf16.gmra.mxu2 %vm567_vm2, %v1820_v38  ;;  %v3817_v33 = vshll.u32 %v8091_v30, 16  ;;  %v4096_v41 = vrot.slane %v8091_v30, 1  ;;  %v2275_v38 = vor.u32 %v2273_v21, %v2271_v42 }
 0x25c   : > { %v2867_v21 = vrot.slane %v7782_v20, 2 }
 0x25d   : > { %v2087_v34 = vpack.c.bf16 %v2052_v5, %v2052_v5  ;;  %v3819_v10 = vrot.slane %v3817_v33, 1  ;;  %v8106_v45 = vsel %vm2641_vm5, %v4094_v29, %v4096_v41 }
 0x25e   : > { %v1917_v23 = vpop.f32.mrf.mxu2 }
 0x25f   : > { %v2184_v9 = vunpack.c.l.b16 %v2087_v34  ;;  %v1979_v25 = vadd.f32 %v1917_v23, %v1786_v39  ;;  %v1523_v40 = vpop.f32.mrf.mxu0  ;;  %v1726_v1 = vpop.f32.mrf.mxu1  ;;  %v8111_v52 = vsel %vm2212_vm3, %v3815_v62, %v3819_v10 }
 0x260   : > { %v1584_v8 = vadd.f32 %v1523_v40, %v1391_v18 }
 0x261   : > { %v8113_v7 = vpack.c.b16 %v2184_v9, %v2183_v15  ;;  %v2018_v6 = vadd.f32 %v7751_v35, %v1979_v25  ;;  %v2642_v15 = vrot.slane %v7769_v57, 1 }
 0x262   : > { %v1787_v56 = vadd.f32 %v1726_v1, %v1584_v8 }
 0x263   : > { %v2053_v58 = vmax.f32 %v2018_v6, 0.0  ;;  %v2277_v29 = vshll.u32 %v8113_v7, 16  ;;  %v2281_v27 = vshrl.u32 %v8113_v7, 16  ;;  %v2644_v42 = vsel %vm2641_vm5, %v2642_v15, %v2643_v36 }
 0x265   : > { %v2088_v13 = vpack.c.bf16 %v2053_v58, %v2053_v58  ;;  %v2279_v19 = vrot.slane %v2277_v29, 1  ;;  %v3115_v5 = vrot.slane %v2281_v27, 2  ;;  %v3116_v62 = vrot.slane %v2277_v29, 3 }
 0x266   : > { %v1919_v33 = vpop.f32.mrf.mxu2  ;;  %v2869_v58 = vsel %vm510_vm1, %v2867_v21, %v10026_v2 }
 0x267   : > { %v2185_v34 = vunpack.c.l.b16 %v2088_v13  ;;  %v1980_v39 = vadd.f32 %v1919_v33, %v1787_v56  ;;  %v1526_v23 = vpop.f32.mrf.mxu0  ;;  %v1729_v18 = vpop.f32.mrf.mxu1  ;;  %v2280_v25 = vsel %vm2212_vm3, %v2275_v38, %v2279_v19  ;;  %v3117_v40 = vor.u32 %v3116_v62, %v3115_v5 }
 0x268   : > { %2438 = vmatmul.bf16.gmra.mxu3 %v2280_v25  ;;  %v1585_v8 = vadd.f32 %v1526_v23, %v7637_v31  ;;  %v3821_v38 = vshrl.u32 %v8091_v30, 16 }
 0x269   : > { %v8126_v1 = vpack.c.b16 %v2185_v34, %v2184_v9  ;;  %v2019_v6 = vadd.f32 %v7751_v35, %v1980_v39  ;;  %v8134_v29 = vsel %vm3087_vm4, %v3113_v37, %v3117_v40  ;;  %v1393_v37 = vadd.f32 %v7639_v3, %v7641_v17 }
 0x26a   : > { %2742 = vmatmul.bf16.vlgmr.msra.gmra.mxu0 %v2644_v42  ;;  %2967 = vmatmul.bf16.vlgmr.msra.gmra.mxu1 %v2869_v58  ;;  %v3823_v5 = vor.u32 %v3821_v38, %v3819_v10  ;;  %v1788_v33 = vadd.f32 %v1729_v18, %v1585_v8  ;;  %v2283_v38 = vor.u32 %v2281_v27, %v2279_v19  ;;  %v10028_v3 = vrot.slane %v7801_v50, 1 }
 0x26b   : > { %v2054_v13 = vmax.f32 %v2019_v6, 0.0  ;;  %3223 = vmatmul.bf16.vlgmr.msra.gmra.mxu2 %v7819_v26  ;;  %v3825_v9 = vshll.u32 %v8126_v1, 16  ;;  %v4098_v56 = vrot.slane %v8126_v1, 1  ;;  %v10027_v17 = vrot.slane %v7824_v14, 2 }
 0x26c   : > { %v2646_v27 = vsel %vm2641_vm5, %v2643_v36, %v10028_v3  ;;  %v3829_v36 = vshrl.u32 %v8126_v1, 16 }
 0x26d   : > { %v2089_v31 = vpack.c.bf16 %v2054_v13, %v2054_v13  ;;  %v3827_v15 = vrot.slane %v3825_v9, 1  ;;  %v8141_v62 = vsel %vm2641_vm5, %v4096_v41, %v4098_v56 }
 0x26e   : > { %v1922_v39 = vpop.f32.mrf.mxu2 }
 0x26f   : > { %v2186_v23 = vunpack.c.l.b16 %v2089_v31  ;;  %v1981_v25 = vadd.f32 %v1922_v39, %v1788_v33  ;;  %v1528_v21 = vpop.f32.mrf.mxu0  ;;  %v1731_v42 = vpop.f32.mrf.mxu1  ;;  %v8146_v26 = vsel %vm2212_vm3, %v3823_v5, %v3827_v15 }
 0x270   : > { %v1586_v18 = vadd.f32 %v1528_v21, %v1393_v37 }
 0x271   : > { %v8148_v6 = vpack.c.b16 %v2186_v23, %v2185_v34  ;;  %v2020_v10 = vadd.f32 %v7751_v35, %v1981_v25 }
 0x272   : > { %v1789_v9 = vadd.f32 %v1731_v42, %v1586_v18 }
 0x273   : > { %v2055_v8 = vmax.f32 %v2020_v10, 0.0  ;;  %v2285_v41 = vshll.u32 %v8148_v6, 16  ;;  %v2289_v58 = vshrl.u32 %v8148_v6, 16 }
 0x275   : > { %v2090_v13 = vpack.c.bf16 %v2055_v8, %v2055_v8  ;;  %v2287_v31 = vrot.slane %v2285_v41, 1  ;;  %v3119_v5 = vrot.slane %v2289_v58, 2  ;;  %v3120_v34 = vrot.slane %v2285_v41, 3 }
 0x276   : > { %v1924_v33 = vpop.f32.mrf.mxu2  ;;  %v10106_v8 = vrot.slane %v7801_v50, 2 }
 0x277   : > { %v2187_v39 = vunpack.c.l.b16 %v2090_v13  ;;  %v1982_v2 = vadd.f32 %v1924_v33, %v1789_v9  ;;  %v1531_v25 = vpop.f32.mrf.mxu0  ;;  %v1734_v37 = vpop.f32.mrf.mxu1  ;;  %v2288_v21 = vsel %vm2212_vm3, %v2283_v38, %v2287_v31  ;;  %v3121_v19 = vor.u32 %v3120_v34, %v3119_v5 }
 0x278   : > { %2443 = vmatmul.bf16.gmra.mxu3 %v2288_v21  ;;  %v1587_v18 = vadd.f32 %v1531_v25, %v7649_v28  ;;  %v2871_v41 = vsel %vm510_vm1, %v10106_v8, %v10027_v17  ;;  %v1395_v25 = vadd.f32 %v7651_v63, %v7653_v54 }
 0x279   : > { %v8161_v10 = vpack.c.b16 %v2187_v39, %v2186_v23  ;;  %v2021_v42 = vadd.f32 %v7751_v35, %v1982_v2  ;;  %v8171_v38 = vsel %vm3087_vm4, %v3117_v40, %v3121_v19  ;;  %v3831_v2 = vor.u32 %v3829_v36, %v3827_v15  ;;  %v8192_v15 = vld [vmem:[%s10002_s2] ss:$0 sm:$0xff] }
 0x27a   : > { %2747 = vmatmul.bf16.gmra.mxu0 %v2646_v27  ;;  %2972 = vmatmul.bf16.gmra.mxu1 %v2871_v41  ;;  %v1790_v5 = vadd.f32 %v1734_v37, %v1587_v18 }
 0x27b   : > { %v2056_v13 = vmax.f32 %v2021_v42, 0.0  ;;  %v8174_v23 = vpop.f32.mrf.mxu3  ;;  %3228 = vmatmul.bf16.gmra.mxu2 %v7849_v24  ;;  %v3833_v28 = vshll.u32 %v8161_v10, 16  ;;  %v4100_v35 = vrot.slane %v8161_v10, 1 }
 0x27c   : > { %10107 = vst [vmem:[#allocation16_spill] sm:$0xff] %v8174_v23 }
 0x27d   : > { %v2091_v9 = vpack.c.bf16 %v2056_v13, %v2056_v13  ;;  %v3835_v33 = vrot.slane %v3833_v28, 1  ;;  %v8180_v34 = vsel %vm2641_vm5, %v4098_v56, %v4100_v35  ;;  %v2291_v13 = vor.u32 %v2289_v58, %v2287_v31 }
 0x27e   : > { %v1927_v40 = vpop.f32.mrf.mxu2  ;;  %v10029_v28 = vrot.slane %v7824_v14, 1  ;;  %v10109_v58 = vrot.slane %v7801_v50, 1 }
 0x27f   : > { %v2188_v21 = vunpack.c.l.b16 %v2091_v9  ;;  %v1983_v27 = vadd.f32 %v1927_v40, %v1790_v5  ;;  %v1533_v42 = vpop.f32.mrf.mxu0  ;;  %v1736_v8 = vpop.f32.mrf.mxu1  ;;  %v8185_v24 = vsel %vm2212_vm3, %v3831_v2, %v3835_v33 }
 0x280   : > { %v1588_v37 = vadd.f32 %v1533_v42, %v1395_v25  ;;  %v2648_v31 = vsel %vm2641_vm5, %v10109_v58, %v10029_v28 }
 0x281   : > { %v8187_v41 = vpack.c.b16 %v2188_v21, %v2187_v39  ;;  %v2022_v56 = vadd.f32 %v8192_v15, %v1983_v27 }
 0x282   : > { %v1791_v9 = vadd.f32 %v1736_v8, %v1588_v37 }
 0x283   : > { %v2057_v18 = vmax.f32 %v2022_v56, 0.0  ;;  %v8195_v36 = vpop.f32.mrf.mxu3  ;;  %v2293_v63 = vshll.u32 %v8187_v41, 16  ;;  %v2297_v54 = vshrl.u32 %v8187_v41, 16 }
 0x284   : > { %10108 = vst [vmem:[#allocation15_spill] sm:$0xff] %v8195_v36 }
 0x285   : > { %v2092_v2 = vpack.c.bf16 %v2057_v18, %v2057_v18  ;;  %v2295_v5 = vrot.slane %v2293_v63, 1  ;;  %v3123_v40 = vrot.slane %v2297_v54, 2  ;;  %v3124_v3 = vrot.slane %v2293_v63, 3 }
 0x286   : > { %v1929_v17 = vpop.f32.mrf.mxu2  ;;  %v10112_v63 = vrot.slane %v7824_v14, 2 }
 0x287   : > { %v2189_v27 = vunpack.c.l.b16 %v2092_v2  ;;  %v1984_v25 = vadd.f32 %v1929_v17, %v1791_v9  ;;  %v1536_v42 = vpop.f32.mrf.mxu0  ;;  %v1739_v56 = vpop.f32.mrf.mxu1  ;;  %v2296_v36 = vsel %vm2212_vm3, %v2291_v13, %v2295_v5  ;;  %v3125_v39 = vor.u32 %v3124_v3, %v3123_v40 }
 0x288   : > { %2448 = vmatmul.bf16.gmra.mxu3 %v2296_v36  ;;  %v1589_v37 = vadd.f32 %v1536_v42, %v7661_v22  ;;  %v10111_v17 = vrot.slane %v7862_v11, 2  ;;  %v3837_v2 = vshrl.u32 %v8161_v10, 16 }
 0x289   : > { %v8207_v18 = vpack.c.b16 %v2189_v27, %v2188_v21  ;;  %v2023_v8 = vadd.f32 %v8192_v15, %v1984_v25  ;;  %v8217_v36 = vsel %vm3087_vm4, %v3121_v19, %v3125_v39 }
 0x28a   : > { %v2873_v13 = vsel %vm510_vm1, %v10112_v63, %v10111_v17  ;;  %2752 = vmatmul.bf16.gmra.mxu0 %v2648_v31  ;;  %v3839_v40 = vor.u32 %v3837_v2, %v3835_v33  ;;  %v1792_v42 = vadd.f32 %v1739_v56, %v1589_v37  ;;  %v1397_v17 = vadd.f32 %v7663_v51, %v7665_v32 }
 0x28b   : > { %10110 = vst [vmem:[#allocation18_spill] sm:$0xff] %v8207_v18  ;;  %2977 = vmatmul.bf16.gmra.mxu1 %v2873_v13  ;;  %v2058_v3 = vmax.f32 %v2023_v8, 0.0  ;;  %v8220_v21 = vpop.f32.mrf.mxu3  ;;  %3233 = vmatmul.bf16.gmra.mxu2 %v7902_v48  ;;  %v3841_v22 = vshll.u32 %v8207_v18, 16  ;;  %v4102_v9 = vrot.slane %v8207_v18, 1  ;;  %v2299_v51 = vor.u32 %v2297_v54, %v2295_v5 }
 0x28c   : > { %10113 = vst [vmem:[#allocation20_spill] sm:$0xff] %v8220_v21  ;;  %v10030_v32 = vrot.slane %v7862_v11, 1  ;;  %v10116_v54 = vrot.slane %v7824_v14, 1 }
 0x28d   : > { %v2093_v25 = vpack.c.bf16 %v2058_v3, %v2058_v3  ;;  %v3843_v58 = vrot.slane %v3841_v22, 1  ;;  %v8226_v31 = vsel %vm2641_vm5, %v4100_v35, %v4102_v9 }
 0x28e   : > { %10114 = vst [vmem:[#allocation19_spill] sm:$0xff] %v8226_v31  ;;  %v1932_v19 = vpop.f32.mrf.mxu2  ;;  %v2650_v5 = vsel %vm2641_vm5, %v10116_v54, %v10030_v32 }
 0x28f   : > { %v2190_v8 = vunpack.c.l.b16 %v2093_v25  ;;  %v1985_v63 = vadd.f32 %v1932_v19, %v1792_v42  ;;  %v1538_v13 = vpop.f32.mrf.mxu0  ;;  %v1741_v28 = vpop.f32.mrf.mxu1  ;;  %v8231_v48 = vsel %vm2212_vm3, %v3839_v40, %v3843_v58 }
 0x290   : > { %v1590_v56 = vadd.f32 %v1538_v13, %v1397_v17 }
 0x291   : > { %v8233_v21 = vpack.c.b16 %v2190_v8, %v2189_v27  ;;  %v2024_v33 = vadd.f32 %v8192_v15, %v1985_v63 }
 0x292   : > { %v1793_v40 = vadd.f32 %v1741_v28, %v1590_v56 }
 0x293   : > { %v2059_v37 = vmax.f32 %v2024_v33, 0.0  ;;  %v8236_v2 = vpop.f32.mrf.mxu3  ;;  %v2301_v35 = vshll.u32 %v8233_v21, 16  ;;  %v2305_v3 = vshrl.u32 %v8233_v21, 16 }
 0x294   : > { %10115 = vst [vmem:[#allocation28_spill] sm:$0xff] %v8236_v2 }
 0x295   : > { %v2094_v25 = vpack.c.bf16 %v2059_v37, %v2059_v37  ;;  %v2303_v42 = vrot.slane %v2301_v35, 1  ;;  %v3127_v27 = vrot.slane %v2305_v3, 2  ;;  %v3128_v23 = vrot.slane %v2301_v35, 3 }
 0x296   : > { %v1934_v19 = vpop.f32.mrf.mxu2  ;;  %v10118_v35 = vrot.slane %v7931_v55, 2 }
 0x297   : > { %v2191_v63 = vunpack.c.l.b16 %v2094_v25  ;;  %v1986_v17 = vadd.f32 %v1934_v19, %v1793_v40  ;;  %v1541_v13 = vpop.f32.mrf.mxu0  ;;  %v1744_v33 = vpop.f32.mrf.mxu1  ;;  %v2304_v2 = vsel %vm2212_vm3, %v2299_v51, %v2303_v42  ;;  %v3129_v22 = vor.u32 %v3128_v23, %v3127_v27 }
 0x298   : > { %2453 = vmatmul.bf16.gmra.mxu3 %v2304_v2  ;;  %v1591_v56 = vadd.f32 %v1541_v13, %v7673_v60  ;;  %v10119_v25 = vrot.slane %v7862_v11, 2  ;;  %v3845_v40 = vshrl.u32 %v8207_v18, 16 }
 0x299   : > { %v8248_v37 = vpack.c.b16 %v2191_v63, %v2190_v8  ;;  %v2025_v28 = vadd.f32 %v8192_v15, %v1986_v17  ;;  %v8258_v2 = vsel %vm3087_vm4, %v3125_v39, %v3129_v22 }
 0x29a   : > { %v2875_v51 = vsel %vm510_vm1, %v10119_v25, %v10118_v35  ;;  %2757 = vmatmul.bf16.gmra.mxu0 %v2650_v5  ;;  %v3847_v19 = vor.u32 %v3845_v40, %v3843_v58  ;;  %v1794_v13 = vadd.f32 %v1744_v33, %v1591_v56  ;;  %v1399_v35 = vadd.f32 %v7675_v53, %v7677_v4 }
 0x29b   : > { %10117 = vst [vmem:[#allocation29_spill] sm:$0xff] %v8248_v37  ;;  %2982 = vmatmul.bf16.gmra.mxu1 %v2875_v51  ;;  %v2060_v23 = vmax.f32 %v2025_v28, 0.0  ;;  %v8261_v8 = vpop.f32.mrf.mxu3  ;;  %3238 = vmatmul.bf16.gmra.mxu2 %v7993_v16  ;;  %v3849_v60 = vshll.u32 %v8248_v37, 16  ;;  %v4104_v27 = vrot.slane %v8248_v37, 1  ;;  %v2307_v53 = vor.u32 %v2305_v3, %v2303_v42 }
 0x29c   : > { %10120 = vst [vmem:[#allocation30_spill] sm:$0xff] %v8261_v8  ;;  %v10032_v4 = vrot.slane %v7931_v55, 1  ;;  %v10124_v3 = vrot.slane %v7862_v11, 1 }
 0x29d   : > { %v2095_v17 = vpack.c.bf16 %v2060_v23, %v2060_v23  ;;  %v3851_v54 = vrot.slane %v3849_v60, 1  ;;  %v8267_v5 = vsel %vm2641_vm5, %v4102_v9, %v4104_v27 }
 0x29e   : > { %10121 = vst [vmem:[#allocation31_spill] sm:$0xff] %v8267_v5  ;;  %v1937_v39 = vpop.f32.mrf.mxu2  ;;  %v2652_v42 = vsel %vm2641_vm5, %v10124_v3, %v10032_v4 }
 0x29f   : > { %v2192_v28 = vunpack.c.l.b16 %v2095_v17  ;;  %v1987_v25 = vadd.f32 %v1937_v39, %v1794_v13  ;;  %v1543_v51 = vpop.f32.mrf.mxu0  ;;  %v1746_v32 = vpop.f32.mrf.mxu1  ;;  %v8272_v16 = vsel %vm2212_vm3, %v3847_v19, %v3851_v54 }
 0x2a0   : > { %10122 = vst [vmem:[#allocation32_spill] sm:$0xff] %v8272_v16  ;;  %v1592_v33 = vadd.f32 %v1543_v51, %v1399_v35 }
 0x2a1   : > { %v8274_v8 = vpack.c.b16 %v2192_v28, %v2191_v63  ;;  %v2026_v58 = vadd.f32 %v8192_v15, %v1987_v25 }
 0x2a2   : > { %v1795_v19 = vadd.f32 %v1746_v32, %v1592_v33 }
 0x2a3   : > { %v2061_v56 = vmax.f32 %v2026_v58, 0.0  ;;  %v8277_v40 = vpop.f32.mrf.mxu3  ;;  %v2309_v9 = vshll.u32 %v8274_v8, 16  ;;  %v2313_v23 = vshrl.u32 %v8274_v8, 16 }
 0x2a4   : > { %10123 = vst [vmem:[#allocation33_spill] sm:$0xff] %v8277_v40 }
 0x2a5   : > { %v2096_v17 = vpack.c.bf16 %v2061_v56, %v2061_v56  ;;  %v2311_v13 = vrot.slane %v2309_v9, 1  ;;  %v3131_v63 = vrot.slane %v2313_v23, 2  ;;  %v3132_v5 = vrot.slane %v2309_v9, 3 }
 0x2a6   : > { %v1939_v39 = vpop.f32.mrf.mxu2  ;;  %v10126_v9 = vrot.slane %v8023_v0, 2 }
 0x2a7   : > { %v2193_v25 = vunpack.c.l.b16 %v2096_v17  ;;  %v1988_v35 = vadd.f32 %v1939_v39, %v1795_v19  ;;  %v1546_v51 = vpop.f32.mrf.mxu0  ;;  %v1749_v58 = vpop.f32.mrf.mxu1  ;;  %v2312_v40 = vsel %vm2212_vm3, %v2307_v53, %v2311_v13  ;;  %v8289_v60 = vor.u32 %v3132_v5, %v3131_v63  ;;  %v6606_v53 = vld [vmem:[%s10003_s3 + $0x38] sm:$0xff] }
 0x2a8   : > { %2458 = vmatmul.bf16.gmra.mxu3 %v2312_v40  ;;  %v1593_v56 = vadd.f32 %v1546_v51, %v7685_v47  ;;  %v10127_v17 = vrot.slane %v7931_v55, 2 }
 0x2a9   : > { %v8291_v32 = vpack.c.b16 %v2193_v25, %v2192_v28  ;;  %v2027_v33 = vadd.f32 %v8192_v15, %v1988_v35  ;;  %v8305_v5 = vsel %vm3087_vm4, %v3129_v22, %v8289_v60  ;;  %v3853_v28 = vshrl.u32 %v8248_v37, 16  ;;  %2542 = vmatpush.bf16.msra.mxu3 %v6606_v53  ;;  %v6605_v22 = vld [vmem:[%s10003_s3 + $0x30] sm:$0xff] }
 0x2aa   : > { %v2877_v40 = vsel %vm510_vm1, %v10127_v17, %v10126_v9  ;;  %2762 = vmatmul.bf16.gmra.mxu0 %v2652_v42  ;;  %v1796_v3 = vadd.f32 %v1749_v58, %v1593_v56  ;;  %v10149_v37 = vrot.slane %v8023_v0, 1 }
 0x2ab   : > { %10125 = vst [vmem:[#allocation34_spill] sm:$0xff] %v8291_v32  ;;  %2987 = vmatmul.bf16.gmra.mxu1 %v2877_v40  ;;  %v2062_v19 = vmax.f32 %v2027_v33, 0.0  ;;  %v8308_v47 = vpop.f32.mrf.mxu3  ;;  %3243 = vmatmul.bf16.gmra.mxu2 %v8066_v44  ;;  %v3857_v63 = vshll.u32 %v8291_v32, 16  ;;  %v10031_v39 = vrot.slane %v8291_v32, 1  ;;  %v3855_v35 = vor.u32 %v3853_v28, %v3851_v54 }
 0x2ac   : > { %10128 = vst [vmem:[#allocation35_spill] sm:$0xff] %v8308_v47  ;;  %v1401_v44 = vadd.f32 %v7690_v59, %v7692_v43 }
 0x2ad   : > { %v2097_v51 = vpack.c.bf16 %v2062_v19, %v2062_v19  ;;  %v3859_v42 = vrot.slane %v3857_v63, 1  ;;  %v8319_v33 = vsel %vm2641_vm5, %v4104_v27, %v10031_v39  ;;  %2543 = vmatpush.bf16.msra.mxu3 %v6605_v22  ;;  %v6604_v27 = vld [vmem:[%s10003_s3 + $0x28] sm:$0xff] }
 0x2ae   : > { %10129 = vst [vmem:[#allocation36_spill] sm:$0xff] %v8319_v33  ;;  %v1942_v9 = vpop.f32.mrf.mxu2 }
 0x2af   : > { %v2194_v17 = vunpack.c.l.b16 %v2097_v51  ;;  %v1989_v40 = vadd.f32 %v1942_v9, %v1796_v3  ;;  %v1548_v53 = vpop.f32.mrf.mxu0  ;;  %v1751_v54 = vpop.f32.mrf.mxu1  ;;  %v8324_v58 = vsel %vm2212_vm3, %v3855_v35, %v3859_v42  ;;  %v2315_v51 = vor.u32 %v2313_v23, %v2311_v13 }
 0x2b0   : > { %10130 = vst [vmem:[#allocation37_spill] sm:$0xff] %v8324_v58  ;;  %v1594_v19 = vadd.f32 %v1548_v53, %v1401_v44  ;;  %v6603_v44 = vld [vmem:[%s10003_s3 + $0x20] sm:$0xff]  ;;  %v10148_v58 = vrot.slane %v8083_v12, 1 }
 0x2b1   : > { %v8326_v56 = vpack.c.b16 %v2194_v17, %v2193_v25  ;;  %v2028_v28 = vadd.f32 %v8192_v15, %v1989_v40  ;;  %2544 = vmatpush.bf16.msra.mxu3 %v6604_v27 }
 0x2b2   : > { %v1797_v22 = vadd.f32 %v1751_v54, %v1594_v19 }
 0x2b3   : > { %v2063_v63 = vmax.f32 %v2028_v28, 0.0  ;;  %v8332_v39 = vpop.f32.mrf.mxu3  ;;  %v2317_v59 = vshll.u32 %v8326_v56, 16  ;;  %v10033_v43 = vshrl.u32 %v8326_v56, 16 }
 0x2b4   : > { %10131 = vst [vmem:[#allocation38_spill] sm:$0xff] %v8332_v39 }
 0x2b5   : > { %v2098_v3 = vpack.c.bf16 %v2063_v63, %v2063_v63  ;;  %v2319_v9 = vrot.slane %v2317_v59, 1  ;;  %v3135_v40 = vrot.slane %v10033_v43, 2  ;;  %v3136_v28 = vrot.slane %v2317_v59, 3  ;;  %2545 = vmatpush.bf16.msra.mxu3 %v6603_v44  ;;  %v10132_v63 = vld [vmem:[#allocation21_spill] sm:$0xff] }
 0x2b6   : > { %v1944_v53 = vpop.f32.mrf.mxu2  ;;  %v10134_v59 = vrot.slane %v8023_v0, 1 }
 0x2b7   : > { %v8343_v4 = vunpack.c.l.b16 %v2098_v3  ;;  %v1990_v27 = vadd.f32 %v1944_v53, %v1797_v22  ;;  %v1551_v23 = vpop.f32.mrf.mxu0  ;;  %v1754_v13 = vpop.f32.mrf.mxu1  ;;  %v2320_v35 = vsel %vm2212_vm3, %v2315_v51, %v2319_v9  ;;  %v8347_v19 = vor.u32 %v3136_v28, %v3135_v40 }
 0x2b8   : > { %v1595_v54 = vadd.f32 %v1551_v23, %v10132_v63  ;;  %2463 = vmatmul.bf16.gmra.mxu3 %v2320_v35  ;;  %v10135_v3 = vrot.slane %v7931_v55, 1  ;;  %v10136_v53 = vrot.slane %v8083_v12, 2  ;;  %v10137_v51 = vrot.slane %v8023_v0, 2  ;;  %v6602_v35 = vld [vmem:[%s10003_s3 + $0x18] sm:$0xff] }
 0x2b9   : > { %v8350_v25 = vpack.c.b16 %v8343_v4, %v2194_v17  ;;  %v2029_v43 = vadd.f32 %v8192_v15, %v1990_v27  ;;  %v8369_v40 = vsel %vm3087_vm4, %v8289_v60, %v8347_v19  ;;  %2546 = vmatpush.bf16.msra.mxu3 %v6602_v35  ;;  %v3861_v23 = vshrl.u32 %v8291_v32, 16 }
 0x2ba   : > { %v2654_v22 = vsel %vm2641_vm5, %v10135_v3, %v10134_v59  ;;  %v2879_v44 = vsel %vm510_vm1, %v10137_v51, %v10136_v53  ;;  %v1798_v17 = vadd.f32 %v1754_v13, %v1595_v54  ;;  %v6601_v54 = vld [vmem:[%s10003_s3 + $0x10] sm:$0xff] }
 0x2bb   : > { %10133 = vst [vmem:[#allocation21_spill] sm:$0xff] %v8350_v25  ;;  %2767 = vmatmul.bf16.gmra.mxu0 %v2654_v22  ;;  %2992 = vmatmul.bf16.gmra.mxu1 %v2879_v44  ;;  %v2064_v28 = vmax.f32 %v2029_v43, 0.0  ;;  %v8371_v27 = vpop.f32.mrf.mxu3  ;;  %v3865_v63 = vshll.u32 %v8350_v25, 16  ;;  %v4108_v59 = vrot.slane %v8350_v25, 1  ;;  %v3863_v3 = vor.u32 %v3861_v23, %v3859_v42  ;;  %v10142_v53 = vld [vmem:[#allocation22_spill] sm:$0xff] }
 0x2bc   : > { %10138 = vst [vmem:[#allocation39_spill] sm:$0xff] %v8371_v27  ;;  %3248 = vmatmul.bf16.gmra.mxu2 %v8099_v61  ;;  %v10139_v43 = vrot.slane %v8291_v32, 1  ;;  %v10141_v61 = vld [vmem:[#allocation23_spill] sm:$0xff] }
 0x2bd   : > { %v2099_v13 = vpack.c.bf16 %v2064_v28, %v2064_v28  ;;  %v3867_v60 = vrot.slane %v3865_v63, 1  ;;  %v1403_v51 = vadd.f32 %v10142_v53, %v10141_v61  ;;  %2547 = vmatpush.bf16.msra.mxu3 %v6601_v54  ;;  %v6600_v63 = vld [vmem:[%s10003_s3 + $0x8] sm:$0xff] }
 0x2be   : > { %v8383_v22 = vsel %vm2641_vm5, %v10139_v43, %v4108_v59  ;;  %v1947_v44 = vpop.f32.mrf.mxu2 }
 0x2bf   : > { %10140 = vst [vmem:[#allocation40_spill] sm:$0xff] %v8383_v22  ;;  %v2196_v35 = vunpack.c.l.b16 %v2099_v13  ;;  %v1991_v27 = vadd.f32 %v1947_v44, %v1798_v17  ;;  %v1553_v39 = vpop.f32.mrf.mxu0  ;;  %v1756_v47 = vpop.f32.mrf.mxu1  ;;  %v8388_v28 = vsel %vm2212_vm3, %v3863_v3, %v3867_v60 }
 0x2c0   : > { %10143 = vst [vmem:[#allocation23_spill] sm:$0xff] %v8388_v28  ;;  %v1596_v33 = vadd.f32 %v1553_v39, %v1403_v51 }
 0x2c1   : > { %v8391_v42 = vpack.c.b16 %v2196_v35, %v8343_v4  ;;  %v2030_v23 = vadd.f32 %v8192_v15, %v1991_v27  ;;  %2548 = vmatpush.bf16.msra.mxu3 %v6600_v63  ;;  %v10146_v27 = vshrl.u32 %v8326_v56, 16 }
 0x2c2   : > { %v1799_v43 = vadd.f32 %v1756_v47, %v1596_v33  ;;  %v6599_v33 = vld [vmem:[%s10003_s3] sm:$0xff] }
 0x2c3   : > { %10144 = vst [vmem:[#allocation22_spill] sm:$0xff] %v8391_v42  ;;  %v2065_v61 = vmax.f32 %v2030_v23, 0.0  ;;  %v8397_v13 = vpop.f32.mrf.mxu3  ;;  %v2325_v17 = vshll.u32 %v8391_v42, 16  ;;  %v10035_v54 = vshrl.u32 %v8391_v42, 16  ;;  %v2323_v51 = vor.u32 %v10146_v27, %v2319_v9 }
 0x2c4   : > { %10145 = vst [vmem:[#allocation41_spill] sm:$0xff] %v8397_v13 }
 0x2c5   : > { %v2100_v53 = vpack.c.bf16 %v2065_v61, %v2065_v61  ;;  %v2327_v44 = vrot.slane %v2325_v17, 1  ;;  %v3139_v47 = vrot.slane %v10035_v54, 2  ;;  %v3140_v13 = vrot.slane %v2325_v17, 3  ;;  %2549 = vmatpush.bf16.msra.mxu3 %v6599_v33  ;;  %v10147_v61 = vld [vmem:[#allocation24_spill] sm:$0xff] }
 0x2c6   : > { %v1949_v23 = vpop.f32.mrf.mxu2  ;;  %v2656_v17 = vsel %vm2641_vm5, %v10149_v37, %v10148_v58  ;;  %v3869_v37 = vshrl.u32 %v8350_v25, 16 }
 0x2c7   : > { %v2864_v22 = vunpack.c.l.b16 %v2100_v53  ;;  %v1992_v63 = vadd.f32 %v1949_v23, %v1799_v43  ;;  %v1556_v28 = vpop.f32.mrf.mxu0  ;;  %v1759_v39 = vpop.f32.mrf.mxu1  ;;  %v2328_v3 = vsel %vm2212_vm3, %v2323_v51, %v2327_v44  ;;  %v3141_v9 = vor.u32 %v3140_v13, %v3139_v47 }
 0x2c8   : > { %v1597_v32 = vadd.f32 %v1556_v28, %v10147_v61  ;;  %2468 = vmatmul.bf16.gmra.mxu3 %v2328_v3  ;;  %v10150_v43 = vrot.slane %v8113_v7, 2  ;;  %v10151_v53 = vrot.slane %v8083_v12, 2  ;;  %v3871_v23 = vor.u32 %v3869_v37, %v3867_v60 }
 0x2c9   : > { %v8412_v27 = vpack.c.b16 %v2864_v22, %v2196_v35  ;;  %v2031_v54 = vadd.f32 %v8192_v15, %v1992_v63  ;;  %v8427_v35 = vsel %vm3087_vm4, %v8347_v19, %v3141_v9  ;;  %v10154_v63 = vld [vmem:[#allocation26_spill] sm:$0xff]  ;;  %v10155_v19 = vld [vmem:[#allocation25_spill] sm:$0xff] }
 0x2ca   : > { %v2881_v51 = vsel %vm510_vm1, %v10151_v53, %v10150_v43  ;;  %v1800_v33 = vadd.f32 %v1759_v39, %v1597_v32  ;;  %v1405_v61 = vadd.f32 %v10155_v19, %v10154_v63  ;;  %v10042_v19 = vrot.slane %v8391_v42, 3 }
 0x2cb   : > { %2772 = vmatmul.bf16.gmra.mxu0 %v2656_v17  ;;  %2997 = vmatmul.bf16.gmra.mxu1 %v2881_v51  ;;  %v2066_v28 = vmax.f32 %v2031_v54, 0.0  ;;  %v8429_v13 = vpop.f32.mrf.mxu3  ;;  %v3873_v58 = vshll.u32 %v8412_v27, 16  ;;  %v4110_v3 = vrot.slane %v8412_v27, 1 }
 0x2cc   : > { %10152 = vst [vmem:[#allocation24_spill] sm:$0xff] %v8429_v13  ;;  %3253 = vmatmul.bf16.gmra.mxu2 %v8134_v29 }
 0x2cd   : > { %v2101_v47 = vpack.c.bf16 %v2066_v28, %v2066_v28  ;;  %v3875_v32 = vrot.slane %v3873_v58, 1  ;;  %v8436_v39 = vsel %vm2641_vm5, %v4108_v59, %v4110_v3  ;;  %v10040_v59 = vrot.slane %v8391_v42, 2 }
 0x2ce   : > { %10153 = vst [vmem:[#allocation42_spill] sm:$0xff] %v8436_v39  ;;  %v1952_v54 = vpop.f32.mrf.mxu2 }
 0x2cf   : > { %v2865_v17 = vunpack.c.l.b16 %v2101_v47  ;;  %v1993_v43 = vadd.f32 %v1952_v54, %v1800_v33  ;;  %v1558_v53 = vpop.f32.mrf.mxu0  ;;  %v1761_v29 = vpop.f32.mrf.mxu1  ;;  %v8441_v51 = vsel %vm2212_vm3, %v3871_v23, %v3875_v32  ;;  %v2657_v23 = vrot.slane %v8113_v7, 1 }
 0x2d0   : > { %10156 = vst [vmem:[#allocation26_spill] sm:$0xff] %v8441_v51  ;;  %v1598_v13 = vadd.f32 %v1558_v53, %v1405_v61 }
 0x2d1   : > { %v8443_v25 = vpack.c.b16 %v2865_v17, %v2864_v22  ;;  %v2032_v60 = vadd.f32 %v8192_v15, %v1993_v43  ;;  %v2882_v22 = vrot.slane %v8148_v6, 2 }
 0x2d2   : > { %v1801_v28 = vadd.f32 %v1761_v29, %v1598_v13 }
 0x2d3   : > { %10157 = vst [vmem:[#allocation25_spill] sm:$0xff] %v8443_v25  ;;  %v2067_v37 = vmax.f32 %v2032_v60, 0.0  ;;  %v8447_v58 = vpop.f32.mrf.mxu3  ;;  %v10039_v47 = vrot.slane %v8443_v25, 2  ;;  %v3144_v33 = vshrl.u32 %v8443_v25, 16  ;;  %v3147_v63 = vshll.u32 %v8443_v25, 16 }
 0x2d4   : > { %10158 = vst [vmem:[#allocation43_spill] sm:$0xff] %v8447_v58  ;;  %v10041_v13 = vrot.slane %v8443_v25, 3  ;;  %v10159_v60 = vshrl.u32 %v8391_v42, 16 }
 0x2d5   : > { %v2102_v61 = vpack.c.bf16 %v2067_v37, %v2067_v37  ;;  %v8461_v54 = vsel %vm510_vm1, %v10040_v59, %v10039_v47  ;;  %v3146_v43 = vrot.slane %v3144_v33, 2  ;;  %v3149_v53 = vrot.slane %v3147_v63, 3  ;;  %v10161_v47 = vld [vmem:[#allocation27_spill] sm:$0xff] }
 0x2d6   : > { %v1954_v29 = vpop.f32.mrf.mxu2  ;;  %v2331_v58 = vor.u32 %v10159_v60, %v2327_v44  ;;  %v8470_v39 = vsel %vm3343_vm6, %v10042_v19, %v10041_v13  ;;  %v10162_v44 = vrot.slane %v8083_v12, 1  ;;  %v10163_v59 = vrot.slane %v8113_v7, 2 }
 0x2d7   : > { %10160 = vst [vmem:[#allocation44_spill] sm:$0xff] %v8470_v39  ;;  %v3566_v37 = vunpack.c.l.b16 %v2102_v61  ;;  %v1994_v51 = vadd.f32 %v1954_v29, %v1801_v28  ;;  %v1561_v16 = vpop.f32.mrf.mxu0  ;;  %v1764_v18 = vpop.f32.mrf.mxu1  ;;  %v8472_v31 = vor.u32 %v3149_v53, %v3146_v43  ;;  %v2663_v39 = vrot.slane %v8233_v21, 1 }
 0x2d8   : > { %v1599_v33 = vadd.f32 %v1561_v16, %v10161_v47  ;;  %2473 = vmatmul.bf16.gmra.mxu3 %v2331_v58  ;;  %v2658_v60 = vsel %vm2641_vm5, %v10162_v44, %v2657_v23  ;;  %v2883_v13 = vsel %vm510_vm1, %v10163_v59, %v2882_v22 }
 0x2d9   : > { %v8475_v63 = vpack.c.b16 %v3566_v37, %v2865_v17  ;;  %v8485_v28 = vsel %vm3087_vm4, %v3141_v9, %v8472_v31  ;;  %v2033_v16 = vadd.f32 %v8192_v15, %v1994_v51  ;;  %v3877_v17 = vshrl.u32 %v8412_v27, 16 }
 0x2da   : > { %v1802_v61 = vadd.f32 %v1764_v18, %v1599_v33 }
 0x2db   : > { %2777 = vmatmul.bf16.gmra.mxu0 %v2658_v60  ;;  %3002 = vmatmul.bf16.gmra.mxu1 %v2883_v13  ;;  %v8488_v58 = vpop.f32.mrf.mxu3  ;;  %v3881_v47 = vshll.u32 %v8475_v63, 16  ;;  %v4112_v43 = vrot.slane %v8475_v63, 1  ;;  %v3879_v59 = vor.u32 %v3877_v17, %v3875_v32  ;;  %v2068_v29 = vmax.f32 %v2033_v16, 0.0 }
 0x2dc   : > { %10164 = vst [vmem:[#allocation27_spill] sm:$0xff] %v8488_v58  ;;  %3258 = vmatmul.bf16.gmra.mxu2 %v8171_v38  ;;  %v2659_v32 = vrot.slane %v8148_v6, 1 }
 0x2dd   : > { %v3883_v53 = vrot.slane %v3881_v47, 1  ;;  %v8495_v9 = vsel %vm2641_vm5, %v4110_v3, %v4112_v43  ;;  %v2103_v44 = vpack.c.bf16 %v2068_v29, %v2068_v29  ;;  %v2884_v3 = vrot.slane %v8187_v41, 2 }
 0x2de   : > { %v1957_v18 = vpop.f32.mrf.mxu2 }
 0x2df   : > { %v1995_v13 = vadd.f32 %v1957_v18, %v1802_v61  ;;  %v1563_v37 = vpop.f32.mrf.mxu0  ;;  %v1766_v51 = vpop.f32.mrf.mxu1  ;;  %v8498_v33 = vsel %vm2212_vm3, %v3879_v59, %v3883_v53  ;;  %v8505_v47 = vunpack.c.l.b16 %v2103_v44  ;;  %v2660_v59 = vsel %vm2641_vm5, %v2657_v23, %v2659_v32 }
 0x2e0   : > { %v2885_v29 = vsel %vm510_vm1, %v2882_v22, %v2884_v3 }
 0x2e1   : > { %v2034_v38 = vadd.f32 %v8192_v15, %v1995_v13 }
 0x2e3   : > { %v2069_v60 = vmax.f32 %v2034_v38, 0.0  ;;  %v8501_v19 = vpop.f32.mrf.mxu3 }
 0x2e4   : > { %10165 = vst [vmem:[#allocation45_spill] sm:$0xff] %v8501_v19 }
 0x2e5   : > { %v2104_v58 = vpack.c.bf16 %v2069_v60, %v2069_v60 }
 0x2e6   : > { %v1959_v17 = vpop.f32.mrf.mxu2 }
 0x2e7   : > { %v3775_v61 = vunpack.c.l.b16 %v2104_v58  ;;  %v8507_v16 = vpop.f32.mrf.mxu0  ;;  %v8509_v18 = vpop.f32.mrf.mxu1  ;;  %v3885_v58 = vshrl.u32 %v8475_v63, 16 }
 0x2e8   : > { %2550 = vmatmul.bf16.vlgmr.msra.gmra.mxu3 %v7769_v57 }
 0x2e9   : > { %v8513_v15 = vpack.c.b16 %v3775_v61, %v8505_v47  ;;  %v3887_v57 = vor.u32 %v3885_v58, %v3883_v53  ;;  %v2661_v53 = vrot.slane %v8187_v41, 1  ;;  %v2886_v61 = vrot.slane %v8233_v21, 2 }
 0x2eb   : > { %2782 = vmatmul.bf16.gmra.mxu0 %v2660_v59  ;;  %3007 = vmatmul.bf16.gmra.mxu1 %v2885_v29  ;;  %v8517_v13 = vpop.f32.mrf.mxu3  ;;  %v3889_v37 = vshll.u32 %v8513_v15, 16  ;;  %v10043_v51 = vrot.slane %v8513_v15, 1  ;;  %v2662_v58 = vsel %vm2641_vm5, %v2659_v32, %v2661_v53  ;;  %v2888_v32 = vrot.slane %v8274_v8, 2 }
 0x2ec   : > { %10166 = vst [vmem:[#allocation46_spill] sm:$0xff] %v8517_v13  ;;  %3263 = vmatmul.bf16.gmra.mxu2 %v8217_v36 }
 0x2ed   : > { %v8523_v38 = vrot.slane %v3889_v37, 1  ;;  %v8528_v23 = vsel %vm2641_vm5, %v4112_v43, %v10043_v51  ;;  %v2887_v37 = vsel %vm510_vm1, %v2884_v3, %v2886_v61 }
 0x2ee   : > { %v8530_v22 = vpop.f32.mrf.mxu2 }
 0x2ef   : > { %v8532_v44 = vpop.f32.mrf.mxu0  ;;  %v8534_v60 = vpop.f32.mrf.mxu1  ;;  %v8538_v36 = vsel %vm2212_vm3, %v3887_v57, %v8523_v38 }
 0x2f3   : > { %v8540_v17 = vpop.f32.mrf.mxu3 }
 0x2f4   : > { %10167 = vst [vmem:[#allocation47_spill] sm:$0xff] %v8540_v17 }
 0x2f6   : > { %v8544_v59 = vpop.f32.mrf.mxu2 }
 0x2f7   : > { %v8546_v43 = vpop.f32.mrf.mxu0  ;;  %v8548_v29 = vpop.f32.mrf.mxu1 }
 0x2f8   : > { %10168 = vst [vmem:[#allocation48_spill] sm:$0xff] %v8548_v29  ;;  %2555 = vmatmul.bf16.gmra.mxu3 %v7782_v20 }
 0x2fb   : > { %2787 = vmatmul.bf16.gmra.mxu0 %v2662_v58  ;;  %3012 = vmatmul.bf16.gmra.mxu1 %v2887_v37  ;;  %v8553_v57 = vpop.f32.mrf.mxu3  ;;  %v2889_v37 = vsel %vm510_vm1, %v2886_v61, %v2888_v32 }
 0x2fc   : > { %10169 = vst [vmem:[#allocation49_spill] sm:$0xff] %v8553_v57  ;;  %3268 = vmatmul.bf16.gmra.mxu2 %v8258_v2  ;;  %v2664_v2 = vsel %vm2641_vm5, %v2661_v53, %v2663_v39  ;;  %v2890_v53 = vrot.slane %v8326_v56, 2 }
 0x2fe   : > { %v8556_v51 = vpop.f32.mrf.mxu2 }
 0x2ff   : > { %10170 = vst [vmem:[#allocation50_spill] sm:$0xff] %v8556_v51  ;;  %v8558_v17 = vpop.f32.mrf.mxu0  ;;  %v8560_v13 = vpop.f32.mrf.mxu1 }
 0x300   : > { %10171 = vst [vmem:[#allocation51_spill] sm:$0xff] %v8560_v13 }
 0x303   : > { %v8562_v19 = vpop.f32.mrf.mxu3 }
 0x304   : > { %10172 = vst [vmem:[#allocation52_spill] sm:$0xff] %v8562_v19 }
 0x306   : > { %v8566_v29 = vpop.f32.mrf.mxu2 }
 0x307   : > { %10173 = vst [vmem:[#allocation53_spill] sm:$0xff] %v8566_v29  ;;  %v8568_v3 = vpop.f32.mrf.mxu0 }
 0x308   : > { %10174 = vst [vmem:[#allocation54_spill] sm:$0xff] %v8568_v3  ;;  %v8570_v58 = vpop.f32.mrf.mxu1  ;;  %2560 = vmatmul.bf16.gmra.mxu3 %v7801_v50 }
 0x309   : > { %10175 = vst [vmem:[#allocation55_spill] sm:$0xff] %v8570_v58  ;;  %v2665_v58 = vrot.slane %v8274_v8, 1 }
 0x30b   : > { %2792 = vmatmul.bf16.gmra.mxu0 %v2664_v2  ;;  %3017 = vmatmul.bf16.gmra.mxu1 %v2889_v37  ;;  %v8575_v57 = vpop.f32.mrf.mxu3  ;;  %v2891_v37 = vsel %vm510_vm1, %v2888_v32, %v2890_v53 }
 0x30c   : > { %10176 = vst [vmem:[#allocation56_spill] sm:$0xff] %v8575_v57  ;;  %3273 = vmatmul.bf16.gmra.mxu2 %v8305_v5  ;;  %v2666_v5 = vsel %vm2641_vm5, %v2663_v39, %v2665_v58  ;;  %v6670_v39 = vld [vmem:[%s10003_s3 + $0x238] sm:$0xff] }
 0x30d   : > { %4179 = vmatpush.bf16.msrb.mxu2 %v6670_v39  ;;  %v6652_v39 = vld [vmem:[%s10003_s3 + $0x1a8] sm:$0xff] }
 0x30e   : > { %v8578_v19 = vpop.f32.mrf.mxu2 }
 0x30f   : > { %v8580_v13 = vpop.f32.mrf.mxu0 }
 0x310   : > { %v8582_v29 = vpop.f32.mrf.mxu1 }
 0x313   : > { %v8584_v3 = vpop.f32.mrf.mxu3 }
 0x314   : > { %10177 = vst [vmem:[#allocation57_spill] sm:$0xff] %v8584_v3  ;;  %v6654_v3 = vld [vmem:[%s10003_s3 + $0x1b8] sm:$0xff] }
 0x315   : > { %3646 = vmatpush.bf16.msrb.mxu0 %v6654_v3  ;;  %v6669_v3 = vld [vmem:[%s10003_s3 + $0x230] sm:$0xff] }
 0x316   : > { %v8588_v51 = vpop.f32.mrf.mxu2  ;;  %4180 = vmatpush.bf16.msrb.mxu2 %v6669_v3 }
 0x317   : > { %10178 = vst [vmem:[#allocation58_spill] sm:$0xff] %v8588_v51  ;;  %v8590_v61 = vpop.f32.mrf.mxu0  ;;  %v6659_v51 = vld [vmem:[%s10003_s3 + $0x1e0] sm:$0xff] }
 0x318   : > { %v8592_v2 = vpop.f32.mrf.mxu1  ;;  %2565 = vmatmul.bf16.gmra.mxu3 %v7824_v14 }
 0x319   : > { %10179 = vst [vmem:[#allocation59_spill] sm:$0xff] %v8592_v2  ;;  %v6662_v2 = vld [vmem:[%s10003_s3 + $0x1f8] sm:$0xff] }
 0x31a   : > { %3959 = vmatpush.bf16.msrb.mxu1 %v6662_v2 }
 0x31b   : > { %2797 = vmatmul.bf16.gmra.mxu0 %v2666_v5  ;;  %3022 = vmatmul.bf16.gmra.mxu1 %v2891_v37  ;;  %v8597_v57 = vpop.f32.mrf.mxu3  ;;  %v6653_v37 = vld [vmem:[%s10003_s3 + $0x1b0] sm:$0xff] }
 0x31c   : > { %10180 = vst [vmem:[#allocation60_spill] sm:$0xff] %v8597_v57  ;;  %3278 = vmatmul.bf16.gmra.mxu2 %v8369_v40  ;;  %v6661_v57 = vld [vmem:[%s10003_s3 + $0x1f0] sm:$0xff]  ;;  %3647 = vmatpush.bf16.msrb.mxu0 %v6653_v37 }
 0x31e   : > { %v8609_v32 = vpop.f32.mrf.mxu2  ;;  %3960 = vmatpush.bf16.msrb.mxu1 %v6661_v57 }
 0x31f   : > { %10181 = vst [vmem:[#allocation61_spill] sm:$0xff] %v8609_v32  ;;  %v8611_v5 = vpop.f32.mrf.mxu0  ;;  %v6668_v32 = vld [vmem:[%s10003_s3 + $0x228] sm:$0xff] }
 0x320   : > { %10182 = vst [vmem:[#allocation62_spill] sm:$0xff] %v8611_v5  ;;  %v8613_v40 = vpop.f32.mrf.mxu1  ;;  %v2667_v5 = vrot.slane %v8326_v56, 1  ;;  %3648 = vmatpush.bf16.msrb.mxu0 %v6652_v39  ;;  %4181 = vmatpush.bf16.msrb.mxu2 %v6668_v32  ;;  %v10188_v39 = vrot.slane %v8391_v42, 2 }
 0x321   : > { %10183 = vst [vmem:[#allocation63_spill] sm:$0xff] %v8613_v40  ;;  %v6660_v40 = vld [vmem:[%s10003_s3 + $0x1e8] sm:$0xff] }
 0x322   : > { %3961 = vmatpush.bf16.msrb.mxu1 %v6660_v40  ;;  %v6667_v40 = vld [vmem:[%s10003_s3 + $0x220] sm:$0xff]  ;;  %v2668_v32 = vsel %vm2641_vm5, %v2665_v58, %v2667_v5  ;;  %v6658_v58 = vld [vmem:[%s10003_s3 + $0x1d8] sm:$0xff] }
 0x323   : > { %v8624_v2 = vpop.f32.mrf.mxu3 }
 0x324   : > { %10184 = vst [vmem:[#allocation64_spill] sm:$0xff] %v8624_v2  ;;  %v6651_v2 = vld [vmem:[%s10003_s3 + $0x1a0] sm:$0xff]  ;;  %4182 = vmatpush.bf16.msrb.mxu2 %v6667_v40  ;;  %v6665_v40 = vld [vmem:[%s10003_s3 + $0x210] sm:$0xff] }
 0x325   : > { %3649 = vmatpush.bf16.msrb.mxu0 %v6651_v2  ;;  %v6657_v2 = vld [vmem:[%s10003_s3 + $0x1d0] sm:$0xff] }
 0x326   : > { %v8636_v57 = vpop.f32.mrf.mxu2  ;;  %3962 = vmatpush.bf16.msrb.mxu1 %v6659_v51  ;;  %v6649_v51 = vld [vmem:[%s10003_s3 + $0x190] sm:$0xff] }
 0x327   : > { %10185 = vst [vmem:[#allocation65_spill] sm:$0xff] %v8636_v57  ;;  %v8638_v37 = vpop.f32.mrf.mxu0 }
 0x328   : > { %10186 = vst [vmem:[#allocation66_spill] sm:$0xff] %v8638_v37  ;;  %v8640_v3 = vpop.f32.mrf.mxu1  ;;  %2570 = vmatmul.bf16.gmra.mxu3 %v7862_v11  ;;  %v6650_v37 = vld [vmem:[%s10003_s3 + $0x198] sm:$0xff] }
 0x329   : > { %10187 = vst [vmem:[#allocation67_spill] sm:$0xff] %v8640_v3  ;;  %v2893_v3 = vsel %vm510_vm1, %v2890_v53, %v10188_v39  ;;  %v6666_v53 = vld [vmem:[%s10003_s3 + $0x218] sm:$0xff]  ;;  %3650 = vmatpush.bf16.msrb.mxu0 %v6650_v37  ;;  %v6648_v37 = vld [vmem:[%s10003_s3 + $0x188] sm:$0xff] }
 0x32a   : > { %3963 = vmatpush.bf16.msrb.mxu1 %v6658_v58  ;;  %4183 = vmatpush.bf16.msrb.mxu2 %v6666_v53  ;;  %v6656_v58 = vld [vmem:[%s10003_s3 + $0x1c8] sm:$0xff]  ;;  %v2669_v53 = vrot.slane %v8391_v42, 1 }
 0x32b   : > { %2802 = vmatmul.bf16.gmra.mxu0 %v2668_v32  ;;  %3027 = vmatmul.bf16.gmra.mxu1 %v2893_v3  ;;  %v8656_v57 = vpop.f32.mrf.mxu3 }
 0x32c   : > { %10189 = vst [vmem:[#allocation68_spill] sm:$0xff] %v8656_v57  ;;  %3283 = vmatmul.bf16.gmra.mxu2 %v8427_v35  ;;  %v6664_v57 = vld [vmem:[%s10003_s3 + $0x208] sm:$0xff] }
 0x32d   : > { %3651 = vmatpush.bf16.msrb.mxu0 %v6649_v51 }
 0x32e   : > { %v8668_v3 = vpop.f32.mrf.mxu2  ;;  %3964 = vmatpush.bf16.msrb.mxu1 %v6657_v2  ;;  %4184 = vmatpush.bf16.msrb.mxu2 %v6665_v40  ;;  %v6647_v2 = vld [vmem:[%s10003_s3 + $0x180] sm:$0xff] }
 0x32f   : > { %10190 = vst [vmem:[#allocation69_spill] sm:$0xff] %v8668_v3  ;;  %v8670_v32 = vpop.f32.mrf.mxu0  ;;  %v6655_v40 = vld [vmem:[%s10003_s3 + $0x1c0] sm:$0xff] }
 0x330   : > { %10191 = vst [vmem:[#allocation70_spill] sm:$0xff] %v8670_v32  ;;  %v8672_v35 = vpop.f32.mrf.mxu1  ;;  %v2670_v32 = vsel %vm2641_vm5, %v2667_v5, %v2669_v53  ;;  %v10289_v3 = vld [vmem:[#allocation40_spill] sm:$0xff] }
 0x331   : > { %10192 = vst [vmem:[#allocation71_spill] sm:$0xff] %v8672_v35  ;;  %3652 = vmatpush.bf16.msrb.mxu0 %v6648_v37 }
 0x332   : > { %3965 = vmatpush.bf16.msrb.mxu1 %v6656_v58  ;;  %4185 = vmatpush.bf16.msrb.mxu2 %v6664_v57 }
 0x333   : > { %v8683_v39 = vpop.f32.mrf.mxu3 }
 0x334   : > { %10193 = vst [vmem:[#allocation72_spill] sm:$0xff] %v8683_v39 }
 0x335   : > { %3653 = vmatpush.bf16.msrb.mxu0 %v6647_v2 }
 0x336   : > { %v8695_v35 = vpop.f32.mrf.mxu2  ;;  %3966 = vmatpush.bf16.msrb.mxu1 %v6655_v40 }
 0x337   : > { %10194 = vst [vmem:[#allocation73_spill] sm:$0xff] %v8695_v35  ;;  %v6663_v35 = vld [vmem:[%s10003_s3 + $0x200] sm:$0xff] }
 0x338   : > { %v8697_v39 = vpop.f32.mrf.mxu0  ;;  %v8699_v51 = vpop.f32.mrf.mxu1  ;;  %2575 = vmatmul.bf16.gmra.mxu3 %v7931_v55  ;;  %4186 = vmatpush.bf16.msrb.mxu2 %v6663_v35 }
 0x339   : > { %10195 = vst [vmem:[#allocation74_spill] sm:$0xff] %v8697_v39 }
 0x33a   : > { %10196 = vst [vmem:[#allocation75_spill] sm:$0xff] %v8699_v51 }
 0x33b   : > { %2807 = vmatmul.bf16.gmra.mxu0 %v2670_v32  ;;  %3032 = vmatmul.bf16.gmra.mxu1 %v8461_v54  ;;  %v8713_v37 = vpop.f32.mrf.mxu3 }
 0x33c   : > { %10197 = vst [vmem:[#allocation76_spill] sm:$0xff] %v8713_v37  ;;  %3288 = vmatmul.bf16.gmra.mxu2 %v8485_v28  ;;  %v10205_v28 = vrot.slane %v8443_v25, 2 }
 0x33f   : > { %v8716_v58 = vpop.f32.mrf.mxu2 }
 0x340   : > { %10198 = vst [vmem:[#allocation77_spill] sm:$0xff] %v8716_v58  ;;  %v8718_v51 = vpop.f32.mrf.mxu0  ;;  %v8720_v5 = vpop.f32.mrf.mxu1  ;;  %v3349_v58 = vrot.slane %v7862_v11, 3 }
 0x341   : > { %10199 = vst [vmem:[#allocation78_spill] sm:$0xff] %v8718_v51 }
 0x342   : > { %10200 = vst [vmem:[#allocation79_spill] sm:$0xff] %v8720_v5 }
 0x343   : > { %v8722_v57 = vpop.f32.mrf.mxu3 }
 0x344   : > { %10201 = vst [vmem:[#allocation80_spill] sm:$0xff] %v8722_v57 }
 0x347   : > { %v8724_v39 = vpop.f32.mrf.mxu2 }
 0x348   : > { %10202 = vst [vmem:[#allocation81_spill] sm:$0xff] %v8724_v39  ;;  %v8726_v32 = vpop.f32.mrf.mxu0  ;;  %v8728_v54 = vpop.f32.mrf.mxu1  ;;  %2580 = vmatmul.bf16.gmra.mxu3 %v8023_v0 }
 0x349   : > { %10203 = vst [vmem:[#allocation82_spill] sm:$0xff] %v8726_v32 }
 0x34a   : > { %10204 = vst [vmem:[#allocation83_spill] sm:$0xff] %v8728_v54 }
 0x34b   : > { %2812 = vmatmul.bf16.gmra.mxu0 %v2669_v53  ;;  %3037 = vmatmul.bf16.gmra.mxu1 %v10205_v28  ;;  %v8733_v35 = vpop.f32.mrf.mxu3  ;;  %v10214_v28 = vld [vmem:[#allocation5_spill] sm:$0xff] }
 0x34c   : > { %10206 = vst [vmem:[#allocation84_spill] sm:$0xff] %v8733_v35  ;;  %3293 = vmatmul.bf16.gmra.mxu2 %v8472_v31  ;;  %v10215_v35 = vld [vmem:[#allocation7_spill] sm:$0xff] }
 0x34f   : > { %v8736_v2 = vpop.f32.mrf.mxu2 }
 0x350   : > { %10207 = vst [vmem:[#allocation85_spill] sm:$0xff] %v8736_v2  ;;  %v8738_v40 = vpop.f32.mrf.mxu0  ;;  %v8740_v57 = vpop.f32.mrf.mxu1  ;;  %v10217_v2 = vld [vmem:[#allocation11_spill] sm:$0xff] }
 0x351   : > { %10208 = vst [vmem:[#allocation86_spill] sm:$0xff] %v8738_v40 }
 0x352   : > { %10209 = vst [vmem:[#allocation87_spill] sm:$0xff] %v8740_v57 }
 0x353   : > { %v8742_v37 = vpop.f32.mrf.mxu3 }
 0x354   : > { %10210 = vst [vmem:[#allocation88_spill] sm:$0xff] %v8742_v37 }
 0x357   : > { %v8744_v39 = vpop.f32.mrf.mxu2 }
 0x358   : > { %10211 = vst [vmem:[#allocation89_spill] sm:$0xff] %v8744_v39  ;;  %v8746_v54 = vpop.f32.mrf.mxu0  ;;  %v8748_v53 = vpop.f32.mrf.mxu1  ;;  %2585 = vmatmul.bf16.gmra.mxu3 %v8083_v12 }
 0x359   : > { %10212 = vst [vmem:[#allocation90_spill] sm:$0xff] %v8746_v54 }
 0x35a   : > { %10213 = vst [vmem:[#allocation91_spill] sm:$0xff] %v8748_v53 }
 0x35b   : > { %3654 = vmatmul.bf16.vlgmr.msrb.gmra.mxu0 %v10214_v28  ;;  %3967 = vmatmul.bf16.vlgmr.msrb.gmra.mxu1 %v10215_v35  ;;  %v8753_v31 = vpop.f32.mrf.mxu3  ;;  %v10224_v35 = vld [vmem:[#allocation6_spill] sm:$0xff]  ;;  %v10225_v28 = vld [vmem:[#allocation12_spill] sm:$0xff] }
 0x35c   : > { %10216 = vst [vmem:[#allocation5_spill] sm:$0xff] %v8753_v31  ;;  %4187 = vmatmul.bf16.vlgmr.msrb.gmra.mxu2 %v10217_v2  ;;  %v10226_v31 = vld [vmem:[#allocation8_spill] sm:$0xff] }
 0x35f   : > { %v8756_v40 = vpop.f32.mrf.mxu2 }
 0x360   : > { %10218 = vst [vmem:[#allocation7_spill] sm:$0xff] %v8756_v40  ;;  %v8758_v57 = vpop.f32.mrf.mxu0  ;;  %v8760_v37 = vpop.f32.mrf.mxu1 }
 0x361   : > { %10219 = vst [vmem:[#allocation11_spill] sm:$0xff] %v8758_v57 }
 0x362   : > { %10220 = vst [vmem:[#allocation92_spill] sm:$0xff] %v8760_v37 }
 0x363   : > { %v2476_v39 = vpop.f32.mrf.mxu3 }
 0x367   : > { %v8762_v54 = vpop.f32.mrf.mxu2 }
 0x368   : > { %10221 = vst [vmem:[#allocation93_spill] sm:$0xff] %v8762_v54  ;;  %v8764_v53 = vpop.f32.mrf.mxu0  ;;  %v8766_v25 = vpop.f32.mrf.mxu1  ;;  %2590 = vmatmul.bf16.gmra.mxu3 %v8113_v7 }
 0x369   : > { %10222 = vst [vmem:[#allocation94_spill] sm:$0xff] %v8764_v53 }
 0x36a   : > { %10223 = vst [vmem:[#allocation95_spill] sm:$0xff] %v8766_v25 }
 0x36b   : > { %3659 = vmatmul.bf16.gmra.mxu0 %v10224_v35  ;;  %3972 = vmatmul.bf16.gmra.mxu1 %v10225_v28  ;;  %v8771_v2 = vpop.f32.mrf.mxu3  ;;  %v10233_v35 = vld [vmem:[#allocation13_spill] sm:$0xff] }
 0x36c   : > { %4192 = vmatmul.bf16.gmra.mxu2 %v10226_v31  ;;  %v10234_v28 = vld [vmem:[#allocation9_spill] sm:$0xff] }
 0x36f   : > { %v8774_v57 = vpop.f32.mrf.mxu2 }
 0x370   : > { %10227 = vst [vmem:[#allocation6_spill] sm:$0xff] %v8774_v57  ;;  %v8776_v37 = vpop.f32.mrf.mxu0  ;;  %v8778_v39 = vpop.f32.mrf.mxu1  ;;  %v10235_v57 = vld [vmem:[#allocation17_spill] sm:$0xff] }
 0x371   : > { %10228 = vst [vmem:[#allocation12_spill] sm:$0xff] %v8776_v37 }
 0x372   : > { %10229 = vst [vmem:[#allocation8_spill] sm:$0xff] %v8778_v39 }
 0x373   : > { %v8780_v54 = vpop.f32.mrf.mxu3 }
 0x377   : > { %v8782_v53 = vpop.f32.mrf.mxu2 }
 0x378   : > { %10230 = vst [vmem:[#allocation96_spill] sm:$0xff] %v8782_v53  ;;  %v8784_v25 = vpop.f32.mrf.mxu0  ;;  %v8786_v40 = vpop.f32.mrf.mxu1  ;;  %2595 = vmatmul.bf16.gmra.mxu3 %v8148_v6 }
 0x379   : > { %10231 = vst [vmem:[#allocation97_spill] sm:$0xff] %v8784_v25 }
 0x37a   : > { %10232 = vst [vmem:[#allocation98_spill] sm:$0xff] %v8786_v40 }
 0x37b   : > { %3664 = vmatmul.bf16.gmra.mxu0 %v10233_v35  ;;  %3977 = vmatmul.bf16.gmra.mxu1 %v10234_v28  ;;  %v8791_v31 = vpop.f32.mrf.mxu3  ;;  %v10242_v35 = vld [vmem:[#allocation14_spill] sm:$0xff] }
 0x37c   : > { %4197 = vmatmul.bf16.gmra.mxu2 %v10235_v57  ;;  %v10243_v28 = vld [vmem:[#allocation10_spill] sm:$0xff] }
 0x37f   : > { %v8794_v37 = vpop.f32.mrf.mxu2 }
 0x380   : > { %10236 = vst [vmem:[#allocation13_spill] sm:$0xff] %v8794_v37  ;;  %v8796_v39 = vpop.f32.mrf.mxu0  ;;  %v8798_v32 = vpop.f32.mrf.mxu1 }
 0x381   : > { %10237 = vst [vmem:[#allocation9_spill] sm:$0xff] %v8796_v39 }
 0x382   : > { %10238 = vst [vmem:[#allocation17_spill] sm:$0xff] %v8798_v32 }
 0x383   : > { %v8800_v53 = vpop.f32.mrf.mxu3 }
 0x387   : > { %v8802_v25 = vpop.f32.mrf.mxu2 }
 0x388   : > { %10239 = vst [vmem:[#allocation99_spill] sm:$0xff] %v8802_v25  ;;  %v8804_v40 = vpop.f32.mrf.mxu0  ;;  %v8806_v5 = vpop.f32.mrf.mxu1  ;;  %2600 = vmatmul.bf16.gmra.mxu3 %v8187_v41 }
 0x389   : > { %10240 = vst [vmem:[#allocation100_spill] sm:$0xff] %v8804_v40 }
 0x38a   : > { %10241 = vst [vmem:[#allocation101_spill] sm:$0xff] %v8806_v5 }
 0x38b   : > { %3669 = vmatmul.bf16.gmra.mxu0 %v7974_v46  ;;  %3982 = vmatmul.bf16.gmra.mxu1 %v10242_v35  ;;  %v8811_v57 = vpop.f32.mrf.mxu3  ;;  %v6646_v46 = vld [vmem:[%s10003_s3 + $0x178] sm:$0xff] }
 0x38c   : > { %4202 = vmatmul.bf16.gmra.mxu2 %v10243_v28  ;;  %3436 = vmatpush.bf16.msrb.mxu3 %v6646_v46  ;;  %v6645_v28 = vld [vmem:[%s10003_s3 + $0x170] sm:$0xff] }
 0x38f   : > { %v8814_v39 = vpop.f32.mrf.mxu2 }
 0x390   : > { %10244 = vst [vmem:[#allocation14_spill] sm:$0xff] %v8814_v39  ;;  %v8816_v32 = vpop.f32.mrf.mxu0  ;;  %v8818_v37 = vpop.f32.mrf.mxu1  ;;  %3437 = vmatpush.bf16.msrb.mxu3 %v6645_v28  ;;  %v6642_v28 = vld [vmem:[%s10003_s3 + $0x158] sm:$0xff]  ;;  %v10282_v39 = vld [vmem:[#allocation37_spill] sm:$0xff] }
 0x391   : > { %10245 = vst [vmem:[#allocation10_spill] sm:$0xff] %v8816_v32 }
 0x392   : > { %10246 = vst [vmem:[#allocation102_spill] sm:$0xff] %v8818_v37 }
 0x393   : > { %v8820_v25 = vpop.f32.mrf.mxu3 }
 0x397   : > { %v8822_v40 = vpop.f32.mrf.mxu2 }
 0x398   : > { %10247 = vst [vmem:[#allocation103_spill] sm:$0xff] %v8822_v40  ;;  %v8824_v5 = vpop.f32.mrf.mxu0  ;;  %v8826_v51 = vpop.f32.mrf.mxu1  ;;  %2605 = vmatmul.bf16.gmra.mxu3 %v8233_v21 }
 0x399   : > { %10248 = vst [vmem:[#allocation104_spill] sm:$0xff] %v8824_v5 }
 0x39a   : > { %10249 = vst [vmem:[#allocation105_spill] sm:$0xff] %v8826_v51 }
 0x39b   : > { %3674 = vmatmul.bf16.gmra.mxu0 %v8057_v49  ;;  %3987 = vmatmul.bf16.gmra.mxu1 %v8111_v52  ;;  %v8834_v35 = vpop.f32.mrf.mxu3  ;;  %v6644_v49 = vld [vmem:[%s10003_s3 + $0x168] sm:$0xff] }
 0x39c   : > { %4207 = vmatmul.bf16.gmra.mxu2 %v8106_v45  ;;  %3438 = vmatpush.bf16.msrb.mxu3 %v6644_v49  ;;  %v6643_v45 = vld [vmem:[%s10003_s3 + $0x160] sm:$0xff] }
 0x39f   : > { %v8840_v51 = vpop.f32.mrf.mxu2 }
 0x3a0   : > { %10250 = vst [vmem:[#allocation106_spill] sm:$0xff] %v8840_v51  ;;  %v8842_v40 = vpop.f32.mrf.mxu0  ;;  %v8844_v5 = vpop.f32.mrf.mxu1  ;;  %3439 = vmatpush.bf16.msrb.mxu3 %v6643_v45 }
 0x3a1   : > { %10251 = vst [vmem:[#allocation107_spill] sm:$0xff] %v8842_v40  ;;  %v10276_v40 = vld [vmem:[#allocation18_spill] sm:$0xff] }
 0x3a2   : > { %10252 = vst [vmem:[#allocation108_spill] sm:$0xff] %v8844_v5 }
 0x3a3   : > { %v8849_v52 = vpop.f32.mrf.mxu3 }
 0x3a4   : > { %3440 = vmatpush.bf16.msrb.mxu3 %v6642_v28 }
 0x3a7   : > { %v8854_v46 = vpop.f32.mrf.mxu2 }
 0x3a8   : > { %10253 = vst [vmem:[#allocation109_spill] sm:$0xff] %v8854_v46  ;;  %v8856_v37 = vpop.f32.mrf.mxu0  ;;  %v8858_v51 = vpop.f32.mrf.mxu1  ;;  %2610 = vmatmul.bf16.gmra.mxu3 %v8274_v8 }
 0x3a9   : > { %10254 = vst [vmem:[#allocation110_spill] sm:$0xff] %v8856_v37 }
 0x3aa   : > { %10255 = vst [vmem:[#allocation111_spill] sm:$0xff] %v8858_v51  ;;  %v6641_v51 = vld [vmem:[%s10003_s3 + $0x150] sm:$0xff] }
 0x3ab   : > { %3679 = vmatmul.bf16.gmra.mxu0 %v8091_v30  ;;  %3992 = vmatmul.bf16.gmra.mxu1 %v8146_v26  ;;  %v8866_v49 = vpop.f32.mrf.mxu3  ;;  %v6640_v30 = vld [vmem:[%s10003_s3 + $0x148] sm:$0xff] }
 0x3ac   : > { %10256 = vst [vmem:[#allocation112_spill] sm:$0xff] %v8866_v49  ;;  %4212 = vmatmul.bf16.gmra.mxu2 %v8141_v62  ;;  %3441 = vmatpush.bf16.msrb.mxu3 %v6641_v51  ;;  %v6639_v62 = vld [vmem:[%s10003_s3 + $0x140] sm:$0xff] }
 0x3af   : > { %v8872_v45 = vpop.f32.mrf.mxu2 }
 0x3b0   : > { %10257 = vst [vmem:[#allocation113_spill] sm:$0xff] %v8872_v45  ;;  %v8874_v46 = vpop.f32.mrf.mxu0  ;;  %v8876_v37 = vpop.f32.mrf.mxu1  ;;  %3442 = vmatpush.bf16.msrb.mxu3 %v6640_v30 }
 0x3b1   : > { %10258 = vst [vmem:[#allocation114_spill] sm:$0xff] %v8874_v46 }
 0x3b2   : > { %10259 = vst [vmem:[#allocation115_spill] sm:$0xff] %v8876_v37 }
 0x3b3   : > { %v8881_v26 = vpop.f32.mrf.mxu3 }
 0x3b4   : > { %10260 = vst [vmem:[#allocation116_spill] sm:$0xff] %v8881_v26  ;;  %3443 = vmatpush.bf16.msrb.mxu3 %v6639_v62  ;;  %v2478_v62 = vpack.c.b16 %v8343_v4, %v8343_v4  ;;  %v3345_v4 = vrot.slane %v7801_v50, 3  ;;  %v3351_v26 = vrot.slane %v7931_v55, 3 }
 0x3b7   : > { %v8886_v28 = vpop.f32.mrf.mxu2 }
 0x3b8   : > { %10261 = vst [vmem:[#allocation117_spill] sm:$0xff] %v8886_v28  ;;  %v8888_v5 = vpop.f32.mrf.mxu0  ;;  %v8890_v45 = vpop.f32.mrf.mxu1  ;;  %2615 = vmatmul.bf16.gmra.mxu3 %v8326_v56 }
 0x3b9   : > { %10262 = vst [vmem:[#allocation118_spill] sm:$0xff] %v8888_v5 }
 0x3ba   : > { %10263 = vst [vmem:[#allocation119_spill] sm:$0xff] %v8890_v45 }
 0x3bb   : > { %3684 = vmatmul.bf16.gmra.mxu0 %v8126_v1  ;;  %3997 = vmatmul.bf16.gmra.mxu1 %v8185_v24  ;;  %v8895_v51 = vpop.f32.mrf.mxu3 }
 0x3bc   : > { %10264 = vst [vmem:[#allocation120_spill] sm:$0xff] %v8895_v51  ;;  %4217 = vmatmul.bf16.gmra.mxu2 %v8180_v34 }
 0x3bf   : > { %v8898_v30 = vpop.f32.mrf.mxu2 }
 0x3c0   : > { %10265 = vst [vmem:[#allocation121_spill] sm:$0xff] %v8898_v30  ;;  %v8900_v37 = vpop.f32.mrf.mxu0  ;;  %v8902_v28 = vpop.f32.mrf.mxu1 }
 0x3c1   : > { %10266 = vst [vmem:[#allocation122_spill] sm:$0xff] %v8900_v37  ;;  %v10273_v37 = vld [vmem:[#allocation19_spill] sm:$0xff] }
 0x3c2   : > { %10267 = vst [vmem:[#allocation123_spill] sm:$0xff] %v8902_v28 }
 0x3c3   : > { %v8904_v5 = vpop.f32.mrf.mxu3 }
 0x3c4   : > { %10268 = vst [vmem:[#allocation124_spill] sm:$0xff] %v8904_v5 }
 0x3c7   : > { %v8906_v45 = vpop.f32.mrf.mxu2 }
 0x3c8   : > { %10269 = vst [vmem:[#allocation125_spill] sm:$0xff] %v8906_v45  ;;  %v8910_v1 = vpop.f32.mrf.mxu0  ;;  %v8912_v24 = vpop.f32.mrf.mxu1  ;;  %2620 = vmatmul.bf16.gmra.mxu3 %v2478_v62 }
 0x3c9   : > { %10270 = vst [vmem:[#allocation126_spill] sm:$0xff] %v8910_v1  ;;  %v3344_v1 = vrot.slane %v7782_v20, 3 }
 0x3ca   : > { %10271 = vst [vmem:[#allocation127_spill] sm:$0xff] %v8912_v24 }
 0x3cb   : > { %3689 = vmatmul.bf16.gmra.mxu0 %v8161_v10  ;;  %4002 = vmatmul.bf16.gmra.mxu1 %v8231_v48  ;;  %v8916_v34 = vpop.f32.mrf.mxu3  ;;  %v3346_v62 = vsel %vm3343_vm6, %v3344_v1, %v3345_v4 }
 0x3cc   : > { %10272 = vst [vmem:[#allocation128_spill] sm:$0xff] %v8916_v34  ;;  %4222 = vmatmul.bf16.gmra.mxu2 %v10273_v37  ;;  %v10277_v37 = vld [vmem:[#allocation32_spill] sm:$0xff] }
 0x3cf   : > { %v8919_v28 = vpop.f32.mrf.mxu2 }
 0x3d0   : > { %10274 = vst [vmem:[#allocation19_spill] sm:$0xff] %v8919_v28  ;;  %v2815_v30 = vpop.f32.mrf.mxu0  ;;  %v3040_v45 = vpop.f32.mrf.mxu1 }
 0x3d1   : > { %v10279_v45 = vld [vmem:[#allocation31_spill] sm:$0xff] }
 0x3d3   : > { %v8921_v46 = vpop.f32.mrf.mxu3 }
 0x3d4   : > { %10275 = vst [vmem:[#allocation129_spill] sm:$0xff] %v8921_v46  ;;  %v10284_v46 = vld [vmem:[#allocation36_spill] sm:$0xff] }
 0x3d7   : > { %v3296_v24 = vpop.f32.mrf.mxu2 }
 0x3d8   : > { %v8926_v10 = vpop.f32.mrf.mxu0  ;;  %v8928_v48 = vpop.f32.mrf.mxu1  ;;  %3444 = vmatmul.bf16.vlgmr.msrb.gmra.mxu3 %v3346_v62  ;;  %v3347_v24 = vrot.slane %v7824_v14, 3 }
 0x3db   : > { %3694 = vmatmul.bf16.gmra.mxu0 %v10276_v40  ;;  %4007 = vmatmul.bf16.gmra.mxu1 %v10277_v37  ;;  %v8932_v30 = vpop.f32.mrf.mxu3  ;;  %v3348_v40 = vsel %vm3343_vm6, %v3345_v4, %v3347_v24 }
 0x3dc   : > { %10278 = vst [vmem:[#allocation18_spill] sm:$0xff] %v8932_v30  ;;  %4227 = vmatmul.bf16.gmra.mxu2 %v10279_v45  ;;  %v10281_v45 = vld [vmem:[#allocation29_spill] sm:$0xff] }
 0x3df   : > { %v8935_v28 = vpop.f32.mrf.mxu2 }
 0x3e0   : > { %v8937_v50 = vpop.f32.mrf.mxu0  ;;  %v8939_v20 = vpop.f32.mrf.mxu1 }
 0x3e3   : > { %v8941_v1 = vpop.f32.mrf.mxu3 }
 0x3e4   : > { %10280 = vst [vmem:[#allocation32_spill] sm:$0xff] %v8941_v1 }
 0x3e7   : > { %v8944_v32 = vpop.f32.mrf.mxu2 }
 0x3e8   : > { %v8947_v62 = vpop.f32.mrf.mxu0  ;;  %v8949_v37 = vpop.f32.mrf.mxu1  ;;  %3449 = vmatmul.bf16.gmra.mxu3 %v3348_v40  ;;  %v3350_v40 = vsel %vm3343_vm6, %v3347_v24, %v3349_v58 }
 0x3eb   : > { %3699 = vmatmul.bf16.gmra.mxu0 %v10281_v45  ;;  %4012 = vmatmul.bf16.gmra.mxu1 %v10282_v39  ;;  %v8953_v30 = vpop.f32.mrf.mxu3 }
 0x3ec   : > { %10283 = vst [vmem:[#allocation31_spill] sm:$0xff] %v8953_v30  ;;  %4232 = vmatmul.bf16.gmra.mxu2 %v10284_v46  ;;  %v10286_v46 = vld [vmem:[#allocation34_spill] sm:$0xff]  ;;  %v10287_v30 = vld [vmem:[#allocation23_spill] sm:$0xff] }
 0x3ef   : > { %v8956_v1 = vpop.f32.mrf.mxu2 }
 0x3f0   : > { %v8958_v14 = vpop.f32.mrf.mxu0  ;;  %v8960_v34 = vpop.f32.mrf.mxu1 }
 0x3f3   : > { %v8962_v4 = vpop.f32.mrf.mxu3 }
 0x3f4   : > { %10285 = vst [vmem:[#allocation29_spill] sm:$0xff] %v8962_v4 }
 0x3f7   : > { %v8965_v5 = vpop.f32.mrf.mxu2 }
 0x3f8   : > { %v8968_v45 = vpop.f32.mrf.mxu0  ;;  %v8970_v39 = vpop.f32.mrf.mxu1  ;;  %3454 = vmatmul.bf16.gmra.mxu3 %v3350_v40  ;;  %v3352_v40 = vsel %vm3343_vm6, %v3349_v58, %v3351_v26 }
 0x3fb   : > { %3704 = vmatmul.bf16.gmra.mxu0 %v10286_v46  ;;  %4017 = vmatmul.bf16.gmra.mxu1 %v10287_v30  ;;  %v8974_v51 = vpop.f32.mrf.mxu3 }
 0x3fc   : > { %10288 = vst [vmem:[#allocation37_spill] sm:$0xff] %v8974_v51  ;;  %4237 = vmatmul.bf16.gmra.mxu2 %v10289_v3  ;;  %v10296_v3 = vld [vmem:[#allocation21_spill] sm:$0xff]  ;;  %v10297_v51 = vld [vmem:[#allocation26_spill] sm:$0xff] }
 0x3ff   : > { %v8977_v4 = vpop.f32.mrf.mxu2 }
 0x400   : > { %v8979_v11 = vpop.f32.mrf.mxu0  ;;  %v8981_v42 = vpop.f32.mrf.mxu1 }
 0x401   : > { %10290 = vst [vmem:[#allocation36_spill] sm:$0xff] %v8979_v11 }
 0x402   : > { %10291 = vst [vmem:[#allocation34_spill] sm:$0xff] %v8981_v42  ;;  %v10299_v42 = vld [vmem:[#allocation42_spill] sm:$0xff] }
 0x403   : > { %v8983_v24 = vpop.f32.mrf.mxu3 }
 0x404   : > { %10292 = vst [vmem:[#allocation23_spill] sm:$0xff] %v8983_v24 }
 0x407   : > { %v8986_v49 = vpop.f32.mrf.mxu2 }
 0x408   : > { %10293 = vst [vmem:[#allocation40_spill] sm:$0xff] %v8986_v49  ;;  %v8989_v46 = vpop.f32.mrf.mxu0  ;;  %v8991_v30 = vpop.f32.mrf.mxu1  ;;  %3459 = vmatmul.bf16.gmra.mxu3 %v3352_v40 }
 0x409   : > { %10294 = vst [vmem:[#allocation130_spill] sm:$0xff] %v8989_v46  ;;  %v3353_v46 = vrot.slane %v8023_v0, 3 }
 0x40a   : > { %10295 = vst [vmem:[#allocation131_spill] sm:$0xff] %v8991_v30 }
 0x40b   : > { %3709 = vmatmul.bf16.gmra.mxu0 %v10296_v3  ;;  %4022 = vmatmul.bf16.gmra.mxu1 %v10297_v51  ;;  %v8995_v11 = vpop.f32.mrf.mxu3  ;;  %v3354_v40 = vsel %vm3343_vm6, %v3351_v26, %v3353_v46 }
 0x40c   : > { %10298 = vst [vmem:[#allocation21_spill] sm:$0xff] %v8995_v11  ;;  %4242 = vmatmul.bf16.gmra.mxu2 %v10299_v42 }
 0x40f   : > { %v8998_v24 = vpop.f32.mrf.mxu2 }
 0x410   : > { %v9000_v55 = vpop.f32.mrf.mxu0  ;;  %v9002_v49 = vpop.f32.mrf.mxu1 }
 0x413   : > { %v9004_v58 = vpop.f32.mrf.mxu3 }
 0x414   : > { %10300 = vst [vmem:[#allocation26_spill] sm:$0xff] %v9004_v58 }
 0x417   : > { %v9007_v30 = vpop.f32.mrf.mxu2 }
 0x418   : > { %v9010_v3 = vpop.f32.mrf.mxu0  ;;  %v9012_v51 = vpop.f32.mrf.mxu1  ;;  %3464 = vmatmul.bf16.gmra.mxu3 %v3354_v40 }
 0x419   : > { %10301 = vst [vmem:[#allocation42_spill] sm:$0xff] %v9010_v3  ;;  %v3355_v3 = vrot.slane %v8083_v12, 3 }
 0x41a   : > { %10302 = vst [vmem:[#allocation132_spill] sm:$0xff] %v9012_v51 }
 0x41b   : > { %3714 = vmatmul.bf16.gmra.mxu0 %v8412_v27  ;;  %4027 = vmatmul.bf16.gmra.mxu1 %v8498_v33  ;;  %v9016_v42 = vpop.f32.mrf.mxu3  ;;  %v3356_v27 = vsel %vm3343_vm6, %v3353_v46, %v3355_v3 }
 0x41c   : > { %10303 = vst [vmem:[#allocation133_spill] sm:$0xff] %v9016_v42  ;;  %4247 = vmatmul.bf16.gmra.mxu2 %v8495_v9 }
 0x41f   : > { %v9019_v58 = vpop.f32.mrf.mxu2 }
 0x420   : > { %v9021_v0 = vpop.f32.mrf.mxu0  ;;  %v9023_v11 = vpop.f32.mrf.mxu1 }
 0x423   : > { %v9025_v26 = vpop.f32.mrf.mxu3 }
 0x424   : > { %10304 = vst [vmem:[#allocation134_spill] sm:$0xff] %v9025_v26 }
 0x427   : > { %v9028_v51 = vpop.f32.mrf.mxu2 }
 0x428   : > { %v9031_v40 = vpop.f32.mrf.mxu0  ;;  %v9033_v33 = vpop.f32.mrf.mxu1  ;;  %3469 = vmatmul.bf16.gmra.mxu3 %v3356_v27 }
 0x429   : > { %10305 = vst [vmem:[#allocation135_spill] sm:$0xff] %v9031_v40  ;;  %v3357_v40 = vrot.slane %v8113_v7, 3  ;;  %v10314_v7 = vrot.slane %v8513_v15, 1 }
 0x42a   : > { %10306 = vst [vmem:[#allocation136_spill] sm:$0xff] %v9033_v33 }
 0x42b   : > { %3719 = vmatmul.bf16.gmra.mxu0 %v8475_v63  ;;  %4032 = vmatmul.bf16.gmra.mxu1 %v8538_v36  ;;  %v9037_v9 = vpop.f32.mrf.mxu3  ;;  %v3893_v63 = vshrl.u32 %v8513_v15, 16  ;;  %v3358_v36 = vsel %vm3343_vm6, %v3355_v3, %v3357_v40 }
 0x42c   : > { %10307 = vst [vmem:[#allocation137_spill] sm:$0xff] %v9037_v9  ;;  %4252 = vmatmul.bf16.gmra.mxu2 %v8528_v23  ;;  %v3582_v23 = vpack.c.b16 %v8505_v47, %v8505_v47 }
 0x42f   : > { %v9040_v26 = vpop.f32.mrf.mxu2 }
 0x430   : > { %v9042_v12 = vpop.f32.mrf.mxu0  ;;  %v9044_v42 = vpop.f32.mrf.mxu1 }
 0x431   : > { %10308 = vst [vmem:[#allocation138_spill] sm:$0xff] %v9044_v42  ;;  %v3895_v42 = vor.u32 %v3893_v63, %v8523_v38 }
 0x433   : > { %v9046_v46 = vpop.f32.mrf.mxu3 }
 0x434   : > { %10309 = vst [vmem:[#allocation139_spill] sm:$0xff] %v9046_v46 }
 0x437   : > { %v9049_v33 = vpop.f32.mrf.mxu2 }
 0x438   : > { %10310 = vst [vmem:[#allocation140_spill] sm:$0xff] %v9049_v33  ;;  %v9053_v27 = vpop.f32.mrf.mxu0  ;;  %v9055_v9 = vpop.f32.mrf.mxu1  ;;  %3474 = vmatmul.bf16.gmra.mxu3 %v3358_v36  ;;  %v3359_v36 = vrot.slane %v8148_v6, 3 }
 0x439   : > { %10311 = vst [vmem:[#allocation141_spill] sm:$0xff] %v9053_v27 }
 0x43a   : > { %10312 = vst [vmem:[#allocation142_spill] sm:$0xff] %v9055_v9  ;;  %v3360_v38 = vsel %vm3343_vm6, %v3357_v40, %v3359_v36  ;;  %v3361_v40 = vrot.slane %v8187_v41, 3 }
 0x43b   : > { %3724 = vmatmul.bf16.gmra.mxu0 %v3582_v23  ;;  %4037 = vmatmul.bf16.gmra.mxu1 %v3895_v42  ;;  %v9060_v46 = vpop.f32.mrf.mxu3  ;;  %v10321_v23 = vld [vmem:[#allocation16_spill] sm:$0xff] }
 0x43c   : > { %10313 = vst [vmem:[#allocation143_spill] sm:$0xff] %v9060_v46  ;;  %4257 = vmatmul.bf16.gmra.mxu2 %v10314_v7  ;;  %v2552_v7 = vadd.f32 %v8771_v2, %v10321_v23  ;;  %v3362_v2 = vsel %vm3343_vm6, %v3359_v36, %v3361_v40 }
 0x43e   : > { %v2817_v6 = vadd.f32 %v8507_v16, %v2552_v7  ;;  %v10326_v7 = vld [vmem:[#allocation20_spill] sm:$0xff] }
 0x43f   : > { %v9064_v33 = vpop.f32.mrf.mxu2 }
 0x440   : > { %v9066_v3 = vpop.f32.mrf.mxu0  ;;  %v9068_v27 = vpop.f32.mrf.mxu1 }
 0x441   : > { %10315 = vst [vmem:[#allocation144_spill] sm:$0xff] %v9068_v27 }
 0x443   : > { %v9070_v9 = vpop.f32.mrf.mxu3 }
 0x444   : > { %10316 = vst [vmem:[#allocation145_spill] sm:$0xff] %v9070_v9 }
 0x447   : > { %v9073_v47 = vpop.f32.mrf.mxu2 }
 0x448   : > { %10317 = vst [vmem:[#allocation146_spill] sm:$0xff] %v9073_v47  ;;  %v9076_v42 = vpop.f32.mrf.mxu0  ;;  %v9078_v63 = vpop.f32.mrf.mxu1  ;;  %3479 = vmatmul.bf16.gmra.mxu3 %v3360_v38 }
 0x449   : > { %10318 = vst [vmem:[#allocation147_spill] sm:$0xff] %v9076_v42  ;;  %v10324_v42 = vld [vmem:[#allocation15_spill] sm:$0xff] }
 0x44a   : > { %10319 = vst [vmem:[#allocation148_spill] sm:$0xff] %v9078_v63  ;;  %v2554_v63 = vadd.f32 %v8780_v54, %v10324_v42  ;;  %v2557_v54 = vadd.f32 %v8791_v31, %v10326_v7 }
 0x44b   : > { %v9080_v15 = vpop.f32.mrf.mxu3 }
 0x44c   : > { %10320 = vst [vmem:[#allocation149_spill] sm:$0xff] %v9080_v15  ;;  %v3042_v15 = vadd.f32 %v8509_v18, %v2817_v6 }
 0x44e   : > { %v3298_v16 = vadd.f32 %v8530_v22, %v3042_v15  ;;  %v3363_v15 = vrot.slane %v8233_v21, 3 }
 0x44f   : > { %v9084_v46 = vpop.f32.mrf.mxu2 }
 0x450   : > { %10322 = vst [vmem:[#allocation16_spill] sm:$0xff] %v9084_v46  ;;  %v9086_v27 = vpop.f32.mrf.mxu0  ;;  %v9088_v9 = vpop.f32.mrf.mxu1 }
 0x451   : > { %10323 = vst [vmem:[#allocation150_spill] sm:$0xff] %v9088_v9  ;;  %v2818_v9 = vadd.f32 %v8532_v44, %v2554_v63  ;;  %v2819_v44 = vadd.f32 %v8546_v43, %v2557_v54  ;;  %v10328_v43 = vld [vmem:[#allocation48_spill] sm:$0xff] }
 0x453   : > { %v2623_v47 = vpop.f32.mrf.mxu3  ;;  %v3043_v18 = vadd.f32 %v8534_v60, %v2818_v9  ;;  %v10327_v9 = vld [vmem:[#allocation28_spill] sm:$0xff] }
 0x455   : > { %v3299_v22 = vadd.f32 %v8544_v59, %v3043_v18  ;;  %v3044_v59 = vadd.f32 %v10328_v43, %v2819_v44 }
 0x457   : > { %v9094_v38 = vpop.f32.mrf.mxu2 }
 0x458   : > { %10325 = vst [vmem:[#allocation15_spill] sm:$0xff] %v9094_v38  ;;  %v9098_v23 = vpop.f32.mrf.mxu0  ;;  %v9100_v46 = vpop.f32.mrf.mxu1  ;;  %3484 = vmatmul.bf16.gmra.mxu3 %v3362_v2 }
 0x45b   : > { %v3445_v47 = vpop.f32.mrf.mxu3 }
 0x45c   : > { %v3519_v41 = vadd.f32 %v3445_v47, %v3298_v16  ;;  %v2559_v16 = vadd.f32 %v8800_v53, %v10327_v9 }
 0x45e   : > { %v3729_v42 = vadd.f32 %v8926_v10, %v3519_v41  ;;  %v9122_v10 = vld [vmem:[%s10004_s4] ss:$0 sm:$0xff]  ;;  %v3364_v41 = vsel %vm3343_vm6, %v3361_v40, %v3363_v15 }
 0x45f   : > { %v9107_v38 = vpop.f32.mrf.mxu2 }
 0x460   : > { %v9110_v36 = vpop.f32.mrf.mxu0  ;;  %v9112_v6 = vpop.f32.mrf.mxu1  ;;  %v4042_v2 = vadd.f32 %v8928_v48, %v3729_v42  ;;  %v2820_v42 = vadd.f32 %v8558_v17, %v2559_v16 }
 0x462   : > { %v4262_v31 = vadd.f32 %v8935_v28, %v4042_v2 }
 0x463   : > { %v3447_v63 = vpop.f32.mrf.mxu3 }
 0x464   : > { %v3520_v60 = vadd.f32 %v3447_v63, %v3299_v22  ;;  %v4295_v7 = vadd.f32 %v9122_v10, %v4262_v31  ;;  %v10330_v63 = vld [vmem:[#allocation30_spill] sm:$0xff] }
 0x466   : > { %v3730_v48 = vadd.f32 %v8937_v50, %v3520_v60  ;;  %v10329_v50 = vld [vmem:[#allocation50_spill] sm:$0xff]  ;;  %v4324_v22 = vmax.f32 %v4295_v7, 0.0  ;;  %v2562_v60 = vadd.f32 %v8811_v57, %v10330_v63  ;;  %v10333_v57 = vld [vmem:[#allocation53_spill] sm:$0xff] }
 0x467   : > { %v9127_v47 = vpop.f32.mrf.mxu2  ;;  %v3300_v18 = vadd.f32 %v10329_v50, %v3044_v59  ;;  %v10332_v7 = vld [vmem:[#allocation54_spill] sm:$0xff]  ;;  %v10334_v63 = vld [vmem:[#allocation33_spill] sm:$0xff] }
 0x468   : > { %v9131_v21 = vpop.f32.mrf.mxu0  ;;  %v9133_v28 = vpop.f32.mrf.mxu1  ;;  %v4043_v54 = vadd.f32 %v8939_v20, %v3730_v48  ;;  %3489 = vmatmul.bf16.gmra.mxu3 %v3364_v41  ;;  %v10331_v20 = vld [vmem:[#allocation51_spill] sm:$0xff]  ;;  %v4381_v16 = vrot.slane %v4324_v22, 1 }
 0x469   : > { %v3045_v48 = vadd.f32 %v10331_v20, %v2820_v42  ;;  %v3365_v42 = vrot.slane %v8274_v8, 3 }
 0x46a   : > { %v4263_v53 = vadd.f32 %v8944_v32, %v4043_v54  ;;  %v2821_v54 = vadd.f32 %v10332_v7, %v2562_v60 }
 0x46b   : > { %v3450_v2 = vpop.f32.mrf.mxu3  ;;  %v3301_v50 = vadd.f32 %v10333_v57, %v3045_v48 }
 0x46c   : > { %v4296_v44 = vadd.f32 %v9122_v10, %v4263_v53  ;;  %v3521_v40 = vadd.f32 %v3450_v2, %v3300_v18 }
 0x46e   : > { %v3731_v9 = vadd.f32 %v8947_v62, %v3521_v40  ;;  %v4325_v43 = vmax.f32 %v4296_v44, 0.0 }
 0x46f   : > { %v9144_v31 = vpop.f32.mrf.mxu2 }
 0x470   : > { %v9147_v17 = vpop.f32.mrf.mxu0  ;;  %v9149_v32 = vpop.f32.mrf.mxu1  ;;  %v4044_v59 = vadd.f32 %v8949_v37, %v3731_v9  ;;  %v4382_v41 = vrot.slane %v4325_v43, 1  ;;  %v2564_v37 = vadd.f32 %v8820_v25, %v10334_v63 }
 0x472   : > { %v4264_v53 = vadd.f32 %v8956_v1, %v4044_v59  ;;  %v4383_v62 = vsel %vm2641_vm5, %v4381_v16, %v4382_v41  ;;  %v10335_v1 = vld [vmem:[#allocation55_spill] sm:$0xff]  ;;  %v3366_v16 = vsel %vm3343_vm6, %v3363_v15, %v3365_v42 }
 0x473   : > { %v3452_v18 = vpop.f32.mrf.mxu3  ;;  %v9157_v2 = vmax.f32 %v4324_v22, %v4383_v62  ;;  %v3046_v48 = vadd.f32 %v10335_v1, %v2821_v54  ;;  %v10337_v1 = vld [vmem:[#allocation58_spill] sm:$0xff] }
 0x474   : > { %v4297_v44 = vadd.f32 %v9122_v10, %v4264_v53  ;;  %v3522_v40 = vadd.f32 %v3452_v18, %v3301_v50  ;;  %v2822_v53 = vadd.f32 %v8580_v13, %v2564_v37  ;;  %v10336_v18 = vld [vmem:[#allocation35_spill] sm:$0xff] }
 0x476   : > { %v4326_v9 = vmax.f32 %v4297_v44, 0.0  ;;  %v3732_v60 = vadd.f32 %v8958_v14, %v3522_v40  ;;  %v3302_v14 = vadd.f32 %v8578_v19, %v3046_v48  ;;  %v2567_v44 = vadd.f32 %v8834_v35, %v10336_v18  ;;  %v10341_v18 = vld [vmem:[#allocation34_spill] sm:$0xff] }
 0x477   : > { %v9163_v20 = vpop.f32.mrf.mxu2  ;;  %v3047_v13 = vadd.f32 %v8582_v29, %v2822_v53 }
 0x478   : > { %v9167_v59 = vpop.f32.mrf.mxu0  ;;  %v9169_v8 = vpop.f32.mrf.mxu1  ;;  %v4384_v22 = vrot.slane %v4326_v9, 1  ;;  %v4045_v7 = vadd.f32 %v8960_v34, %v3732_v60  ;;  %3494 = vmatmul.bf16.gmra.mxu3 %v3366_v16  ;;  %v2823_v37 = vadd.f32 %v8590_v61, %v2567_v44  ;;  %v3367_v16 = vrot.slane %v8326_v56, 3 }
 0x479   : > { %v3303_v35 = vadd.f32 %v10337_v1, %v3047_v13 }
 0x47a   : > { %v4265_v25 = vadd.f32 %v8965_v5, %v4045_v7  ;;  %v4385_v57 = vsel %vm2641_vm5, %v4382_v41, %v4384_v22 }
 0x47b   : > { %v3455_v50 = vpop.f32.mrf.mxu3  ;;  %v9176_v54 = vmax.f32 %v4325_v43, %v4385_v57  ;;  %v10339_v57 = vld [vmem:[#allocation36_spill] sm:$0xff] }
 0x47c   : > { %v4298_v15 = vadd.f32 %v9122_v10, %v4265_v25  ;;  %v3523_v62 = vadd.f32 %v3455_v50, %v3302_v14  ;;  %v10338_v25 = vld [vmem:[#allocation38_spill] sm:$0xff] }
 0x47e   : > { %v3733_v34 = vadd.f32 %v8968_v45, %v3523_v62  ;;  %v4327_v5 = vmax.f32 %v4298_v15, 0.0 }
 0x47f   : > { %v9182_v40 = vpop.f32.mrf.mxu2 }
 0x480   : > { %v9185_v63 = vpop.f32.mrf.mxu0  ;;  %v9187_v19 = vpop.f32.mrf.mxu1  ;;  %v4046_v43 = vadd.f32 %v8970_v39, %v3733_v34  ;;  %v4386_v41 = vrot.slane %v4327_v5, 1  ;;  %v2569_v39 = vadd.f32 %v8849_v52, %v10338_v25  ;;  %v10342_v34 = vld [vmem:[#allocation62_spill] sm:$0xff]  ;;  %v10343_v52 = vld [vmem:[#allocation40_spill] sm:$0xff] }
 0x482   : > { %v4266_v60 = vadd.f32 %v8977_v4, %v4046_v43  ;;  %v4387_v45 = vsel %vm2641_vm5, %v4384_v22, %v4386_v41  ;;  %v10340_v4 = vld [vmem:[#allocation59_spill] sm:$0xff]  ;;  %v3368_v22 = vsel %vm3343_vm6, %v3365_v42, %v3367_v16  ;;  %v2824_v13 = vadd.f32 %v10342_v34, %v2569_v39  ;;  %v10347_v39 = vld [vmem:[#allocation130_spill] sm:$0xff] }
 0x483   : > { %v3457_v48 = vpop.f32.mrf.mxu3  ;;  %v9195_v29 = vmax.f32 %v4326_v9, %v4387_v45  ;;  %v3048_v15 = vadd.f32 %v10340_v4, %v2823_v37 }
 0x484   : > { %v4299_v7 = vadd.f32 %v9122_v10, %v4266_v60  ;;  %v3524_v53 = vadd.f32 %v3457_v48, %v3303_v35  ;;  %v10344_v60 = vld [vmem:[#allocation61_spill] sm:$0xff] }
 0x485   : > { %v3304_v1 = vadd.f32 %v10344_v60, %v3048_v15  ;;  %v10348_v15 = vld [vmem:[#allocation63_spill] sm:$0xff] }
 0x486   : > { %v4328_v14 = vmax.f32 %v4299_v7, 0.0  ;;  %v3734_v61 = vadd.f32 %v10339_v57, %v3524_v53  ;;  %v10345_v7 = vld [vmem:[#allocation39_spill] sm:$0xff]  ;;  %v10346_v53 = vld [vmem:[#allocation112_spill] sm:$0xff]  ;;  %v4527_v57 = vrot.slane %v9195_v29, 4 }
 0x487   : > { %v9201_v50 = vpop.f32.mrf.mxu2  ;;  %v2572_v25 = vadd.f32 %v10346_v53, %v10345_v7  ;;  %v10353_v7 = vld [vmem:[#allocation65_spill] sm:$0xff] }
 0x488   : > { %v9205_v62 = vpop.f32.mrf.mxu0  ;;  %v9207_v56 = vpop.f32.mrf.mxu1  ;;  %v4388_v9 = vrot.slane %v4328_v14, 1  ;;  %v4047_v44 = vadd.f32 %v10341_v18, %v3734_v61  ;;  %3499 = vmatmul.bf16.gmra.mxu3 %v3368_v22  ;;  %v3049_v18 = vadd.f32 %v10348_v15, %v2824_v13 }
 0x48a   : > { %v4267_v43 = vadd.f32 %v10343_v52, %v4047_v44  ;;  %v4389_v35 = vsel %vm2641_vm5, %v4386_v41, %v4388_v9  ;;  %v10351_v52 = vld [vmem:[#allocation131_spill] sm:$0xff]  ;;  %v3305_v53 = vadd.f32 %v10353_v7, %v3049_v18  ;;  %v10357_v18 = vld [vmem:[#allocation22_spill] sm:$0xff] }
 0x48b   : > { %v3460_v45 = vpop.f32.mrf.mxu3  ;;  %v9214_v37 = vmax.f32 %v4327_v5, %v4389_v35  ;;  %v10352_v35 = vld [vmem:[#allocation66_spill] sm:$0xff] }
 0x48c   : > { %v4300_v42 = vadd.f32 %v9122_v10, %v4267_v43  ;;  %v3525_v48 = vadd.f32 %v3460_v45, %v3304_v1  ;;  %v2825_v45 = vadd.f32 %v10352_v35, %v2572_v25 }
 0x48d   : > { %v4528_v61 = vrot.slane %v9214_v37, 4 }
 0x48e   : > { %v3735_v4 = vadd.f32 %v10347_v39, %v3525_v48  ;;  %v4329_v41 = vmax.f32 %v4300_v42, 0.0 }
 0x48f   : > { %v9222_v22 = vpop.f32.mrf.mxu2  ;;  %v4529_v34 = vsel %vm622_vm0, %v4527_v57, %v4528_v61  ;;  %v10354_v57 = vld [vmem:[#allocation67_spill] sm:$0xff] }
 0x490   : > { %v9225_v44 = vpop.f32.mrf.mxu0  ;;  %v9227_v5 = vpop.f32.mrf.mxu1  ;;  %v4048_v43 = vadd.f32 %v10351_v52, %v3735_v4  ;;  %v4390_v60 = vrot.slane %v4329_v41, 1  ;;  %v4607_v1 = vmax.f32 %v9157_v2, %v4529_v34  ;;  %v10355_v52 = vld [vmem:[#allocation41_spill] sm:$0xff]  ;;  %v10356_v2 = vld [vmem:[#allocation116_spill] sm:$0xff] }
 0x491   : > { %10349 = vst [vmem:[#allocation20_spill] sm:$0xff] %v9225_v44  ;;  %v3050_v44 = vadd.f32 %v10354_v57, %v2825_v45  ;;  %v2574_v34 = vadd.f32 %v10356_v2, %v10355_v52 }
 0x492   : > { %10350 = vst [vmem:[#allocation28_spill] sm:$0xff] %v9227_v5  ;;  %v4268_v48 = vadd.f32 %v8998_v24, %v4048_v43  ;;  %v4391_v13 = vsel %vm2641_vm5, %v4388_v9, %v4390_v60  ;;  %v10358_v9 = vrot.slane %v10357_v18, 3 }
 0x493   : > { %v3462_v42 = vpop.f32.mrf.mxu3  ;;  %v9236_v39 = vmax.f32 %v4328_v14, %v4391_v13 }
 0x494   : > { %v4301_v15 = vadd.f32 %v9122_v10, %v4268_v48  ;;  %v3526_v5 = vadd.f32 %v3462_v42, %v3305_v53  ;;  %v3370_v14 = vsel %vm3343_vm6, %v3367_v16, %v10358_v9  ;;  %v10359_v42 = vld [vmem:[#allocation69_spill] sm:$0xff] }
 0x495   : > { %v4530_v4 = vrot.slane %v9236_v39, 4 }
 0x496   : > { %v4330_v25 = vmax.f32 %v4301_v15, 0.0  ;;  %v3736_v24 = vadd.f32 %v9000_v55, %v3526_v5  ;;  %v3306_v55 = vadd.f32 %v10359_v42, %v3050_v44  ;;  %v10360_v5 = vld [vmem:[#allocation70_spill] sm:$0xff]  ;;  %v10367_v42 = vld [vmem:[#allocation132_spill] sm:$0xff] }
 0x497   : > { %v9244_v43 = vpop.f32.mrf.mxu2  ;;  %v4531_v45 = vsel %vm622_vm0, %v4528_v61, %v4530_v4  ;;  %v2826_v15 = vadd.f32 %v10360_v5, %v2574_v34  ;;  %v10364_v44 = vld [vmem:[#allocation42_spill] sm:$0xff] }
 0x498   : > { %v9249_v35 = vpop.f32.mrf.mxu0  ;;  %v9251_v48 = vpop.f32.mrf.mxu1  ;;  %v4392_v7 = vrot.slane %v4330_v25, 1  ;;  %v4049_v53 = vadd.f32 %v9002_v49, %v3736_v24  ;;  %3504 = vmatmul.bf16.gmra.mxu3 %v3370_v14  ;;  %v4608_v13 = vmax.f32 %v9176_v54, %v4531_v45  ;;  %v10362_v49 = vld [vmem:[#allocation24_spill] sm:$0xff] }
 0x499   : > { %v10363_v24 = vld [vmem:[#allocation120_spill] sm:$0xff] }
 0x49a   : > { %v4269_v57 = vadd.f32 %v9007_v30, %v4049_v53  ;;  %v4393_v16 = vsel %vm2641_vm5, %v4390_v60, %v4392_v7  ;;  %v9260_v52 = vpack.c.bf16 %v4608_v13, %v4607_v1  ;;  %v2577_v14 = vadd.f32 %v10363_v24, %v10362_v49  ;;  %v10365_v30 = vld [vmem:[#allocation71_spill] sm:$0xff]  ;;  %v10369_v49 = vld [vmem:[#allocation73_spill] sm:$0xff] }
 0x49b   : > { %v3465_v2 = vpop.f32.mrf.mxu3  ;;  %v9262_v18 = vmax.f32 %v4329_v41, %v4393_v16  ;;  %v3051_v53 = vadd.f32 %v10365_v30, %v2826_v15  ;;  %v10368_v16 = vld [vmem:[#allocation74_spill] sm:$0xff] }
 0x49c   : > { %10361 = vst [vmem:[#allocation48_spill] sm:$0xff] %v9260_v52  ;;  %v4302_v61 = vadd.f32 %v9122_v10, %v4269_v57  ;;  %v3527_v9 = vadd.f32 %v3465_v2, %v3306_v55  ;;  %v2827_v2 = vadd.f32 %v10368_v16, %v2577_v14 }
 0x49d   : > { %v4532_v54 = vrot.slane %v9262_v18, 4  ;;  %v3307_v24 = vadd.f32 %v10369_v49, %v3051_v53 }
 0x49e   : > { %v3737_v45 = vadd.f32 %v10364_v44, %v3527_v9  ;;  %v4331_v60 = vmax.f32 %v4302_v61, 0.0 }
 0x49f   : > { %v9269_v34 = vpop.f32.mrf.mxu2  ;;  %v4533_v41 = vsel %vm622_vm0, %v4530_v4, %v4532_v54  ;;  %v10370_v4 = vld [vmem:[#allocation75_spill] sm:$0xff] }
 0x4a0   : > { %v9272_v1 = vpop.f32.mrf.mxu0  ;;  %v9274_v13 = vpop.f32.mrf.mxu1  ;;  %v4050_v55 = vadd.f32 %v10367_v42, %v3737_v45  ;;  %v4394_v5 = vrot.slane %v4331_v60, 1  ;;  %v4609_v57 = vmax.f32 %v9195_v29, %v4533_v41  ;;  %v10371_v42 = vld [vmem:[#allocation43_spill] sm:$0xff]  ;;  %v10372_v29 = vld [vmem:[#allocation124_spill] sm:$0xff] }
 0x4a1   : > { %10366 = vst [vmem:[#allocation50_spill] sm:$0xff] %v9274_v13  ;;  %v3052_v13 = vadd.f32 %v10370_v4, %v2827_v2  ;;  %v2579_v41 = vadd.f32 %v10372_v29, %v10371_v42  ;;  %v10374_v2 = vld [vmem:[#allocation44_spill] sm:$0xff] }
 0x4a2   : > { %v4270_v9 = vadd.f32 %v9019_v58, %v4050_v55  ;;  %v4395_v15 = vsel %vm2641_vm5, %v4392_v7, %v4394_v5 }
 0x4a3   : > { %v3467_v61 = vpop.f32.mrf.mxu3  ;;  %v9283_v44 = vmax.f32 %v4330_v25, %v4395_v15 }
 0x4a4   : > { %v4303_v30 = vadd.f32 %v9122_v10, %v4270_v9  ;;  %v3528_v52 = vadd.f32 %v3467_v61, %v3307_v24  ;;  %v10375_v24 = vld [vmem:[#allocation77_spill] sm:$0xff]  ;;  %v10376_v61 = vld [vmem:[#allocation78_spill] sm:$0xff] }
 0x4a5   : > { %v4534_v45 = vrot.slane %v9283_v44, 4  ;;  %v3308_v15 = vadd.f32 %v10375_v24, %v3052_v13  ;;  %v10379_v13 = vld [vmem:[#allocation135_spill] sm:$0xff]  ;;  %v10383_v24 = vld [vmem:[#allocation136_spill] sm:$0xff] }
 0x4a6   : > { %v4332_v14 = vmax.f32 %v4303_v30, 0.0  ;;  %v3738_v58 = vadd.f32 %v9021_v0, %v3528_v52  ;;  %v2828_v30 = vadd.f32 %v10376_v61, %v2579_v41 }
 0x4a7   : > { %v9291_v55 = vpop.f32.mrf.mxu2  ;;  %v4535_v25 = vsel %vm622_vm0, %v4532_v54, %v4534_v45 }
 0x4a8   : > { %v9293_v53 = vpop.f32.mrf.mxu0  ;;  %v9295_v7 = vpop.f32.mrf.mxu1  ;;  %v4396_v16 = vrot.slane %v4332_v14, 1  ;;  %v4051_v9 = vadd.f32 %v9023_v11, %v3738_v58  ;;  %3509 = vmatmul.bf16.gmra.mxu3 %v10374_v2  ;;  %v4610_v49 = vmax.f32 %v9214_v37, %v4535_v25  ;;  %v10377_v58 = vld [vmem:[#allocation27_spill] sm:$0xff]  ;;  %v10378_v2 = vld [vmem:[#allocation128_spill] sm:$0xff] }
 0x4a9   : > { %10373 = vst [vmem:[#allocation30_spill] sm:$0xff] %v9295_v7  ;;  %v2582_v7 = vadd.f32 %v10378_v2, %v10377_v58  ;;  %v10385_v58 = vld [vmem:[#allocation81_spill] sm:$0xff] }
 0x4aa   : > { %v4271_v0 = vadd.f32 %v9028_v51, %v4051_v9  ;;  %v4397_v52 = vsel %vm2641_vm5, %v4394_v5, %v4396_v16  ;;  %v9305_v4 = vpack.c.bf16 %v4610_v49, %v4609_v57  ;;  %v10380_v51 = vld [vmem:[#allocation79_spill] sm:$0xff] }
 0x4ab   : > { %v3470_v42 = vpop.f32.mrf.mxu3  ;;  %v9307_v29 = vmax.f32 %v4331_v60, %v4397_v52  ;;  %v3053_v9 = vadd.f32 %v10380_v51, %v2828_v30  ;;  %v10384_v52 = vld [vmem:[#allocation82_spill] sm:$0xff] }
 0x4ac   : > { %v4304_v54 = vadd.f32 %v9122_v10, %v4271_v0  ;;  %v3529_v11 = vadd.f32 %v3470_v42, %v3308_v15  ;;  %v2829_v42 = vadd.f32 %v10384_v52, %v2582_v7 }
 0x4ad   : > { %v4536_v37 = vrot.slane %v9307_v29, 4  ;;  %v3309_v2 = vadd.f32 %v10385_v58, %v3053_v9 }
 0x4ae   : > { %v3739_v25 = vadd.f32 %v10379_v13, %v3529_v11  ;;  %v4333_v5 = vmax.f32 %v4304_v54, 0.0 }
 0x4af   : > { %v9314_v41 = vpop.f32.mrf.mxu2  ;;  %v4537_v60 = vsel %vm622_vm0, %v4534_v45, %v4536_v37  ;;  %v10386_v45 = vld [vmem:[#allocation83_spill] sm:$0xff] }
 0x4b0   : > { %v9317_v57 = vpop.f32.mrf.mxu0  ;;  %v9319_v49 = vpop.f32.mrf.mxu1  ;;  %v4052_v15 = vadd.f32 %v10383_v24, %v3739_v25  ;;  %v4398_v61 = vrot.slane %v4333_v5, 1  ;;  %v4611_v0 = vmax.f32 %v9236_v39, %v4537_v60  ;;  %v10387_v24 = vld [vmem:[#allocation45_spill] sm:$0xff] }
 0x4b1   : > { %10381 = vst [vmem:[#allocation51_spill] sm:$0xff] %v9317_v57  ;;  %v3054_v57 = vadd.f32 %v10386_v45, %v2829_v42  ;;  %v10388_v39 = vld [vmem:[#allocation129_spill] sm:$0xff]  ;;  %v10396_v45 = vld [vmem:[#allocation86_spill] sm:$0xff] }
 0x4b2   : > { %10382 = vst [vmem:[#allocation54_spill] sm:$0xff] %v9319_v49  ;;  %v4272_v11 = vadd.f32 %v9040_v26, %v4052_v15  ;;  %v4399_v30 = vsel %vm2641_vm5, %v4396_v16, %v4398_v61  ;;  %v2584_v60 = vadd.f32 %v10388_v39, %v10387_v24  ;;  %v10393_v42 = vld [vmem:[#allocation25_spill] sm:$0xff] }
 0x4b3   : > { %v3472_v54 = vpop.f32.mrf.mxu3  ;;  %v9328_v13 = vmax.f32 %v4332_v14, %v4399_v30 }
 0x4b4   : > { %v4305_v51 = vadd.f32 %v9122_v10, %v4272_v11  ;;  %v3530_v49 = vadd.f32 %v3472_v54, %v3309_v2  ;;  %v10392_v11 = vld [vmem:[#allocation138_spill] sm:$0xff]  ;;  %v10394_v2 = vrot.slane %v10393_v42, 3  ;;  %v10395_v54 = vld [vmem:[#allocation85_spill] sm:$0xff] }
 0x4b5   : > { %v4538_v25 = vrot.slane %v9328_v13, 4  ;;  %v10398_v42 = vld [vmem:[#allocation46_spill] sm:$0xff] }
 0x4b6   : > { %v4334_v7 = vmax.f32 %v4305_v51, 0.0  ;;  %v3740_v26 = vadd.f32 %v9042_v12, %v3530_v49  ;;  %v3310_v51 = vadd.f32 %v10395_v54, %v3054_v57  ;;  %v2830_v12 = vadd.f32 %v10396_v45, %v2584_v60  ;;  %v10397_v49 = vld [vmem:[#allocation140_spill] sm:$0xff]  ;;  %v10400_v57 = vld [vmem:[#allocation141_spill] sm:$0xff]  ;;  %v10403_v45 = vld [vmem:[#allocation142_spill] sm:$0xff] }
 0x4b7   : > { %v9336_v15 = vpop.f32.mrf.mxu2  ;;  %v4539_v14 = vsel %vm622_vm0, %v4536_v37, %v4538_v25 }
 0x4b8   : > { %10389 = vst [vmem:[#allocation53_spill] sm:$0xff] %v9336_v15  ;;  %v9338_v9 = vpop.f32.mrf.mxu0  ;;  %v9340_v16 = vpop.f32.mrf.mxu1  ;;  %v4400_v52 = vrot.slane %v4334_v7, 1  ;;  %v4053_v58 = vadd.f32 %v10392_v11, %v3740_v26  ;;  %3514 = vmatmul.bf16.gmra.mxu3 %v10394_v2  ;;  %v4612_v30 = vmax.f32 %v9262_v18, %v4539_v14  ;;  %v10399_v2 = vld [vmem:[#allocation18_spill] sm:$0xff] }
 0x4b9   : > { %10390 = vst [vmem:[#allocation33_spill] sm:$0xff] %v9338_v9  ;;  %v2587_v15 = vadd.f32 %v10399_v2, %v10398_v42  ;;  %v10405_v2 = vld [vmem:[#allocation89_spill] sm:$0xff] }
 0x4ba   : > { %10391 = vst [vmem:[#allocation55_spill] sm:$0xff] %v9340_v16  ;;  %v4273_v24 = vadd.f32 %v10397_v49, %v4053_v58  ;;  %v4401_v39 = vsel %vm2641_vm5, %v4398_v61, %v4400_v52  ;;  %v9351_v9 = vpack.c.bf16 %v4612_v30, %v4611_v0  ;;  %v10402_v58 = vld [vmem:[#allocation87_spill] sm:$0xff] }
 0x4bb   : > { %v3475_v16 = vpop.f32.mrf.mxu3  ;;  %v9353_v37 = vmax.f32 %v4333_v5, %v4401_v39  ;;  %v3055_v54 = vadd.f32 %v10402_v58, %v2830_v12 }
 0x4bc   : > { %v4306_v26 = vadd.f32 %v9122_v10, %v4273_v24  ;;  %v3531_v11 = vadd.f32 %v3475_v16, %v3310_v51  ;;  %v10404_v51 = vld [vmem:[#allocation90_spill] sm:$0xff] }
 0x4bd   : > { %v4540_v18 = vrot.slane %v9353_v37, 4  ;;  %v2831_v39 = vadd.f32 %v10404_v51, %v2587_v15 }
 0x4be   : > { %v3741_v14 = vadd.f32 %v10400_v57, %v3531_v11  ;;  %v4335_v61 = vmax.f32 %v4306_v26, 0.0  ;;  %v3311_v11 = vadd.f32 %v10405_v2, %v3055_v54  ;;  %v10411_v2 = vld [vmem:[#allocation11_spill] sm:$0xff] }
 0x4bf   : > { %v9360_v60 = vpop.f32.mrf.mxu2  ;;  %v4541_v5 = vsel %vm622_vm0, %v4538_v25, %v4540_v18  ;;  %v10406_v25 = vld [vmem:[#allocation91_spill] sm:$0xff] }
 0x4c0   : > { %10401 = vst [vmem:[#allocation35_spill] sm:$0xff] %v9360_v60  ;;  %v3727_v0 = vpop.f32.mrf.mxu0  ;;  %v4040_v30 = vpop.f32.mrf.mxu1  ;;  %v4054_v49 = vadd.f32 %v10403_v45, %v3741_v14  ;;  %v4402_v24 = vrot.slane %v4335_v61, 1  ;;  %v4613_v16 = vmax.f32 %v9283_v44, %v4541_v5  ;;  %v10408_v44 = vld [vmem:[#allocation32_spill] sm:$0xff] }
 0x4c1   : > { %v3056_v0 = vadd.f32 %v10406_v25, %v2831_v39  ;;  %v10407_v30 = vld [vmem:[#allocation47_spill] sm:$0xff] }
 0x4c2   : > { %v4274_v42 = vadd.f32 %v9064_v33, %v4054_v49  ;;  %v4403_v57 = vsel %vm2641_vm5, %v4400_v52, %v4402_v24  ;;  %v2589_v5 = vadd.f32 %v10408_v44, %v10407_v30  ;;  %v10409_v49 = vld [vmem:[#allocation144_spill] sm:$0xff]  ;;  %v10413_v44 = vld [vmem:[#allocation49_spill] sm:$0xff] }
 0x4c3   : > { %v3477_v60 = vpop.f32.mrf.mxu3  ;;  %v9370_v12 = vmax.f32 %v4334_v7, %v4403_v57 }
 0x4c4   : > { %v4307_v26 = vadd.f32 %v9122_v10, %v4274_v42  ;;  %v3532_v58 = vadd.f32 %v3477_v60, %v3311_v11  ;;  %v10410_v42 = vld [vmem:[#allocation7_spill] sm:$0xff]  ;;  %v2832_v39 = vadd.f32 %v10411_v2, %v2589_v5  ;;  %v10412_v11 = vld [vmem:[#allocation146_spill] sm:$0xff]  ;;  %v10416_v5 = vld [vmem:[#allocation92_spill] sm:$0xff] }
 0x4c5   : > { %v4542_v14 = vrot.slane %v9370_v12, 4  ;;  %v3312_v60 = vadd.f32 %v10410_v42, %v3056_v0  ;;  %v10415_v0 = vld [vmem:[#allocation147_spill] sm:$0xff]  ;;  %v10418_v2 = vld [vmem:[#allocation94_spill] sm:$0xff] }
 0x4c6   : > { %v4336_v15 = vmax.f32 %v4307_v26, 0.0  ;;  %v3742_v33 = vadd.f32 %v9066_v3, %v3532_v58 }
 0x4c7   : > { %v4260_v45 = vpop.f32.mrf.mxu2  ;;  %v4543_v54 = vsel %vm622_vm0, %v4540_v18, %v4542_v14 }
 0x4c8   : > { %v4404_v52 = vrot.slane %v4336_v15, 1  ;;  %v4055_v7 = vadd.f32 %v10409_v49, %v3742_v33  ;;  %v4614_v51 = vmax.f32 %v9307_v29, %v4543_v54  ;;  %v10414_v33 = vld [vmem:[#allocation31_spill] sm:$0xff]  ;;  %v3057_v49 = vadd.f32 %v10416_v5, %v2832_v39  ;;  %v10422_v5 = vld [vmem:[#allocation52_spill] sm:$0xff] }
 0x4c9   : > { %v2592_v45 = vadd.f32 %v10414_v33, %v10413_v44 }
 0x4ca   : > { %v4275_v57 = vadd.f32 %v10412_v11, %v4055_v7  ;;  %v4405_v25 = vsel %vm2641_vm5, %v4402_v24, %v4404_v52  ;;  %v9385_v30 = vpack.c.bf16 %v4614_v51, %v4613_v16  ;;  %v10417_v16 = vld [vmem:[#allocation148_spill] sm:$0xff] }
 0x4cb   : > { %v3480_v26 = vpop.f32.mrf.mxu3  ;;  %v9387_v3 = vmax.f32 %v4335_v61, %v4405_v25  ;;  %v2833_v11 = vadd.f32 %v10418_v2, %v2592_v45  ;;  %v10420_v25 = vld [vmem:[#allocation93_spill] sm:$0xff] }
 0x4cc   : > { %v4308_v18 = vadd.f32 %v9122_v10, %v4275_v57  ;;  %v3533_v58 = vadd.f32 %v3480_v26, %v3312_v60  ;;  %v10419_v60 = vld [vmem:[#allocation16_spill] sm:$0xff]  ;;  %v3313_v26 = vadd.f32 %v10420_v25, %v3057_v49 }
 0x4cd   : > { %v4544_v29 = vrot.slane %v9387_v3, 4  ;;  %v10426_v25 = vld [vmem:[#allocation12_spill] sm:$0xff] }
 0x4ce   : > { %v3743_v54 = vadd.f32 %v10415_v0, %v3533_v58  ;;  %v4337_v7 = vmax.f32 %v4308_v18, 0.0 }
 0x4cf   : > { %v4545_v24 = vsel %vm622_vm0, %v4542_v14, %v4544_v29  ;;  %v10421_v14 = vld [vmem:[#allocation95_spill] sm:$0xff] }
 0x4d0   : > { %v4056_v51 = vadd.f32 %v10417_v16, %v3743_v54  ;;  %v4406_v42 = vrot.slane %v4337_v7, 1  ;;  %v4615_v61 = vmax.f32 %v9328_v13, %v4545_v24  ;;  %v3058_v0 = vadd.f32 %v10421_v14, %v2833_v11  ;;  %v10423_v13 = vld [vmem:[#allocation29_spill] sm:$0xff]  ;;  %v10427_v11 = vld [vmem:[#allocation15_spill] sm:$0xff] }
 0x4d1   : > { %v2594_v24 = vadd.f32 %v10423_v13, %v10422_v5  ;;  %v10429_v13 = vld [vmem:[#allocation37_spill] sm:$0xff] }
 0x4d2   : > { %v4276_v57 = vadd.f32 %v10419_v60, %v4056_v51  ;;  %v4407_v44 = vsel %vm2641_vm5, %v4404_v52, %v4406_v42  ;;  %v10424_v52 = vld [vmem:[#allocation150_spill] sm:$0xff] }
 0x4d3   : > { %v3482_v33 = vpop.f32.mrf.mxu3  ;;  %v9402_v58 = vmax.f32 %v4336_v15, %v4407_v44  ;;  %v10425_v60 = vld [vmem:[#allocation6_spill] sm:$0xff] }
 0x4d4   : > { %v4309_v39 = vadd.f32 %v9122_v10, %v4276_v57  ;;  %v3534_v18 = vadd.f32 %v3482_v33, %v3313_v26  ;;  %v3314_v57 = vadd.f32 %v10425_v60, %v3058_v0  ;;  %v2834_v26 = vadd.f32 %v10426_v25, %v2594_v24  ;;  %v10432_v25 = vld [vmem:[#allocation96_spill] sm:$0xff] }
 0x4d5   : > { %v4546_v54 = vrot.slane %v9402_v58, 4 }
 0x4d6   : > { %v4338_v45 = vmax.f32 %v4309_v39, 0.0  ;;  %v3744_v16 = vadd.f32 %v9086_v27, %v3534_v18  ;;  %v10428_v18 = vld [vmem:[#allocation56_spill] sm:$0xff] }
 0x4d7   : > { %v4547_v49 = vsel %vm622_vm0, %v4544_v29, %v4546_v54 }
 0x4d8   : > { %v4408_v51 = vrot.slane %v4338_v45, 1  ;;  %v4057_v2 = vadd.f32 %v10424_v52, %v3744_v16  ;;  %v4616_v15 = vmax.f32 %v9353_v37, %v4547_v49  ;;  %v2597_v16 = vadd.f32 %v10429_v13, %v10428_v18  ;;  %v10430_v49 = vld [vmem:[#allocation8_spill] sm:$0xff] }
 0x4d9   : > { %v3059_v52 = vadd.f32 %v10430_v49, %v2834_v26  ;;  %v10436_v49 = vld [vmem:[#allocation13_spill] sm:$0xff] }
 0x4da   : > { %v4277_v44 = vadd.f32 %v10427_v11, %v4057_v2  ;;  %v4409_v33 = vsel %vm2641_vm5, %v4406_v42, %v4408_v51  ;;  %v9417_v14 = vpack.c.bf16 %v4616_v15, %v4615_v61  ;;  %v10431_v15 = vld [vmem:[#allocation97_spill] sm:$0xff] }
 0x4db   : > { %v3485_v39 = vpop.f32.mrf.mxu3  ;;  %v9419_v5 = vmax.f32 %v4337_v7, %v4409_v33  ;;  %v2835_v60 = vadd.f32 %v10431_v15, %v2597_v16  ;;  %v3315_v11 = vadd.f32 %v10432_v25, %v3059_v52 }
 0x4dc   : > { %v4310_v27 = vadd.f32 %v9122_v10, %v4277_v44  ;;  %v3535_v29 = vadd.f32 %v3485_v39, %v3314_v57 }
 0x4dd   : > { %v4548_v37 = vrot.slane %v9419_v5, 4 }
 0x4de   : > { %v4339_v0 = vmax.f32 %v4310_v27, 0.0  ;;  %v3745_v24 = vadd.f32 %v9098_v23, %v3535_v29  ;;  %v10434_v29 = vld [vmem:[#allocation57_spill] sm:$0xff] }
 0x4df   : > { %v4549_v42 = vsel %vm622_vm0, %v4546_v54, %v4548_v37  ;;  %v10433_v54 = vld [vmem:[#allocation98_spill] sm:$0xff] }
 0x4e0   : > { %v4410_v61 = vrot.slane %v4339_v0, 1  ;;  %v4058_v2 = vadd.f32 %v9100_v46, %v3745_v24  ;;  %v4617_v7 = vmax.f32 %v9370_v12, %v4549_v42  ;;  %v3060_v27 = vadd.f32 %v10433_v54, %v2835_v60  ;;  %v10435_v12 = vld [vmem:[#allocation23_spill] sm:$0xff]  ;;  %v10437_v42 = vld [vmem:[#allocation9_spill] sm:$0xff] }
 0x4e1   : > { %v2599_v18 = vadd.f32 %v10435_v12, %v10434_v29  ;;  %v10440_v54 = vld [vmem:[#allocation17_spill] sm:$0xff]  ;;  %v10441_v29 = vld [vmem:[#allocation100_spill] sm:$0xff] }
 0x4e2   : > { %v4278_v57 = vadd.f32 %v9107_v38, %v4058_v2  ;;  %v4411_v44 = vsel %vm2641_vm5, %v4408_v51, %v4410_v61  ;;  %v3316_v52 = vadd.f32 %v10436_v49, %v3060_v27 }
 0x4e3   : > { %v3487_v33 = vpop.f32.mrf.mxu3  ;;  %v9434_v39 = vmax.f32 %v4338_v45, %v4411_v44  ;;  %v2836_v2 = vadd.f32 %v10437_v42, %v2599_v18  ;;  %v10438_v44 = vld [vmem:[#allocation60_spill] sm:$0xff] }
 0x4e4   : > { %v4311_v23 = vadd.f32 %v9122_v10, %v4278_v57  ;;  %v3536_v26 = vadd.f32 %v3487_v33, %v3315_v11 }
 0x4e5   : > { %v4550_v46 = vrot.slane %v9434_v39, 4 }
 0x4e6   : > { %v4340_v13 = vmax.f32 %v4311_v23, 0.0  ;;  %v3746_v38 = vadd.f32 %v9110_v36, %v3536_v26 }
 0x4e7   : > { %v4551_v16 = vsel %vm622_vm0, %v4548_v37, %v4550_v46 }
 0x4e8   : > { %v4412_v24 = vrot.slane %v4340_v13, 1  ;;  %v4059_v51 = vadd.f32 %v9112_v6, %v3746_v38  ;;  %v4618_v45 = vmax.f32 %v9387_v3, %v4551_v16  ;;  %v10439_v6 = vld [vmem:[#allocation21_spill] sm:$0xff]  ;;  %v10442_v16 = vld [vmem:[#allocation99_spill] sm:$0xff] }
 0x4e9   : > { %v2602_v33 = vadd.f32 %v10439_v6, %v10438_v44  ;;  %v10447_v6 = vld [vmem:[#allocation10_spill] sm:$0xff] }
 0x4ea   : > { %v4279_v15 = vadd.f32 %v9127_v47, %v4059_v51  ;;  %v4413_v60 = vsel %vm2641_vm5, %v4410_v61, %v4412_v24  ;;  %v9449_v57 = vpack.c.bf16 %v4618_v45, %v4617_v7  ;;  %v3061_v47 = vadd.f32 %v10440_v54, %v2836_v2  ;;  %v10444_v2 = vld [vmem:[#allocation64_spill] sm:$0xff] }
 0x4eb   : > { %v3490_v25 = vpop.f32.mrf.mxu3  ;;  %v9451_v11 = vmax.f32 %v4339_v0, %v4413_v60  ;;  %v2837_v12 = vadd.f32 %v10441_v29, %v2602_v33  ;;  %v10448_v29 = vld [vmem:[#allocation68_spill] sm:$0xff] }
 0x4ec   : > { %v4312_v36 = vadd.f32 %v9122_v10, %v4279_v15  ;;  %v3537_v37 = vadd.f32 %v3490_v25, %v3316_v52  ;;  %v3317_v51 = vadd.f32 %v10442_v16, %v3061_v47  ;;  %v10450_v16 = vld [vmem:[#allocation102_spill] sm:$0xff] }
 0x4ed   : > { %v4552_v3 = vrot.slane %v9451_v11, 4 }
 0x4ee   : > { %v4341_v23 = vmax.f32 %v4312_v36, 0.0  ;;  %v3747_v26 = vadd.f32 %v9131_v21, %v3537_v37  ;;  %v10446_v37 = vld [vmem:[#allocation14_spill] sm:$0xff] }
 0x4ef   : > { %v4553_v61 = vsel %vm622_vm0, %v4550_v46, %v4552_v3  ;;  %v10443_v46 = vld [vmem:[#allocation101_spill] sm:$0xff] }
 0x4f0   : > { %v4414_v7 = vrot.slane %v4341_v23, 1  ;;  %v4060_v27 = vadd.f32 %v9133_v28, %v3747_v26  ;;  %v4619_v0 = vmax.f32 %v9402_v58, %v4553_v61  ;;  %v3062_v42 = vadd.f32 %v10443_v46, %v2837_v12  ;;  %v10445_v58 = vld [vmem:[#allocation26_spill] sm:$0xff]  ;;  %v10449_v12 = vld [vmem:[#allocation133_spill] sm:$0xff] }
 0x4f1   : > { %v2604_v15 = vadd.f32 %v10445_v58, %v10444_v2 }
 0x4f2   : > { %v4415_v18 = vsel %vm2641_vm5, %v4412_v24, %v4414_v7  ;;  %v4280_v38 = vadd.f32 %v9144_v31, %v4060_v27  ;;  %v3318_v44 = vadd.f32 %v10446_v37, %v3062_v42  ;;  %v10452_v42 = vld [vmem:[#allocation103_spill] sm:$0xff] }
 0x4f3   : > { %v3492_v45 = vpop.f32.mrf.mxu3  ;;  %v9466_v49 = vmax.f32 %v4340_v13, %v4415_v18  ;;  %v2838_v33 = vadd.f32 %v10447_v6, %v2604_v15 }
 0x4f4   : > { %v4313_v21 = vadd.f32 %v9122_v10, %v4280_v38  ;;  %v3538_v52 = vadd.f32 %v3492_v45, %v3317_v51  ;;  %v10451_v45 = vld [vmem:[#allocation104_spill] sm:$0xff] }
 0x4f5   : > { %v4554_v28 = vrot.slane %v9466_v49, 4  ;;  %v3063_v51 = vadd.f32 %v10450_v16, %v2838_v33  ;;  %v10456_v33 = vld [vmem:[#allocation106_spill] sm:$0xff] }
 0x4f6   : > { %v4342_v60 = vmax.f32 %v4313_v21, 0.0  ;;  %v3748_v24 = vadd.f32 %v9147_v17, %v3538_v52 }
 0x4f7   : > { %v4555_v31 = vsel %vm622_vm0, %v4552_v3, %v4554_v28  ;;  %v3319_v2 = vadd.f32 %v10452_v42, %v3063_v51  ;;  %v10462_v42 = vld [vmem:[#allocation109_spill] sm:$0xff] }
 0x4f8   : > { %v4416_v25 = vrot.slane %v4342_v60, 1  ;;  %v4061_v36 = vadd.f32 %v9149_v32, %v3748_v24  ;;  %v4620_v13 = vmax.f32 %v9419_v5, %v4555_v31  ;;  %v2607_v32 = vadd.f32 %v10449_v12, %v10448_v29 }
 0x4fa   : > { %v4417_v26 = vsel %vm2641_vm5, %v4414_v7, %v4416_v25  ;;  %v4281_v54 = vadd.f32 %v9163_v20, %v4061_v36  ;;  %v4645_v47 = vpack.c.bf16 %v4620_v13, %v4619_v0  ;;  %v2839_v21 = vadd.f32 %v10451_v45, %v2607_v32  ;;  %v10454_v36 = vld [vmem:[#allocation72_spill] sm:$0xff] }
 0x4fb   : > { %v9481_v61 = vmax.f32 %v4341_v23, %v4417_v26  ;;  %v3495_v27 = vpop.f32.mrf.mxu3 }
 0x4fc   : > { %v4314_v17 = vadd.f32 %v9122_v10, %v4281_v54  ;;  %v3539_v3 = vadd.f32 %v3495_v27, %v3318_v44  ;;  %v10457_v54 = vld [vmem:[#allocation107_spill] sm:$0xff] }
 0x4fd   : > { %v4556_v5 = vrot.slane %v9481_v61, 4 }
 0x4fe   : > { %v4343_v18 = vmax.f32 %v4314_v17, 0.0  ;;  %v3749_v38 = vadd.f32 %v9167_v59, %v3539_v3 }
 0x4ff   : > { %v4557_v7 = vsel %vm622_vm0, %v4554_v28, %v4556_v5  ;;  %v10453_v28 = vld [vmem:[#allocation105_spill] sm:$0xff] }
 0x500   : > { %v4418_v20 = vrot.slane %v4343_v18, 1  ;;  %v4062_v23 = vadd.f32 %v9169_v8, %v3749_v38  ;;  %v4621_v0 = vmax.f32 %v9434_v39, %v4557_v7  ;;  %v3064_v31 = vadd.f32 %v10453_v28, %v2839_v21  ;;  %v10455_v39 = vld [vmem:[#allocation134_spill] sm:$0xff]  ;;  %v10459_v38 = vld [vmem:[#allocation137_spill] sm:$0xff] }
 0x501   : > { %v2609_v13 = vadd.f32 %v10455_v39, %v10454_v36  ;;  %v10461_v21 = vld [vmem:[#allocation110_spill] sm:$0xff]  ;;  %v10466_v39 = vld [vmem:[#allocation20_spill] sm:$0xff] }
 0x502   : > { %v4419_v52 = vsel %vm2641_vm5, %v4416_v25, %v4418_v20  ;;  %v4282_v46 = vadd.f32 %v9182_v40, %v4062_v23  ;;  %v3320_v26 = vadd.f32 %v10456_v33, %v3064_v31  ;;  %v10460_v23 = vld [vmem:[#allocation108_spill] sm:$0xff]  ;;  %v10469_v33 = vld [vmem:[#allocation114_spill] sm:$0xff] }
 0x503   : > { %v3497_v58 = vpop.f32.mrf.mxu3  ;;  %v9496_v15 = vmax.f32 %v4342_v60, %v4419_v52  ;;  %v2840_v27 = vadd.f32 %v10457_v54, %v2609_v13  ;;  %v10464_v31 = vld [vmem:[#allocation80_spill] sm:$0xff] }
 0x504   : > { %v4315_v59 = vadd.f32 %v9122_v10, %v4282_v46  ;;  %v3540_v24 = vadd.f32 %v3497_v58, %v3319_v2 }
 0x505   : > { %v4558_v8 = vrot.slane %v9496_v15, 4 }
 0x506   : > { %v3750_v37 = vadd.f32 %v9185_v63, %v3540_v24  ;;  %v4344_v25 = vmax.f32 %v4315_v59, 0.0 }
 0x507   : > { %v4559_v40 = vsel %vm622_vm0, %v4556_v5, %v4558_v8 }
 0x508   : > { %v4063_v44 = vadd.f32 %v9187_v19, %v3750_v37  ;;  %v4622_v60 = vmax.f32 %v9451_v11, %v4559_v40  ;;  %v4420_v6 = vrot.slane %v4344_v25, 1  ;;  %v10458_v19 = vld [vmem:[#allocation76_spill] sm:$0xff] }
 0x509   : > { %v2612_v11 = vadd.f32 %v10459_v38, %v10458_v19 }
 0x50a   : > { %v4283_v17 = vadd.f32 %v9201_v50, %v4063_v44  ;;  %v4646_v3 = vpack.c.bf16 %v4622_v60, %v4621_v0  ;;  %v4421_v29 = vsel %vm2641_vm5, %v4418_v20, %v4420_v6  ;;  %v3065_v50 = vadd.f32 %v10460_v23, %v2840_v27 }
 0x50b   : > { %v3500_v12 = vpop.f32.mrf.mxu3  ;;  %v9511_v32 = vmax.f32 %v4343_v18, %v4421_v29  ;;  %v2841_v52 = vadd.f32 %v10461_v21, %v2612_v11  ;;  %v10472_v11 = vld [vmem:[#allocation115_spill] sm:$0xff] }
 0x50c   : > { %v4316_v63 = vadd.f32 %v9122_v10, %v4283_v17  ;;  %v3541_v5 = vadd.f32 %v3500_v12, %v3320_v26  ;;  %4694 = vmatpush.bf16.msra.mxu3 %v4646_v3  ;;  %v3321_v2 = vadd.f32 %v10462_v42, %v3065_v50 }
 0x50d   : > { %v4560_v16 = vrot.slane %v9511_v32, 4 }
 0x50e   : > { %v4345_v51 = vmax.f32 %v4316_v63, 0.0  ;;  %v3751_v7 = vadd.f32 %v9205_v62, %v3541_v5 }
 0x50f   : > { %v4561_v0 = vsel %vm622_vm0, %v4558_v8, %v4560_v16  ;;  %v10465_v8 = vld [vmem:[#allocation139_spill] sm:$0xff] }
 0x510   : > { %v4422_v20 = vrot.slane %v4345_v51, 1  ;;  %v4064_v18 = vadd.f32 %v9207_v56, %v3751_v7  ;;  %4695 = vmatpush.bf16.msra.mxu3 %v4645_v47  ;;  %v4623_v45 = vmax.f32 %v9466_v49, %v4561_v0  ;;  %v10463_v56 = vld [vmem:[#allocation111_spill] sm:$0xff]  ;;  %v2614_v36 = vadd.f32 %v10465_v8, %v10464_v31  ;;  %v10479_v31 = vld [vmem:[#allocation48_spill] sm:$0xff] }
 0x511   : > { %v3066_v47 = vadd.f32 %v10463_v56, %v2841_v52 }
 0x512   : > { %v4284_v46 = vadd.f32 %v9222_v22, %v4064_v18  ;;  %v4423_v58 = vsel %vm2641_vm5, %v4420_v6, %v4422_v20  ;;  %v2842_v26 = vadd.f32 %v10469_v33, %v2614_v36  ;;  %v10474_v18 = vld [vmem:[#allocation117_spill] sm:$0xff] }
 0x513   : > { %v3502_v59 = vpop.f32.mrf.mxu3  ;;  %v9526_v62 = vmax.f32 %v4344_v25, %v4423_v58  ;;  %v10467_v25 = vld [vmem:[#allocation28_spill] sm:$0xff]  ;;  %v10477_v58 = vld [vmem:[#allocation145_spill] sm:$0xff] }
 0x514   : > { %v4317_v24 = vadd.f32 %v9122_v10, %v4284_v46  ;;  %v3542_v28 = vadd.f32 %v3502_v59, %v3321_v2  ;;  %4696 = vmatpush.bf16.msra.mxu3 %v9449_v57  ;;  %v10468_v57 = vld [vmem:[#allocation113_spill] sm:$0xff]  ;;  %v10476_v2 = vld [vmem:[#allocation88_spill] sm:$0xff] }
 0x515   : > { %v4562_v49 = vrot.slane %v9526_v62, 4  ;;  %v3322_v6 = vadd.f32 %v10468_v57, %v3066_v47  ;;  %v2619_v59 = vadd.f32 %v10477_v58, %v10476_v2  ;;  %v10478_v47 = vld [vmem:[#allocation50_spill] sm:$0xff]  ;;  %v10483_v33 = vld [vmem:[#allocation149_spill] sm:$0xff] }
 0x516   : > { %v4346_v22 = vmax.f32 %v4317_v24, 0.0  ;;  %v3752_v13 = vadd.f32 %v10466_v39, %v3542_v28 }
 0x517   : > { %v4563_v37 = vsel %vm622_vm0, %v4560_v16, %v4562_v49  ;;  %v3067_v16 = vadd.f32 %v10472_v11, %v2842_v26 }
 0x518   : > { %v4424_v40 = vrot.slane %v4346_v22, 1  ;;  %v4065_v44 = vadd.f32 %v10467_v25, %v3752_v13  ;;  %4697 = vmatpush.bf16.msra.mxu3 %v9417_v14  ;;  %v4624_v60 = vmax.f32 %v9481_v61, %v4563_v37  ;;  %v10470_v14 = vld [vmem:[#allocation84_spill] sm:$0xff]  ;;  %v10471_v61 = vld [vmem:[#allocation143_spill] sm:$0xff] }
 0x519   : > { %v2617_v5 = vadd.f32 %v10471_v61, %v10470_v14 }
 0x51a   : > { %v4285_v54 = vadd.f32 %v9244_v43, %v4065_v44  ;;  %v4425_v27 = vsel %vm2641_vm5, %v4422_v20, %v4424_v40  ;;  %v9543_v17 = vpack.c.bf16 %v4624_v60, %v4623_v45  ;;  %v3323_v45 = vadd.f32 %v10474_v18, %v3067_v16 }
 0x51b   : > { %v3505_v3 = vpop.f32.mrf.mxu3  ;;  %v9545_v29 = vmax.f32 %v4345_v51, %v4425_v27  ;;  %v10484_v27 = vld [vmem:[#allocation123_spill] sm:$0xff] }
 0x51c   : > { %v4318_v12 = vadd.f32 %v9122_v10, %v4285_v54  ;;  %v3543_v63 = vadd.f32 %v3505_v3, %v3322_v6  ;;  %4698 = vmatpush.bf16.msra.mxu3 %v9385_v30  ;;  %v10473_v30 = vld [vmem:[#allocation118_spill] sm:$0xff]  ;;  %v10482_v6 = vld [vmem:[#allocation5_spill] sm:$0xff] }
 0x51d   : > { %v4564_v19 = vrot.slane %v9545_v29, 4  ;;  %v2843_v0 = vadd.f32 %v10473_v30, %v2617_v5  ;;  %v2622_v26 = vadd.f32 %v10483_v33, %v10482_v6  ;;  %v10486_v5 = vld [vmem:[#allocation126_spill] sm:$0xff]  ;;  %v7003_v6 = vld [vmem:[%s10004_s4] ss:$0 sm:$0xff] }
 0x51e   : > { %v4347_v38 = vmax.f32 %v4318_v12, 0.0  ;;  %v3753_v43 = vadd.f32 %v9249_v35, %v3543_v63  ;;  %v10485_v63 = vld [vmem:[#allocation30_spill] sm:$0xff] }
 0x51f   : > { %v4565_v7 = vsel %vm622_vm0, %v4562_v49, %v4564_v19 }
 0x520   : > { %v4426_v23 = vrot.slane %v4347_v38, 1  ;;  %v4066_v51 = vadd.f32 %v9251_v48, %v3753_v43  ;;  %4699 = vmatpush.bf16.msra.mxu3 %v9351_v9  ;;  %v4625_v50 = vmax.f32 %v9496_v15, %v4565_v7  ;;  %v10475_v48 = vld [vmem:[#allocation119_spill] sm:$0xff]  ;;  %v10487_v43 = vld [vmem:[#allocation125_spill] sm:$0xff] }
 0x521   : > { %v3068_v9 = vadd.f32 %v10475_v48, %v2843_v0  ;;  %v10488_v0 = vld [vmem:[#allocation51_spill] sm:$0xff] }
 0x522   : > { %v4286_v20 = vadd.f32 %v9269_v34, %v4066_v51  ;;  %v4427_v21 = vsel %vm2641_vm5, %v4424_v40, %v4426_v23 }
 0x523   : > { %v3507_v35 = vpop.f32.mrf.mxu3  ;;  %v9562_v52 = vmax.f32 %v4346_v22, %v4427_v21  ;;  %v10481_v22 = vld [vmem:[#allocation122_spill] sm:$0xff] }
 0x524   : > { %v4319_v46 = vadd.f32 %v9122_v10, %v4286_v20  ;;  %v3544_v42 = vadd.f32 %v3507_v35, %v3323_v45  ;;  %4700 = vmatpush.bf16.msra.mxu3 %v9305_v4  ;;  %v10480_v4 = vld [vmem:[#allocation121_spill] sm:$0xff]  ;;  %v2844_v39 = vadd.f32 %v10481_v22, %v2619_v59  ;;  %v10490_v21 = vld [vmem:[#allocation54_spill] sm:$0xff] }
 0x525   : > { %v4566_v15 = vrot.slane %v9562_v52, 4  ;;  %v3324_v36 = vadd.f32 %v10480_v4, %v3068_v9  ;;  %v10492_v9 = vld [vmem:[#allocation19_spill] sm:$0xff] }
 0x526   : > { %v4348_v34 = vmax.f32 %v4319_v46, 0.0  ;;  %v3754_v24 = vadd.f32 %v9272_v1, %v3544_v42  ;;  %v3069_v3 = vadd.f32 %v10484_v27, %v2844_v39  ;;  %v10491_v42 = vld [vmem:[#allocation53_spill] sm:$0xff]  ;;  %v10494_v39 = vld [vmem:[#allocation55_spill] sm:$0xff] }
 0x527   : > { %v4567_v28 = vsel %vm622_vm0, %v4564_v19, %v4566_v15  ;;  %v2845_v19 = vadd.f32 %v10486_v5, %v2622_v26 }
 0x528   : > { %v4428_v56 = vrot.slane %v4348_v34, 1  ;;  %v4067_v49 = vadd.f32 %v10478_v47, %v3754_v24  ;;  %4701 = vmatpush.bf16.msra.mxu3 %v10479_v31  ;;  %v4626_v8 = vmax.f32 %v9511_v32, %v4567_v28  ;;  %v3325_v11 = vadd.f32 %v10487_v43, %v3069_v3 }
 0x52a   : > { %v4287_v13 = vadd.f32 %v9291_v55, %v4067_v49  ;;  %v4429_v37 = vsel %vm2641_vm5, %v4426_v23, %v4428_v56  ;;  %v9579_v40 = vpack.c.bf16 %v4626_v8, %v4625_v50  ;;  %v10493_v8 = vld [vmem:[#allocation33_spill] sm:$0xff] }
 0x52b   : > { %v3510_v1 = vpop.f32.mrf.mxu3  ;;  %v4484_v25 = vmax.f32 %v4347_v38, %v4429_v37  ;;  %v10495_v37 = vld [vmem:[#allocation35_spill] sm:$0xff] }
 0x52c   : > { %v4320_v44 = vadd.f32 %v9122_v10, %v4287_v13  ;;  %v3545_v60 = vadd.f32 %v3510_v1, %v3324_v36 }
 0x52d   : > { %v4568_v57 = vrot.slane %v4484_v25, 4 }
 0x52e   : > { %v4349_v32 = vmax.f32 %v4320_v44, 0.0  ;;  %v3755_v54 = vadd.f32 %v9293_v53, %v3545_v60 }
 0x52f   : > { %v4569_v55 = vsel %vm622_vm0, %v4566_v15, %v4568_v57 }
 0x530   : > { %v4430_v12 = vrot.slane %v4349_v32, 1  ;;  %v4068_v14 = vadd.f32 %v10485_v63, %v3755_v54  ;;  %v4627_v61 = vmax.f32 %v9526_v62, %v4569_v55  ;;  %v10489_v62 = vld [vmem:[#allocation127_spill] sm:$0xff] }
 0x531   : > { %v3070_v18 = vadd.f32 %v10489_v62, %v2845_v19 }
 0x532   : > { %v4288_v38 = vadd.f32 %v9314_v41, %v4068_v14  ;;  %v4431_v16 = vsel %vm2641_vm5, %v4428_v56, %v4430_v12  ;;  %v6268_v56 = vld [vmem:[%s10007_s7] sm:$0xf]  ;;  %v6276_v14 = vld [vmem:[%s10007_s7 + $0x10] sm:$0xf] }
 0x533   : > { %v3512_v7 = vpop.f32.mrf.mxu3  ;;  %v9593_v23 = vmax.f32 %v4348_v34, %v4431_v16  ;;  %v3326_v15 = vadd.f32 %v10492_v9, %v3070_v18  ;;  %v6270_v9 = vld [vmem:[%s10007_s7 + $0x8] sm:$0xf0] }
 0x534   : > { %v4321_v53 = vadd.f32 %v9122_v10, %v4288_v38  ;;  %v3546_v51 = vadd.f32 %v3512_v7, %v3325_v11  ;;  %v7068_v38 = vmov 65535  }
 0x535   : > { %v4570_v50 = vrot.slane %v9593_v23, 4  ;;  %v4689_v43 = vsel %vm4687_vm7, 4294967295, %v7068_v38  ;;  %v6705_v38 = vld [vmem:[%s10005_s5 + $0xf0] sm:$0xff] }
 0x536   : > { %v4350_v30 = vmax.f32 %v4321_v53, 0.0  ;;  %v3756_v20 = vadd.f32 %v10488_v0, %v3546_v51  ;;  %v4690_v7 = vsel %vm4688_vm8, %v4689_v43, 0  ;;  %v6721_v43 = vld [vmem:[%s10005_s5 + $0x170] sm:$0xff] }
 0x537   : > { %v4571_v45 = vsel %vm622_vm0, %v4568_v57, %v4570_v50 }
 0x538   : > { %v4432_v41 = vrot.slane %v4350_v30, 1  ;;  %v4069_v35 = vadd.f32 %v10490_v21, %v3756_v20  ;;  %v4628_v46 = vmax.f32 %v9545_v29, %v4571_v45  ;;  %v6672_v29 = vld [vmem:[%s10007_s7 + $0x4] sm:$0xf0]  ;;  %v6690_v45 = vld [vmem:[%s10005_s5 + $0x78] sm:$0xff]  ;;  %v6689_v21 = vld [vmem:[%s10005_s5 + $0x70] sm:$0xff] }
 0x539   : > { %v6269_v49 = vor.u32 %v6672_v29, %v6268_v56  ;;  %4850 = vmatpush.bf16.msra.mxu1 %v6690_v45  ;;  %v6698_v29 = vld [vmem:[%s10005_s5 + $0xb8] sm:$0xff]  ;;  %v6719_v45 = vld [vmem:[%s10005_s5 + $0x160] sm:$0xff] }
 0x53a   : > { %v4289_v48 = vadd.f32 %v10491_v42, %v4069_v35  ;;  %v4433_v2 = vsel %vm2641_vm5, %v4430_v12, %v4432_v41  ;;  %v9605_v58 = vpack.c.bf16 %v4628_v46, %v4627_v61  ;;  %v6674_v61 = vld [vmem:[%s10007_s7 + $0x14] sm:$0xf0]  ;;  %v4487_v19 = vmax.f32 %v4350_v30, %v4432_v41  ;;  %v6680_v42 = vld [vmem:[%s10005_s5 + $0x28] sm:$0xff]  ;;  %5005 = vmatpush.bf16.msrb.mxu3 %v6698_v29 }
 0x53b   : > { %v3515_v59 = vpop.f32.mrf.mxu3  ;;  %v4486_v34 = vmax.f32 %v4349_v32, %v4433_v2  ;;  %4702 = vmatmul.bf16.vlgmr.msra.gmra.mxu3 %v6269_v49  ;;  %v6688_v2 = vld [vmem:[%s10005_s5 + $0x68] sm:$0xff]  ;;  %v6678_v49 = vld [vmem:[%s10005_s5 + $0x18] sm:$0xff] }
 0x53c   : > { %v4322_v24 = vadd.f32 %v9122_v10, %v4289_v48  ;;  %v3547_v28 = vadd.f32 %v3515_v59, %v3326_v15  ;;  %v6671_v48 = vld [vmem:[%s10007_s7 + $0x4] sm:$0xf]  ;;  %v6278_v59 = vld [vmem:[%s10007_s7 + $0x18] sm:$0xf0] }
 0x53d   : > { %v4572_v47 = vrot.slane %v4486_v34, 4  ;;  %4851 = vmatpush.bf16.msra.mxu1 %v6689_v21  ;;  %v6273_v15 = vor.u32 %v6671_v48, %v6270_v9  ;;  %v6718_v48 = vld [vmem:[%s10005_s5 + $0x158] sm:$0xff] }
 0x53e   : > { %v4351_v31 = vmax.f32 %v4322_v24, 0.0  ;;  %v3757_v4 = vadd.f32 %v10493_v8, %v3547_v28  ;;  %v6702_v9 = vld [vmem:[%s10005_s5 + $0xd8] sm:$0xff] }
 0x53f   : > { %v4573_v36 = vsel %vm622_vm0, %v4570_v50, %v4572_v47 }
 0x540   : > { %v4490_v22 = vrot.slane %v4351_v31, 1  ;;  %v4070_v10 = vadd.f32 %v10494_v39, %v3757_v4  ;;  %v4629_v13 = vmax.f32 %v9562_v52, %v4573_v36  ;;  %v6677_v4 = vld [vmem:[%s10005_s5 + $0x10] sm:$0xff]  ;;  %v6695_v36 = vld [vmem:[%s10005_s5 + $0xa0] sm:$0xff]  ;;  %v6694_v39 = vld [vmem:[%s10005_s5 + $0x98] sm:$0xff] }
 0x541   : > { %4852 = vmatpush.bf16.msra.mxu1 %v6688_v2  ;;  %v6707_v2 = vld [vmem:[%s10005_s5 + $0x100] sm:$0xff] }
 0x542   : > { %v4290_v1 = vadd.f32 %v10495_v37, %v4070_v10  ;;  %v4491_v44 = vsel %vm2641_vm5, %v4432_v41, %v4490_v22  ;;  %v4638_v41 = vld [vmem:[%s10007_s7 + $0x20] sm:$0x33]  ;;  %v6730_v10 = vld [vmem:[%s10005_s5 + $0x1b8] sm:$0xff] }
 0x543   : > { %v3517_v60 = vpop.f32.mrf.mxu3  ;;  %v4497_v57 = vmax.f32 %v4350_v30, %v4491_v44  ;;  %v6682_v30 = vld [vmem:[%s10005_s5 + $0x38] sm:$0xff]  ;;  %v4666_v35 = vunpack.c.l.b16 %v4638_v41  ;;  %v4667_v24 = vunpack.c.h.b16 %v4638_v41  ;;  %v6693_v44 = vld [vmem:[%s10005_s5 + $0x90] sm:$0xff]  ;;  %v6723_v41 = vld [vmem:[%s10005_s5 + $0x180] sm:$0xff] }
 0x544   : > { %v4323_v33 = vadd.f32 %v7003_v6, %v4290_v1  ;;  %4918 = vmatpush.bf16.msra.mxu2 %v6682_v30  ;;  %v6686_v37 = vld [vmem:[%s10005_s5 + $0x58] sm:$0xff]  ;;  %v6729_v60 = vld [vmem:[%s10005_s5 + $0x1b0] sm:$0xff] }
 0x545   : > { %v4574_v26 = vrot.slane %v4497_v57, 4  ;;  %v4672_v46 = vpack.c.b16 %v4666_v35, %v4666_v35  ;;  %v4673_v28 = vpack.c.b16 %v4667_v24, %v4667_v24  ;;  %v6714_v57 = vld [vmem:[%s10005_s5 + $0x138] sm:$0xff]  ;;  %v6685_v6 = vld [vmem:[%s10005_s5 + $0x50] sm:$0xff] }
 0x546   : > { %v4352_v32 = vmax.f32 %v4323_v33, 0.0  ;;  %v6692_v33 = vld [vmem:[%s10005_s5 + $0x88] sm:$0xff] }
 0x547   : > { %v4575_v54 = vsel %vm622_vm0, %v4572_v47, %v4574_v26  ;;  %v6697_v47 = vld [vmem:[%s10005_s5 + $0xb0] sm:$0xff] }
 0x548   : > { %v4492_v27 = vrot.slane %v4352_v32, 1  ;;  %v4630_v3 = vmax.f32 %v4484_v25, %v4575_v54  ;;  %v6277_v25 = vor.u32 %v6674_v61, %v6276_v14  ;;  %5006 = vmatpush.bf16.msrb.mxu3 %v6697_v47  ;;  %v6684_v54 = vld [vmem:[%s10005_s5 + $0x48] sm:$0xff]  ;;  %v6726_v14 = vld [vmem:[%s10005_s5 + $0x198] sm:$0xff] }
 0x549   : > { %v6706_v61 = vld [vmem:[%s10005_s5 + $0xf8] sm:$0xff]  ;;  %v6716_v47 = vld [vmem:[%s10005_s5 + $0x148] sm:$0xff] }
 0x54a   : > { %v4499_v55 = vmax.f32 %v4352_v32, %v4492_v27  ;;  %v4493_v52 = vsel %vm2641_vm5, %v4490_v22, %v4492_v27  ;;  %v4650_v12 = vpack.c.bf16 %v4630_v3, %v4629_v13  ;;  %v6676_v22 = vld [vmem:[%s10005_s5 + $0x8] sm:$0xff]  ;;  %v6675_v13 = vld [vmem:[%s10005_s5] sm:$0xff]  ;;  %v6713_v32 = vld [vmem:[%s10005_s5 + $0x130] sm:$0xff] }
 0x54b   : > { %v4498_v63 = vmax.f32 %v4351_v31, %v4493_v52  ;;  %4707 = vmatmul.bf16.gmra.mxu3 %v6277_v25  ;;  %v6696_v31 = vld [vmem:[%s10005_s5 + $0xa8] sm:$0xff]  ;;  %v6683_v27 = vld [vmem:[%s10005_s5 + $0x40] sm:$0xff]  ;;  %v6725_v25 = vld [vmem:[%s10005_s5 + $0x190] sm:$0xff] }
 0x54c   : > { %v4578_v5 = vrot.slane %v4499_v55, 4  ;;  %5007 = vmatpush.bf16.msrb.mxu3 %v6696_v31  ;;  %v6691_v3 = vld [vmem:[%s10005_s5 + $0x80] sm:$0xff]  ;;  %v6712_v52 = vld [vmem:[%s10005_s5 + $0x128] sm:$0xff] }
 0x54d   : > { %v4576_v11 = vrot.slane %v4498_v63, 4  ;;  %v6727_v55 = vld [vmem:[%s10005_s5 + $0x1a0] sm:$0xff]  ;;  %v6722_v63 = vld [vmem:[%s10005_s5 + $0x178] sm:$0xff] }
 0x54e   : > { %v4633_v16 = vmax.f32 %v4487_v19, %v4578_v5 }
 0x54f   : > { %v4577_v53 = vsel %vm622_vm0, %v4574_v26, %v4576_v11  ;;  %v4579_v51 = vsel %vm622_vm0, %v4576_v11, %v4578_v5  ;;  %v6728_v26 = vld [vmem:[%s10005_s5 + $0x1a8] sm:$0xff]  ;;  %v6711_v5 = vld [vmem:[%s10005_s5 + $0x120] sm:$0xff]  ;;  %v6710_v11 = vld [vmem:[%s10005_s5 + $0x118] sm:$0xff] }
 0x550   : > { %v4652_v50 = vpack.c.bf16 %v4633_v16, %v4633_v16  ;;  %v4631_v0 = vmax.f32 %v9593_v23, %v4577_v53  ;;  %v4632_v20 = vmax.f32 %v4486_v34, %v4579_v51  ;;  %v6681_v23 = vld [vmem:[%s10005_s5 + $0x30] sm:$0xff]  ;;  %5008 = vmatpush.bf16.msrb.mxu3 %v6695_v36  ;;  %v6720_v51 = vld [vmem:[%s10005_s5 + $0x168] sm:$0xff] }
 0x551   : > { %4919 = vmatpush.bf16.msra.mxu2 %v6681_v23  ;;  %v6708_v23 = vld [vmem:[%s10005_s5 + $0x108] sm:$0xff] }
 0x552   : > { %v4692_v62 = vand.u32 %v4690_v7, %v4652_v50  ;;  %v4651_v18 = vpack.c.bf16 %v4632_v20, %v4631_v0  ;;  %v6704_v7 = vld [vmem:[%s10005_s5 + $0xe8] sm:$0xff]  ;;  %v6709_v0 = vld [vmem:[%s10005_s5 + $0x110] sm:$0xff] }
 0x553   : > { %v6724_v50 = vld [vmem:[%s10005_s5 + $0x188] sm:$0xff] }
 0x554   : > { %4719 = vmatpush.bf16.msra.mxu0 %v4692_v62  ;;  %5009 = vmatpush.bf16.msrb.mxu3 %v6694_v39  ;;  %v6703_v62 = vld [vmem:[%s10005_s5 + $0xe0] sm:$0xff] }
 0x555   : > { %4920 = vmatpush.bf16.msra.mxu2 %v6680_v42 }
 0x558   : > { %4720 = vmatpush.bf16.msra.mxu0 %v4651_v18  ;;  %5010 = vmatpush.bf16.msrb.mxu3 %v6693_v44  ;;  %v6744_v44 = vld [vmem:[%s10005_s5 + $0x228] sm:$0xff] }
 0x55b   : > { %4712 = vmatmul.bf16.gmra.mxu3 %v4672_v46 }
 0x55c   : > { %4721 = vmatpush.bf16.msra.mxu0 %v4650_v12  ;;  %5011 = vmatpush.bf16.msrb.mxu3 %v6692_v33 }
 0x560   : > { %4722 = vmatpush.bf16.msra.mxu0 %v9605_v58  ;;  %v6687_v58 = vld [vmem:[%s10005_s5 + $0x60] sm:$0xff]  ;;  %5012 = vmatpush.bf16.msrb.mxu3 %v6691_v3 }
 0x561   : > { %4853 = vmatpush.bf16.msra.mxu1 %v6687_v58  ;;  %v6701_v58 = vld [vmem:[%s10005_s5 + $0xd0] sm:$0xff] }
 0x564   : > { %4723 = vmatpush.bf16.msra.mxu0 %v9579_v40  ;;  %v6679_v40 = vld [vmem:[%s10005_s5 + $0x20] sm:$0xff]  ;;  %5287 = vmatpush.bf16.msra.mxu3 %v6722_v63  ;;  %v6742_v63 = vld [vmem:[%s10005_s5 + $0x218] sm:$0xff] }
 0x565   : > { %4921 = vmatpush.bf16.msra.mxu2 %v6679_v40  ;;  %4854 = vmatpush.bf16.msra.mxu1 %v6686_v37 }
 0x568   : > { %4724 = vmatpush.bf16.msra.mxu0 %v9543_v17  ;;  %v6673_v17 = vld [vmem:[%s10007_s7 + $0x14] sm:$0xf]  ;;  %5288 = vmatpush.bf16.msra.mxu3 %v6721_v43 }
 0x569   : > { %v6281_v34 = vor.u32 %v6673_v17, %v6278_v59  ;;  %4922 = vmatpush.bf16.msra.mxu2 %v6678_v49  ;;  %4855 = vmatpush.bf16.msra.mxu1 %v6685_v6  ;;  %v6746_v59 = vld [vmem:[%s10005_s5 + $0x238] sm:$0xff]  ;;  %v6745_v49 = vld [vmem:[%s10005_s5 + $0x230] sm:$0xff] }
 0x56b   : > { %6282 = vmatmul.msk.bf16.vlgmr.msra.gmra.mxu0 %vm4677_vm9, %v6273_v15 }
 0x56c   : > { %5380 = vmatpush.bf16.msrb.mxu0 %v6730_v10  ;;  %5289 = vmatpush.bf16.msra.mxu3 %v6720_v51 }
 0x56d   : > { %4923 = vmatpush.bf16.msra.mxu2 %v6677_v4  ;;  %4856 = vmatpush.bf16.msra.mxu1 %v6684_v54  ;;  %v6738_v54 = vld [vmem:[%s10005_s5 + $0x1f8] sm:$0xff] }
 0x570   : > { %5381 = vmatpush.bf16.msrb.mxu0 %v6729_v60  ;;  %5290 = vmatpush.bf16.msra.mxu3 %v6719_v45 }
 0x571   : > { %4924 = vmatpush.bf16.msra.mxu2 %v6676_v22  ;;  %4857 = vmatpush.bf16.msra.mxu1 %v6683_v27  ;;  %v6699_v22 = vld [vmem:[%s10005_s5 + $0xc0] sm:$0xff] }
 0x572   : > { %v6743_v27 = vld [vmem:[%s10005_s5 + $0x220] sm:$0xff] }
 0x574   : > { %5382 = vmatpush.bf16.msrb.mxu0 %v6728_v26  ;;  %5291 = vmatpush.bf16.msra.mxu3 %v6718_v48  ;;  %v6733_v48 = vld [vmem:[%s10005_s5 + $0x1d0] sm:$0xff] }
 0x575   : > { %4925 = vmatpush.bf16.msra.mxu2 %v6675_v13  ;;  %5098 = vmatpush.bf16.msrb.mxu1 %v6706_v61 }
 0x578   : > { %5383 = vmatpush.bf16.msrb.mxu0 %v6727_v55  ;;  %v6737_v55 = vld [vmem:[%s10005_s5 + $0x1f0] sm:$0xff] }
 0x579   : > { %5198 = vmatpush.bf16.msrb.mxu2 %v6714_v57  ;;  %5099 = vmatpush.bf16.msrb.mxu1 %v6705_v38 }
 0x57b   : > { %6283 = vmatmul.msk.bf16.gmra.mxu0 %vm4677_vm9, %v6281_v34  ;;  %v6717_v34 = vld [vmem:[%s10005_s5 + $0x150] sm:$0xff] }
 0x57c   : > { %5384 = vmatpush.bf16.msrb.mxu0 %v6726_v14  ;;  %5292 = vmatpush.bf16.msra.mxu3 %v6717_v34 }
 0x57d   : > { %5199 = vmatpush.bf16.msrb.mxu2 %v6713_v32  ;;  %5100 = vmatpush.bf16.msrb.mxu1 %v6704_v7 }
 0x580   : > { %5385 = vmatpush.bf16.msrb.mxu0 %v6725_v25  ;;  %5293 = vmatpush.bf16.msra.mxu3 %v6716_v47  ;;  %v6741_v25 = vld [vmem:[%s10005_s5 + $0x210] sm:$0xff] }
 0x581   : > { %5200 = vmatpush.bf16.msrb.mxu2 %v6712_v52  ;;  %5101 = vmatpush.bf16.msrb.mxu1 %v6703_v62 }
 0x584   : > { %5386 = vmatpush.bf16.msrb.mxu0 %v6724_v50 }
 0x585   : > { %5201 = vmatpush.bf16.msrb.mxu2 %v6711_v5  ;;  %5102 = vmatpush.bf16.msrb.mxu1 %v6702_v9  ;;  %v6732_v9 = vld [vmem:[%s10005_s5 + $0x1c8] sm:$0xff] }
 0x588   : > { %5387 = vmatpush.bf16.msrb.mxu0 %v6723_v41 }
 0x589   : > { %5202 = vmatpush.bf16.msrb.mxu2 %v6710_v11  ;;  %5103 = vmatpush.bf16.msrb.mxu1 %v6701_v58 }
 0x58b   : > { %6284 = vmatmul.msk.bf16.gmra.mxu0 %vm4677_vm9, %v4673_v28 }
 0x58d   : > { %5203 = vmatpush.bf16.msrb.mxu2 %v6709_v0 }
 0x591   : > { %5204 = vmatpush.bf16.msrb.mxu2 %v6708_v23 }
 0x595   : > { %5205 = vmatpush.bf16.msrb.mxu2 %v6707_v2  ;;  %v6731_v2 = vld [vmem:[%s10005_s5 + $0x1c0] sm:$0xff] }
 0x5be   : > { %v9677_v56 = vpop.f32.mrf.mxu3 }
 0x5c6   : > { %v9691_v8 = vpop.f32.mrf.mxu3 }
 0x5ce   : > { %v9714_v1 = vpop.f32.mrf.mxu3 }
 0x5d6   : > { %v9752_v12 = vpop.f32.mrf.mxu3 }
 0x5de   : > { %v9778_v16 = vpop.f32.mrf.mxu3 }
 0x5e6   : > { %v4715_v21 = vpop.f32.mrf.mxu3 }
 0x5e8   : > { %v4726_v19 = vpop.f32.mrf.mxu0 }
 0x5e9   : > { %v4727_v53 = vadd.f32 %v4726_v19, %v9677_v56  ;;  %v6700_v56 = vld [vmem:[%s10005_s5 + $0xc8] sm:$0xff] }
 0x5ea   : > { %5104 = vmatpush.bf16.msrb.mxu1 %v6700_v56  ;;  %v6736_v19 = vld [vmem:[%s10005_s5 + $0x1e8] sm:$0xff] }
 0x5eb   : > { %v4740_v18 = vpack.c.bf16 %v4727_v53, %v4727_v53  ;;  %v6735_v53 = vld [vmem:[%s10005_s5 + $0x1e0] sm:$0xff] }
 0x5ed   : > { %v4780_v46 = vunpack.c.l.b16 %v4740_v18 }
 0x5ee   : > { %5105 = vmatpush.bf16.msrb.mxu1 %v6699_v22 }
 0x5f0   : > { %v4728_v20 = vpop.f32.mrf.mxu0 }
 0x5f1   : > { %v4729_v30 = vadd.f32 %v4728_v20, %v9691_v8 }
 0x5f3   : > { %v4741_v35 = vpack.c.bf16 %v4729_v30, %v4729_v30  ;;  %v6740_v30 = vld [vmem:[%s10005_s5 + $0x208] sm:$0xff] }
 0x5f5   : > { %v9806_v42 = vunpack.c.l.b16 %v4741_v35  ;;  %v6734_v35 = vld [vmem:[%s10005_s5 + $0x1d8] sm:$0xff] }
 0x5f7   : > { %v9815_v15 = vpack.c.b16 %v9806_v42, %v4780_v46  ;;  %v6739_v46 = vld [vmem:[%s10005_s5 + $0x200] sm:$0xff] }
 0x5f8   : > { %v4731_v40 = vpop.f32.mrf.mxu0 }
 0x5f9   : > { %v4732_v17 = vadd.f32 %v4731_v40, %v9714_v1  ;;  %4926 = vmatmul.bf16.vlgmr.msra.gmra.mxu2 %v9815_v15  ;;  %v4788_v28 = vshll.u32 %v9815_v15, 16  ;;  %v4786_v4 = vshrl.u32 %v9815_v15, 16  ;;  %v4952_v13 = vrot.slane %v9815_v15, 1  ;;  %v6715_v1 = vld [vmem:[%s10005_s5 + $0x140] sm:$0xff] }
 0x5fa   : > { %5574 = vmatpush.bf16.msra.mxu2 %v6746_v59  ;;  %5294 = vmatpush.bf16.msra.mxu3 %v6715_v1  ;;  %v5045_v58 = vrot.slane %v9815_v15, 3 }
 0x5fb   : > { %v4742_v24 = vpack.c.bf16 %v4732_v17, %v4732_v17  ;;  %v4790_v8 = vrot.slane %v4788_v28, 1  ;;  %v5136_v62 = vrot.slane %v4786_v4, 3  ;;  %v5137_v18 = vrot.slane %v4788_v28, 4 }
 0x5fd   : > { %v4782_v29 = vunpack.c.l.b16 %v4742_v24  ;;  %v4791_v60 = vor.u32 %v4790_v8, %v4786_v4  ;;  %v5138_v21 = vor.u32 %v5137_v18, %v5136_v62 }
 0x5fe   : > { %5575 = vmatpush.bf16.msra.mxu2 %v6745_v49 }
 0x5ff   : > { %v4784_v31 = vpack.c.b16 %v4782_v29, %v4782_v29  ;;  %v5235_v38 = vpack.c.b16 %v4782_v29, %v9806_v42 }
 0x600   : > { %v4733_v36 = vpop.f32.mrf.mxu0 }
 0x601   : > { %v4793_v39 = vshll.u32 %v4784_v31, 16  ;;  %v4734_v10 = vadd.f32 %v4733_v36, %v9752_v12  ;;  %v4953_v37 = vrot.slane %v4784_v31, 1  ;;  %v5327_v50 = vrot.slane %v5235_v38, 2 }
 0x602   : > { %5576 = vmatpush.bf16.msra.mxu2 %v6744_v44  ;;  %v4797_v20 = vshrl.u32 %v4784_v31, 16  ;;  %v5521_v24 = vrot.slane %v5235_v38, 3  ;;  %v5418_v15 = vshrl.u32 %v5235_v38, 16  ;;  %v5421_v47 = vshll.u32 %v5235_v38, 16 }
 0x603   : > { %v4795_v57 = vrot.slane %v4793_v39, 1  ;;  %v4743_v6 = vpack.c.bf16 %v4734_v10, %v4734_v10  ;;  %v4954_v33 = vsel %vm2641_vm5, %v4952_v13, %v4953_v37 }
 0x604   : > { %5013 = vmatmul.bf16.vlgmr.msrb.gmra.mxu3 %v4954_v33  ;;  %v5420_v8 = vrot.slane %v5418_v15, 2  ;;  %v5423_v4 = vrot.slane %v5421_v47, 3  ;;  %v5650_v47 = vld [vmem:[%s10008_s8 + $0x28] sm:$0xff] }
 0x605   : > { %v4796_v26 = vsel %vm2212_vm3, %v4791_v60, %v4795_v57  ;;  %v9855_v32 = vunpack.c.l.b16 %v4743_v6  ;;  %v4799_v41 = vor.u32 %v4797_v20, %v4795_v57  ;;  %v5657_v20 = vld [vmem:[%s10008_s8 + $0x60] sm:$0xff] }
 0x606   : > { %4858 = vmatmul.bf16.vlgmr.msra.gmra.mxu1 %v4796_v26  ;;  %5577 = vmatpush.bf16.msra.mxu2 %v6743_v27  ;;  %v5424_v22 = vor.u32 %v5423_v4, %v5420_v8  ;;  %v7000_v8 = vld [vmem:[%s10006_s6] ss:$0 sm:$0xff]  ;;  %v5648_v4 = vld [vmem:[%s10008_s8 + $0x18] sm:$0xff] }
 0x607   : > { %v5044_v3 = vpack.c.b16 %v9855_v32, %v4782_v29  ;;  %5484 = vmatpush.bf16.msra.mxu1 %v6738_v54  ;;  %v5236_v59 = vpack.c.b16 %v9855_v32, %v9855_v32 }
 0x608   : > { %v4736_v52 = vpop.f32.mrf.mxu0 }
 0x609   : > { %4931 = vmatmul.bf16.gmra.mxu2 %v4784_v31  ;;  %v4737_v12 = vadd.f32 %v4736_v52, %v9778_v16  ;;  %v5140_v61 = vshrl.u32 %v5044_v3, 16  ;;  %v5143_v5 = vshll.u32 %v5044_v3, 16  ;;  %v5046_v40 = vrot.slane %v5044_v3, 3 }
 0x60a   : > { %5578 = vmatpush.bf16.msra.mxu2 %v6742_v63 }
 0x60b   : > { %v4744_v14 = vpack.c.bf16 %v4737_v12, %v4737_v12  ;;  %5485 = vmatpush.bf16.msra.mxu1 %v6737_v55  ;;  %v5142_v16 = vrot.slane %v5140_v61, 3  ;;  %v5145_v7 = vrot.slane %v5143_v5, 4  ;;  %v5047_v17 = vsel %vm3343_vm6, %v5045_v58, %v5046_v40 }
 0x60d   : > { %v5325_v43 = vunpack.c.l.b16 %v4744_v14  ;;  %v5146_v23 = vor.u32 %v5145_v7, %v5142_v16 }
 0x60e   : > { %5579 = vmatpush.bf16.msra.mxu2 %v6741_v25 }
 0x60f   : > { %v5326_v11 = vpack.c.b16 %v5325_v43, %v9855_v32  ;;  %5486 = vmatpush.bf16.msra.mxu1 %v6736_v19  ;;  %v5147_v42 = vsel %vm5135_vm10, %v5138_v21, %v5146_v23  ;;  %v5655_v21 = vld [vmem:[%s10008_s8 + $0x50] sm:$0xff] }
 0x610   : > { %v4738_v51 = vpop.f32.mrf.mxu0 }
 0x611   : > { %v5328_v0 = vrot.slane %v5326_v11, 2  ;;  %v5522_v34 = vrot.slane %v5326_v11, 3  ;;  %v5426_v56 = vshrl.u32 %v5326_v11, 16  ;;  %v5429_v29 = vshll.u32 %v5326_v11, 16  ;;  %v5660_v11 = vld [vmem:[%s10008_s8 + $0x78] sm:$0xff] }
 0x612   : > { %5580 = vmatpush.bf16.msra.mxu2 %v6740_v30  ;;  %5662 = vmatpush.msrb.mxu3 %v5660_v11  ;;  %v5656_v30 = vld [vmem:[%s10008_s8 + $0x58] sm:$0xff] }
 0x613   : > { %v5329_v45 = vsel %vm510_vm1, %v5327_v50, %v5328_v0  ;;  %5487 = vmatpush.bf16.msra.mxu1 %v6735_v53  ;;  %v5523_v28 = vsel %vm3343_vm6, %v5521_v24, %v5522_v34  ;;  %v5428_v49 = vrot.slane %v5426_v56, 2  ;;  %v5431_v31 = vrot.slane %v5429_v29, 3  ;;  %v5659_v53 = vld [vmem:[%s10008_s8 + $0x70] sm:$0xff]  ;;  %v5658_v50 = vld [vmem:[%s10008_s8 + $0x68] sm:$0xff] }
 0x614   : > { %5018 = vmatmul.bf16.gmra.mxu3 %v4953_v37  ;;  %5388 = vmatmul.bf16.vlgmr.msrb.gmra.mxu0 %v5329_v45  ;;  %v5651_v56 = vld [vmem:[%s10008_s8 + $0x30] sm:$0xff] }
 0x615   : > { %v5432_v36 = vor.u32 %v5431_v31, %v5428_v49  ;;  %5663 = vmatpush.msrb.mxu3 %v5659_v53  ;;  %v5649_v49 = vld [vmem:[%s10008_s8 + $0x20] sm:$0xff] }
 0x616   : > { %4863 = vmatmul.bf16.gmra.mxu1 %v4799_v41  ;;  %5581 = vmatpush.bf16.msra.mxu2 %v6739_v46 }
 0x617   : > { %5488 = vmatpush.bf16.msra.mxu1 %v6734_v35  ;;  %v5433_v39 = vsel %vm3087_vm4, %v5424_v22, %v5432_v36  ;;  %5664 = vmatpush.msrb.mxu3 %v5658_v50 }
 0x619   : > { %5206 = vmatmul.bf16.vlgmr.msrb.gmra.mxu2 %v5147_v42  ;;  %5665 = vmatpush.msrb.mxu3 %v5657_v20  ;;  %v5654_v42 = vld [vmem:[%s10008_s8 + $0x48] sm:$0xff] }
 0x61b   : > { %5489 = vmatpush.bf16.msra.mxu1 %v6733_v48  ;;  %5666 = vmatpush.msrb.mxu3 %v5656_v30 }
 0x61d   : > { %5667 = vmatpush.msrb.mxu3 %v5655_v21 }
 0x61f   : > { %5490 = vmatpush.bf16.msra.mxu1 %v6732_v9  ;;  %5668 = vmatpush.msrb.mxu3 %v5654_v42  ;;  %v5653_v9 = vld [vmem:[%s10008_s8 + $0x40] sm:$0xff] }
 0x620   : > { %v5661_v42 = vld [vmem:[%s10009_s9] sm:$0x1] }
 0x621   : > { %5669 = vmatpush.msrb.mxu3 %v5653_v9 }
 0x623   : > { %5491 = vmatpush.bf16.msra.mxu1 %v6731_v2 }
 0x624   : > { %5295 = vmatmul.bf16.vlgmr.msra.gmra.mxu3 %v5235_v38  ;;  %5393 = vmatmul.bf16.gmra.mxu0 %v5328_v0 }
 0x626   : > { %5106 = vmatmul.bf16.vlgmr.msrb.gmra.mxu1 %v5047_v17  ;;  %v5652_v17 = vld [vmem:[%s10008_s8 + $0x38] sm:$0xff] }
 0x627   : > { %5670 = vmatpush.msrb.mxu3 %v5652_v17 }
 0x629   : > { %5211 = vmatmul.bf16.gmra.mxu2 %v5146_v23  ;;  %5671 = vmatpush.msrb.mxu3 %v5651_v56 }
 0x62b   : > { %5672 = vmatpush.msrb.mxu3 %v5650_v47 }
 0x62d   : > { %5673 = vmatpush.msrb.mxu3 %v5649_v49 }
 0x62f   : > { %5674 = vmatpush.msrb.mxu3 %v5648_v4 }
 0x634   : > { %5300 = vmatmul.bf16.gmra.mxu3 %v5236_v59 }
 0x636   : > { %5111 = vmatmul.bf16.gmra.mxu1 %v5046_v40 }
 0x639   : > { %5582 = vmatmul.bf16.vlgmr.msra.gmra.mxu2 %v5523_v28 }
 0x646   : > { %5492 = vmatmul.bf16.vlgmr.msra.gmra.mxu1 %v5433_v39  ;;  %v5647_v39 = vld [vmem:[%s10008_s8 + $0x10] sm:$0xff] }
 0x647   : > { %5675 = vmatpush.msrb.mxu3 %v5647_v39 }
 0x649   : > { %5587 = vmatmul.bf16.gmra.mxu2 %v5522_v34 }
 0x656   : > { %5497 = vmatmul.bf16.gmra.mxu1 %v5432_v36 }
 0x67c   : > { %v4927_v10 = vpop.f32.mrf.mxu2 }
 0x683   : > { %v4859_v13 = vpop.f32.mrf.mxu1 }
 0x684   : > { %v4928_v37 = vadd.f32 %v4927_v10, %v4859_v13  ;;  %v4929_v1 = vpop.f32.mrf.mxu2 }
 0x687   : > { %v5014_v44 = vpop.f32.mrf.mxu3 }
 0x688   : > { %v5023_v60 = vadd.f32 %v5014_v44, %v4928_v37  ;;  %v5646_v44 = vld [vmem:[%s10008_s8 + $0x8] sm:$0xff] }
 0x689   : > { %5676 = vmatpush.msrb.mxu3 %v5646_v44 }
 0x68b   : > { %v4861_v57 = vpop.f32.mrf.mxu1 }
 0x68c   : > { %v4932_v6 = vpop.f32.mrf.mxu2  ;;  %v4930_v62 = vadd.f32 %v4929_v1, %v4861_v57 }
 0x68f   : > { %v5016_v33 = vpop.f32.mrf.mxu3 }
 0x690   : > { %v5024_v41 = vadd.f32 %v5016_v33, %v4930_v62 }
 0x691   : > { %v5389_v26 = vpop.f32.mrf.mxu0 }
 0x693   : > { %v4864_v32 = vpop.f32.mrf.mxu1 }
 0x694   : > { %v4934_v54 = vpop.f32.mrf.mxu2  ;;  %v4933_v2 = vadd.f32 %v4932_v6, %v4864_v32  ;;  %v5645_v6 = vld [vmem:[%s10008_s8] sm:$0xff] }
 0x695   : > { %5677 = vmatpush.msrb.mxu3 %v5645_v6 }
 0x697   : > { %v5019_v27 = vpop.f32.mrf.mxu3 }
 0x698   : > { %v5025_v34 = vadd.f32 %v5019_v27, %v4933_v2 }
 0x699   : > { %v5391_v3 = vpop.f32.mrf.mxu0 }
 0x69b   : > { %v4866_v55 = vpop.f32.mrf.mxu1 }
 0x69c   : > { %v5207_v52 = vpop.f32.mrf.mxu2 }
 0x69f   : > { %v5021_v12 = vpop.f32.mrf.mxu3 }
 0x6a1   : > { %v9907_v63 = vpop.f32.mrf.mxu0 }
 0x6a3   : > { %v5107_v14 = vpop.f32.mrf.mxu1 }
 0x6a4   : > { %v5209_v61 = vpop.f32.mrf.mxu2  ;;  %v5116_v51 = vadd.f32 %v5107_v14, %v5023_v60 }
 0x6a6   : > { %v5216_v18 = vadd.f32 %v5207_v52, %v5116_v51 }
 0x6a7   : > { %v5296_v5 = vpop.f32.mrf.mxu3 }
 0x6a8   : > { %v5305_v46 = vadd.f32 %v5296_v5, %v5216_v18 }
 0x6a9   : > { %v5396_v19 = vpop.f32.mrf.mxu0 }
 0x6aa   : > { %v5398_v58 = vadd.f32 %v5389_v26, %v5305_v46 }
 0x6ab   : > { %v5109_v38 = vpop.f32.mrf.mxu1 }
 0x6ac   : > { %v5212_v43 = vpop.f32.mrf.mxu2  ;;  %v5117_v35 = vadd.f32 %v5109_v38, %v5024_v41 }
 0x6ae   : > { %v5217_v40 = vadd.f32 %v5209_v61, %v5117_v35 }
 0x6af   : > { %v5298_v25 = vpop.f32.mrf.mxu3 }
 0x6b0   : > { %v5306_v15 = vadd.f32 %v5298_v25, %v5217_v40 }
 0x6b2   : > { %v5399_v22 = vadd.f32 %v5391_v3, %v5306_v15 }
 0x6b3   : > { %v5112_v16 = vpop.f32.mrf.mxu1 }
 0x6b4   : > { %v5214_v7 = vpop.f32.mrf.mxu2  ;;  %v5118_v29 = vadd.f32 %v5112_v16, %v5025_v34 }
 0x6b6   : > { %v5218_v36 = vadd.f32 %v5212_v43, %v5118_v29 }
 0x6b7   : > { %v5301_v0 = vpop.f32.mrf.mxu3 }
 0x6b8   : > { %v5307_v57 = vadd.f32 %v5301_v0, %v5218_v36 }
 0x6ba   : > { %v5400_v54 = vadd.f32 %v9907_v63, %v5307_v57 }
 0x6bb   : > { %v5114_v45 = vpop.f32.mrf.mxu1 }
 0x6bc   : > { %v5583_v23 = vpop.f32.mrf.mxu2 }
 0x6bf   : > { %v5303_v48 = vpop.f32.mrf.mxu3 }
 0x6c3   : > { %v5493_v59 = vpop.f32.mrf.mxu1 }
 0x6c4   : > { %v5502_v24 = vadd.f32 %v5493_v59, %v5398_v58  ;;  %v5585_v28 = vpop.f32.mrf.mxu2 }
 0x6c6   : > { %v5592_v31 = vadd.f32 %v5583_v23, %v5502_v24 }
 0x6c8   : > { %v5599_v13 = vadd.f32 %v7000_v8, %v5592_v31 }
 0x6ca   : > { %v5602_v33 = vmax.f32 %v5599_v13, 0.0 }
 0x6cb   : > { %v5495_v10 = vpop.f32.mrf.mxu1 }
 0x6cc   : > { %v5503_v37 = vadd.f32 %v5495_v10, %v5399_v22  ;;  %v5588_v1 = vpop.f32.mrf.mxu2  ;;  %v5607_v3 = vrot.slane %v5602_v33, 1 }
 0x6ce   : > { %v5593_v60 = vadd.f32 %v5585_v28, %v5503_v37 }
 0x6d0   : > { %v5600_v26 = vadd.f32 %v7000_v8, %v5593_v60 }
 0x6d2   : > { %v5603_v32 = vmax.f32 %v5600_v26, 0.0 }
 0x6d3   : > { %v5498_v27 = vpop.f32.mrf.mxu1 }
 0x6d4   : > { %v5608_v55 = vrot.slane %v5603_v32, 1  ;;  %v5504_v52 = vadd.f32 %v5498_v27, %v5400_v54  ;;  %v5590_v12 = vpop.f32.mrf.mxu2 }
 0x6d6   : > { %v5609_v14 = vsel %vm2641_vm5, %v5607_v3, %v5608_v55  ;;  %v5594_v61 = vadd.f32 %v5588_v1, %v5504_v52  ;;  %v5613_v50 = vmax.f32 %v5603_v32, %v5608_v55 }
 0x6d7   : > { %v5612_v5 = vmax.f32 %v5602_v33, %v5609_v14 }
 0x6d8   : > { %v5601_v19 = vadd.f32 %v7000_v8, %v5594_v61 }
 0x6d9   : > { %v5624_v63 = vrot.slane %v5612_v5, 6 }
 0x6da   : > { %v5604_v38 = vmax.f32 %v5601_v19, 0.0 }
 0x6db   : > { %v5500_v43 = vpop.f32.mrf.mxu1 }
 0x6dc   : > { %v5615_v25 = vrot.slane %v5604_v38, 1 }
 0x6de   : > { %v5616_v11 = vsel %vm2641_vm5, %v5608_v55, %v5615_v25  ;;  %v5620_v16 = vmax.f32 %v5604_v38, %v5615_v25 }
 0x6df   : > { %v5619_v7 = vmax.f32 %v5603_v32, %v5616_v11 }
 0x6e0   : > { %v5627_v53 = vrot.slane %v5620_v16, 6 }
 0x6e1   : > { %v5625_v51 = vrot.slane %v5619_v7, 6 }
 0x6e3   : > { %v5626_v0 = vsel %vm4688_vm8, %v5624_v63, %v5625_v51  ;;  %v5628_v20 = vsel %vm4688_vm8, %v5625_v51, %v5627_v53 }
 0x6e4   : > { %v5631_v62 = vmax.f32 %v5612_v5, %v5626_v0  ;;  %v5632_v18 = vmax.f32 %v5613_v50, %v5628_v20 }
 0x6e6   : > { %v5634_v30 = vrot.slane %v5631_v62, 2  ;;  %v5638_v45 = vrot.slane %v5632_v18, 4  ;;  %v5641_v23 = vrot.slane %v5632_v18, 6 }
 0x6e8   : > { %v5636_v41 = vadd.f32 %v5634_v30, %v5631_v62 }
 0x6ea   : > { %v5640_v21 = vadd.f32 %v5638_v45, %v5636_v41 }
 0x6ec   : > { %v5643_v35 = vadd.f32 %v5641_v23, %v5640_v21 }
 0x6ee   : > { %v5644_v46 = vmul.f32 0.25, %v5643_v35 }
 0x6f0   : > { %5678 = vmatmul.f32.vlgmr.msrb.gmra.mxu3 %v5644_v46 }
 0x773   : > { %v5679_v48 = vpop.f32.mrf.mxu3 }
 0x774   : > { %v5680_v9 = vadd.f32 %v5679_v48, %v5661_v42 }
 0x776   : > { %5682 = vst [vmem:[%s351_s11] sm:$0x1] %v5680_v9 }
 0x777   : > { %7031 = shalt.err (!%p7028_p3)
}
 0x778   : > { %6958 = dma.vmem_to_hbm [thread:$0]  (%p7162_p5), %s5695_s12, 16, %s5697_s20, %s5684_s21  }
 0x779 PF: > { %p6964_p4 = scmp.ge.s32.totalorder %s7066_s16, 2  ;;  %s5708_s26 = sand.u32 1, %s7054_s13  }
 0x77a   : > { %s5709_s30 = scalar_lea.sflag [#allocation3], %s5708_s26 }
 0x77b   : > { %p6961_p7 = pnand %p6964_p4, %p7166_p6 }
 0x77d   : > { %p6962_p8 = pneg %p6961_p7 }
 0x77f   : > { %7049 = dma.done.wait (%p6962_p8), %s5709_s30, 16  }
 0x780   : > { %7051 = vsyncadd (%p6962_p8), %s5709_s30, 4294967280  ;;  %p20_p9 = scmp.ge.s32.totalorder %s7149_s19, 4   ;;  %s10496_s13 = smov %s7058_s14 }
 0x781   : > { %s10497_s14 = smov %s7062_s15  ;;  %s10498_s15 = smov %s7160_s22 }
 0x782   : > { %s10499_s16 = smov %s7149_s19  ;;  %22 = sbr.rel (!%p20_p9) target bundleno = 5 (0x5), region = 95 }
 0x787   :  { %5714 = vsyncpa [#allocation3], 1 }
 0x788   :  { %5716 = vsyncpa [#allocation3 + $0x1], 1 }

</bundles_post_ra>
